<compile_context>
chip_gen: v7x
topology: tpu7x:2x2x1
jax: 0.10.0
libtpu: 0.0.40
codegen_flags: <defaults>
</compile_context>

<pallas_src>
import functools

import jax
import jax.numpy as jnp
import numpy as np
from jax import lax
from jax.experimental import pallas as pl
from jax.experimental.pallas import tpu as pltpu


def _conv_bn_relu(xpad, w_slab, scale, shift, *, H, W, C, K):
    """One conv+BN+ReLU as a single matmul.

    xpad:   (H+2P, W+2P, C) value in compute dtype (zero-padded).
    w_slab: (K*K*C_in, C_out) weight slab in compute dtype (HWIO flattening).
    scale/shift: (1, C) f32 folded bias+BN.
    Returns (H, W, C) f32.
    """
    # im2col: concatenate the K*K shifted views along the lane (channel) axis,
    # then a single reshape (hoisted out of the tap loop) and one MXU matmul.
    taps = [xpad[kh:kh + H, kw:kw + W, :] for kh in range(K) for kw in range(K)]
    patches = jnp.concatenate(taps, axis=-1).reshape(H * W, K * K * C)
    acc = jnp.dot(patches, w_slab, preferred_element_type=jnp.float32)
    y = acc * scale + shift                       # folded bias + BN (f32)
    return jnp.maximum(y, 0.0).reshape(H, W, C)   # ReLU


def _resblock_kernel(x_ref, w1_ref, s1_ref, t1_ref, w2_ref, s2_ref, t2_ref,
                     o_ref, pad_ref, *, H, W, C, K, P):
    Hp, Wp = H + 2 * P, W + 2 * P
    cdt = pad_ref.dtype

    # Zero only the P-wide border strips of the padded scratch; the interior is
    # fully overwritten below.  (Every step, for multi-core safety; see header.)
    pad_ref[0:P, :, :] = jnp.zeros((P, Wp, C), cdt)
    pad_ref[P + H:Hp, :, :] = jnp.zeros((P, Wp, C), cdt)
    pad_ref[P:P + H, 0:P, :] = jnp.zeros((H, P, C), cdt)
    pad_ref[P:P + H, P + W:Wp, :] = jnp.zeros((H, P, C), cdt)

    # conv1 -> BN -> ReLU (operands in input dtype, f32 accumulation).
    x = x_ref[0]                                   # (H, W, C), single HBM read
    pad_ref[P:P + H, P:P + W, :] = x
    h1 = _conv_bn_relu(pad_ref[...], w1_ref[...], s1_ref[...], t1_ref[...],
                       H=H, W=W, C=C, K=K)

    # conv2 -> BN -> ReLU, reusing the SAME padded scratch (border stays zero).
    pad_ref[P:P + H, P:P + W, :] = h1.astype(cdt)
    h2 = _conv_bn_relu(pad_ref[...], w2_ref[...], s2_ref[...], t2_ref[...],
                       H=H, W=W, C=C, K=K)

    # Residual skip (reuses the already-resident input block) and store.
    o_ref[0] = (h2 + x.astype(jnp.float32)).astype(o_ref.dtype)


def residual_block_nhwc(x_nhwc, w1, s1, t1, w2, s2, t2, *, K, P):
    """x_nhwc: (N, H, W, C). w*: (K*K*C_in, C_out). s*/t*: (1, C) f32."""
    N, H, W, C = x_nhwc.shape
    Hp, Wp = H + 2 * P, W + 2 * P

    kernel = functools.partial(_resblock_kernel, H=H, W=W, C=C, K=K, P=P)
    img_map = lambda n: (n, 0, 0, 0)
    full2 = lambda n: (0, 0)

    return pl.pallas_call(
        kernel,
        out_shape=jax.ShapeDtypeStruct((N, H, W, C), x_nhwc.dtype),
        grid_spec=pltpu.PrefetchScalarGridSpec(
            num_scalar_prefetch=0,
            grid=(N,),
            in_specs=[
                pl.BlockSpec((1, H, W, C), img_map),       # input (also skip)
                pl.BlockSpec((K * K * C, C), full2),       # conv1 weight slab
                pl.BlockSpec((1, C), full2),               # scale1
                pl.BlockSpec((1, C), full2),               # shift1
                pl.BlockSpec((K * K * C, C), full2),       # conv2 weight slab
                pl.BlockSpec((1, C), full2),               # scale2
                pl.BlockSpec((1, C), full2),               # shift2
            ],
            out_specs=pl.BlockSpec((1, H, W, C), img_map),
            scratch_shapes=[pltpu.VMEM((Hp, Wp, C), x_nhwc.dtype)],
        ),
        compiler_params=pltpu.CompilerParams(
            dimension_semantics=("parallel",),
            # Explicit scoped-VMEM limit: raises v5e's 16 MiB default, safe on
            # v6e (128 MiB phys) and v7x (64 MiB phys per TC).
            vmem_limit_bytes=32 * 1024 * 1024,
        ),
    )(x_nhwc, w1, s1, t1, w2, s2, t2)


def _fold_bn(bias, gamma, beta, mean, var, eps=1e-5):
    """Fold conv bias + eval-mode BatchNorm into per-channel scale/shift (f32)."""
    inv_std = 1.0 / jnp.sqrt(var.astype(jnp.float32) + eps)
    scale = gamma.astype(jnp.float32) * inv_std
    shift = (bias.astype(jnp.float32) - mean.astype(jnp.float32)) * scale \
        + beta.astype(jnp.float32)
    return scale.reshape(1, -1), shift.reshape(1, -1)


def prepare_resblock_params(params, *, K, compute_dtype):
    """One-time (outside the hot path) weight prep: OIHW -> (K*K*C_in, C_out)
    slabs in compute dtype, plus folded f32 BN scale/shift."""
    (w1_oihw, b1, g1, be1, m1, v1,
     w2_oihw, b2, g2, be2, m2, v2) = params
    c_in = w1_oihw.shape[1]

    def slab(w_oihw):
        # OIHW -> HWIO -> (K*K*C_in, C_out); tap order (kh, kw, c_in) matches
        # the im2col concatenation order in the kernel.
        c_out = w_oihw.shape[0]
        return (jnp.transpose(w_oihw, (2, 3, 1, 0))
                .reshape(K * K * c_in, c_out).astype(compute_dtype))

    s1, t1 = _fold_bn(b1, g1, be1, m1, v1)
    s2, t2 = _fold_bn(b2, g2, be2, m2, v2)
    return slab(w1_oihw), s1, t1, slab(w2_oihw), s2, t2


def residual_block_nchw(x_nchw, prepared, *, K, P):
    """PyTorch-convention entry point (NCHW in / NCHW out).
    NOTE: if this block feeds an NHWC pipeline, call residual_block_nhwc
    directly and drop these transposes (each is a full HBM read+write pass)."""
    w1, s1, t1, w2, s2, t2 = prepared
    x_nhwc = jnp.transpose(x_nchw, (0, 2, 3, 1))
    out_nhwc = residual_block_nhwc(x_nhwc, w1, s1, t1, w2, s2, t2, K=K, P=P)
    return jnp.transpose(out_nhwc, (0, 3, 1, 2))


def _reference_nchw(x_nchw, params, *, K, P, eps=1e-5):
    """Pure-JAX reference (lax.conv, eval-mode BN), matching the PyTorch module."""
    (w1_oihw, b1, g1, be1, m1, v1,
     w2_oihw, b2, g2, be2, m2, v2) = params

    def conv_bn_relu(x_nhwc, w_oihw, b, g, be, m, v):
        w_hwio = jnp.transpose(w_oihw, (2, 3, 1, 0))
        y = lax.conv_general_dilated(
            x_nhwc, w_hwio, window_strides=(1, 1),
            padding=[(P, P), (P, P)],
            dimension_numbers=("NHWC", "HWIO", "NHWC"))
        y = y + b.reshape(1, 1, 1, -1)
        y = (y - m.reshape(1, 1, 1, -1)) / jnp.sqrt(v.reshape(1, 1, 1, -1) + eps)
        y = y * g.reshape(1, 1, 1, -1) + be.reshape(1, 1, 1, -1)
        return jnp.maximum(y, 0.0)

    x_nhwc = jnp.transpose(x_nchw, (0, 2, 3, 1))
    h = conv_bn_relu(x_nhwc, w1_oihw, b1, g1, be1, m1, v1)
    h = conv_bn_relu(h, w2_oihw, b2, g2, be2, m2, v2)
    out = h + x_nhwc
    return jnp.transpose(out, (0, 3, 1, 2))


if __name__ == "__main__":
    N, C, H, W = 2, 4, 16, 16     # small shapes consistent with the module
    K, P = 3, 1                   # kernel_size=3, padding=1 ("same" conv)

    key = jax.random.PRNGKey(0)
    ks = jax.random.split(key, 12)

    w1 = 0.1 * jax.random.normal(ks[0], (C, C, K, K), jnp.float32)   # OIHW
    b1 = 0.1 * jax.random.normal(ks[1], (C,), jnp.float32)
    g1 = 1.0 + 0.1 * jax.random.normal(ks[2], (C,), jnp.float32)     # BN gamma
    be1 = 0.1 * jax.random.normal(ks[3], (C,), jnp.float32)          # BN beta
    m1 = 0.05 * jax.random.normal(ks[4], (C,), jnp.float32)          # running mean
    v1 = 1.0 + 0.1 * jnp.abs(jax.random.normal(ks[5], (C,), jnp.float32))  # running var

    w2 = 0.1 * jax.random.normal(ks[6], (C, C, K, K), jnp.float32)
    b2 = 0.1 * jax.random.normal(ks[7], (C,), jnp.float32)
    g2 = 1.0 + 0.1 * jax.random.normal(ks[8], (C,), jnp.float32)
    be2 = 0.1 * jax.random.normal(ks[9], (C,), jnp.float32)
    m2 = 0.05 * jax.random.normal(ks[10], (C,), jnp.float32)
    v2 = 1.0 + 0.1 * jnp.abs(jax.random.normal(ks[11], (C,), jnp.float32))

    params = (w1, b1, g1, be1, m1, v1, w2, b2, g2, be2, m2, v2)
    x = jax.random.normal(ks[5], (N, C, H, W), jnp.float32)          # NCHW like PyTorch

    # Weight prep happens once, outside the hot path.  Use x.dtype as the
    # matmul-operand dtype (pass bf16 activations/weights on v6e/v7x for the
    # fast MXU path; accumulation/epilogue stay f32 inside the kernel).
    prepared = prepare_resblock_params(params, K=K, compute_dtype=x.dtype)

    run = jax.jit(functools.partial(residual_block_nchw, K=K, P=P))
    out = jax.block_until_ready(run(x, prepared))

    ref = jax.block_until_ready(_reference_nchw(x, params, K=K, P=P))
    np.testing.assert_allclose(np.asarray(out), np.asarray(ref), rtol=1e-4, atol=1e-4)

    print("KERNEL_OK")
</pallas_src>

<mosaic_0001>
module attributes {stable_mosaic.version = 11 : i64} {
  func.func @_resblock_kernel(%arg0: i32, %arg1: memref<1x16x16x4xf32, #tpu.memory_space<vmem>>, %arg2: memref<36x4xf32, #tpu.memory_space<vmem>>, %arg3: memref<1x4xf32, #tpu.memory_space<vmem>>, %arg4: memref<1x4xf32, #tpu.memory_space<vmem>>, %arg5: memref<36x4xf32, #tpu.memory_space<vmem>>, %arg6: memref<1x4xf32, #tpu.memory_space<vmem>>, %arg7: memref<1x4xf32, #tpu.memory_space<vmem>>, %arg8: memref<1x16x16x4xf32, #tpu.memory_space<vmem>>, %arg9: memref<18x18x4xf32, #tpu.memory_space<vmem>>) attributes {dimension_semantics = [#tpu.dimension_semantics<parallel>], iteration_bounds = array<i64: 2>, scalar_prefetch = 0 : i64, scratch_operands = 1 : i64, tpu.core_type = #tpu.core_type<tc>, window_params = [{transform_indices = @transform_0, window_bounds = array<i64: 1, 16, 16, 4>}, {pipeline_mode = #tpu.pipeline_mode<synchronous>, transform_indices = @transform_1, window_bounds = array<i64: 36, 4>}, {pipeline_mode = #tpu.pipeline_mode<synchronous>, transform_indices = @transform_2, window_bounds = array<i64: 1, 4>}, {pipeline_mode = #tpu.pipeline_mode<synchronous>, transform_indices = @transform_3, window_bounds = array<i64: 1, 4>}, {pipeline_mode = #tpu.pipeline_mode<synchronous>, transform_indices = @transform_4, window_bounds = array<i64: 36, 4>}, {pipeline_mode = #tpu.pipeline_mode<synchronous>, transform_indices = @transform_5, window_bounds = array<i64: 1, 4>}, {pipeline_mode = #tpu.pipeline_mode<synchronous>, transform_indices = @transform_6, window_bounds = array<i64: 1, 4>}, {transform_indices = @transform_7, window_bounds = array<i64: 1, 16, 16, 4>}]} {
    %cst = arith.constant 0.000000e+00 : f32
    %0 = vector.broadcast %cst : f32 to vector<1x18x4xf32>
    %c0 = arith.constant 0 : index
    %c0_0 = arith.constant 0 : index
    %c0_1 = arith.constant 0 : index
    %1 = vector.load %arg9[%c0, %c0_0, %c0_1] : memref<18x18x4xf32, #tpu.memory_space<vmem>>, vector<1x18x4xf32>
    tpu.vector_store %arg9[%c0, %c0_0, %c0_1], %0 {strides = array<i32>} : memref<18x18x4xf32, #tpu.memory_space<vmem>>, vector<1x18x4xf32>,
    %cst_2 = arith.constant 0.000000e+00 : f32
    %2 = vector.broadcast %cst_2 : f32 to vector<1x18x4xf32>
    %c17 = arith.constant 17 : index
    %c0_3 = arith.constant 0 : index
    %c0_4 = arith.constant 0 : index
    %3 = vector.load %arg9[%c17, %c0_3, %c0_4] : memref<18x18x4xf32, #tpu.memory_space<vmem>>, vector<1x18x4xf32>
    tpu.vector_store %arg9[%c17, %c0_3, %c0_4], %2 {strides = array<i32>} : memref<18x18x4xf32, #tpu.memory_space<vmem>>, vector<1x18x4xf32>,
    %cst_5 = arith.constant 0.000000e+00 : f32
    %4 = vector.broadcast %cst_5 : f32 to vector<16x1x4xf32>
    %c1 = arith.constant 1 : index
    %c0_6 = arith.constant 0 : index
    %c0_7 = arith.constant 0 : index
    %5 = vector.load %arg9[%c1, %c0_6, %c0_7] : memref<18x18x4xf32, #tpu.memory_space<vmem>>, vector<16x1x4xf32>
    tpu.vector_store %arg9[%c1, %c0_6, %c0_7], %4 {strides = array<i32>} : memref<18x18x4xf32, #tpu.memory_space<vmem>>, vector<16x1x4xf32>,
    %cst_8 = arith.constant 0.000000e+00 : f32
    %6 = vector.broadcast %cst_8 : f32 to vector<16x1x4xf32>
    %c1_9 = arith.constant 1 : index
    %c17_10 = arith.constant 17 : index
    %c0_11 = arith.constant 0 : index
    %7 = vector.load %arg9[%c1_9, %c17_10, %c0_11] : memref<18x18x4xf32, #tpu.memory_space<vmem>>, vector<16x1x4xf32>
    tpu.vector_store %arg9[%c1_9, %c17_10, %c0_11], %6 {strides = array<i32>} : memref<18x18x4xf32, #tpu.memory_space<vmem>>, vector<16x1x4xf32>,
    %c0_12 = arith.constant 0 : index
    %c0_13 = arith.constant 0 : index
    %c0_14 = arith.constant 0 : index
    %c0_15 = arith.constant 0 : index
    %8 = vector.load %arg1[%c0_12, %c0_13, %c0_14, %c0_15] : memref<1x16x16x4xf32, #tpu.memory_space<vmem>>, vector<1x16x16x4xf32>
    %9 = vector.shape_cast %8 : vector<1x16x16x4xf32> to vector<16x16x4xf32>
    %c1_16 = arith.constant 1 : index
    %c1_17 = arith.constant 1 : index
    %c0_18 = arith.constant 0 : index
    %10 = vector.load %arg9[%c1_16, %c1_17, %c0_18] : memref<18x18x4xf32, #tpu.memory_space<vmem>>, vector<16x16x4xf32>
    tpu.vector_store %arg9[%c1_16, %c1_17, %c0_18], %9 {strides = array<i32>} : memref<18x18x4xf32, #tpu.memory_space<vmem>>, vector<16x16x4xf32>,
    %c0_19 = arith.constant 0 : index
    %c0_20 = arith.constant 0 : index
    %c0_21 = arith.constant 0 : index
    %11 = vector.load %arg9[%c0_19, %c0_20, %c0_21] : memref<18x18x4xf32, #tpu.memory_space<vmem>>, vector<18x18x4xf32>
    %c0_22 = arith.constant 0 : index
    %c0_23 = arith.constant 0 : index
    %12 = vector.load %arg2[%c0_22, %c0_23] : memref<36x4xf32, #tpu.memory_space<vmem>>, vector<36x4xf32>
    %c0_24 = arith.constant 0 : index
    %c0_25 = arith.constant 0 : index
    %13 = vector.load %arg3[%c0_24, %c0_25] : memref<1x4xf32, #tpu.memory_space<vmem>>, vector<1x4xf32>
    %c0_26 = arith.constant 0 : index
    %c0_27 = arith.constant 0 : index
    %14 = vector.load %arg4[%c0_26, %c0_27] : memref<1x4xf32, #tpu.memory_space<vmem>>, vector<1x4xf32>
    %15 = vector.extract_strided_slice %11 {offsets = [0, 0, 0], sizes = [16, 16, 4], strides = [1, 1, 1]} : vector<18x18x4xf32> to vector<16x16x4xf32>
    %16 = vector.extract_strided_slice %11 {offsets = [0, 1, 0], sizes = [16, 16, 4], strides = [1, 1, 1]} : vector<18x18x4xf32> to vector<16x16x4xf32>
    %17 = vector.extract_strided_slice %11 {offsets = [0, 2, 0], sizes = [16, 16, 4], strides = [1, 1, 1]} : vector<18x18x4xf32> to vector<16x16x4xf32>
    %18 = vector.extract_strided_slice %11 {offsets = [1, 0, 0], sizes = [16, 16, 4], strides = [1, 1, 1]} : vector<18x18x4xf32> to vector<16x16x4xf32>
    %19 = vector.extract_strided_slice %11 {offsets = [1, 1, 0], sizes = [16, 16, 4], strides = [1, 1, 1]} : vector<18x18x4xf32> to vector<16x16x4xf32>
    %20 = vector.extract_strided_slice %11 {offsets = [1, 2, 0], sizes = [16, 16, 4], strides = [1, 1, 1]} : vector<18x18x4xf32> to vector<16x16x4xf32>
    %21 = vector.extract_strided_slice %11 {offsets = [2, 0, 0], sizes = [16, 16, 4], strides = [1, 1, 1]} : vector<18x18x4xf32> to vector<16x16x4xf32>
    %22 = vector.extract_strided_slice %11 {offsets = [2, 1, 0], sizes = [16, 16, 4], strides = [1, 1, 1]} : vector<18x18x4xf32> to vector<16x16x4xf32>
    %23 = vector.extract_strided_slice %11 {offsets = [2, 2, 0], sizes = [16, 16, 4], strides = [1, 1, 1]} : vector<18x18x4xf32> to vector<16x16x4xf32>
    %24 = tpu.concatenate %15, %16, %17, %18, %19, %20, %21, %22, %23 in 2 : vector<16x16x4xf32>, vector<16x16x4xf32>, vector<16x16x4xf32>, vector<16x16x4xf32>, vector<16x16x4xf32>, vector<16x16x4xf32>, vector<16x16x4xf32>, vector<16x16x4xf32>, vector<16x16x4xf32> -> vector<16x16x36xf32>
    %25 = vector.shape_cast %24 : vector<16x16x36xf32> to vector<256x36xf32>
    %cst_28 = arith.constant dense<0.000000e+00> : vector<256x4xf32>
    %26 = tpu.matmul %25, %12, %cst_28 {dimension_numbers = #tpu.dot_dimension_numbers<[1], [0], [0], [1], [0, 0, 1, 1], [], []>} : vector<256x36xf32>, vector<36x4xf32>, vector<256x4xf32> -> vector<256x4xf32>
    %27 = vector.broadcast %13 : vector<1x4xf32> to vector<256x4xf32>
    %28 = arith.mulf %26, %27 : vector<256x4xf32>
    %29 = vector.broadcast %14 : vector<1x4xf32> to vector<256x4xf32>
    %30 = arith.addf %28, %29 : vector<256x4xf32>
    %cst_29 = arith.constant 0.000000e+00 : f32
    %31 = vector.broadcast %cst_29 : f32 to vector<256x4xf32>
    %32 = arith.maximumf %30, %31 : vector<256x4xf32>
    %33 = vector.shape_cast %32 : vector<256x4xf32> to vector<16x16x4xf32>
    %c1_30 = arith.constant 1 : index
    %c1_31 = arith.constant 1 : index
    %c0_32 = arith.constant 0 : index
    %34 = vector.load %arg9[%c1_30, %c1_31, %c0_32] : memref<18x18x4xf32, #tpu.memory_space<vmem>>, vector<16x16x4xf32>
    tpu.vector_store %arg9[%c1_30, %c1_31, %c0_32], %33 {strides = array<i32>} : memref<18x18x4xf32, #tpu.memory_space<vmem>>, vector<16x16x4xf32>,
    %c0_33 = arith.constant 0 : index
    %c0_34 = arith.constant 0 : index
    %c0_35 = arith.constant 0 : index
    %35 = vector.load %arg9[%c0_33, %c0_34, %c0_35] : memref<18x18x4xf32, #tpu.memory_space<vmem>>, vector<18x18x4xf32>
    %c0_36 = arith.constant 0 : index
    %c0_37 = arith.constant 0 : index
    %36 = vector.load %arg5[%c0_36, %c0_37] : memref<36x4xf32, #tpu.memory_space<vmem>>, vector<36x4xf32>
    %c0_38 = arith.constant 0 : index
    %c0_39 = arith.constant 0 : index
    %37 = vector.load %arg6[%c0_38, %c0_39] : memref<1x4xf32, #tpu.memory_space<vmem>>, vector<1x4xf32>
    %c0_40 = arith.constant 0 : index
    %c0_41 = arith.constant 0 : index
    %38 = vector.load %arg7[%c0_40, %c0_41] : memref<1x4xf32, #tpu.memory_space<vmem>>, vector<1x4xf32>
    %39 = vector.extract_strided_slice %35 {offsets = [0, 0, 0], sizes = [16, 16, 4], strides = [1, 1, 1]} : vector<18x18x4xf32> to vector<16x16x4xf32>
    %40 = vector.extract_strided_slice %35 {offsets = [0, 1, 0], sizes = [16, 16, 4], strides = [1, 1, 1]} : vector<18x18x4xf32> to vector<16x16x4xf32>
    %41 = vector.extract_strided_slice %35 {offsets = [0, 2, 0], sizes = [16, 16, 4], strides = [1, 1, 1]} : vector<18x18x4xf32> to vector<16x16x4xf32>
    %42 = vector.extract_strided_slice %35 {offsets = [1, 0, 0], sizes = [16, 16, 4], strides = [1, 1, 1]} : vector<18x18x4xf32> to vector<16x16x4xf32>
    %43 = vector.extract_strided_slice %35 {offsets = [1, 1, 0], sizes = [16, 16, 4], strides = [1, 1, 1]} : vector<18x18x4xf32> to vector<16x16x4xf32>
    %44 = vector.extract_strided_slice %35 {offsets = [1, 2, 0], sizes = [16, 16, 4], strides = [1, 1, 1]} : vector<18x18x4xf32> to vector<16x16x4xf32>
    %45 = vector.extract_strided_slice %35 {offsets = [2, 0, 0], sizes = [16, 16, 4], strides = [1, 1, 1]} : vector<18x18x4xf32> to vector<16x16x4xf32>
    %46 = vector.extract_strided_slice %35 {offsets = [2, 1, 0], sizes = [16, 16, 4], strides = [1, 1, 1]} : vector<18x18x4xf32> to vector<16x16x4xf32>
    %47 = vector.extract_strided_slice %35 {offsets = [2, 2, 0], sizes = [16, 16, 4], strides = [1, 1, 1]} : vector<18x18x4xf32> to vector<16x16x4xf32>
    %48 = tpu.concatenate %39, %40, %41, %42, %43, %44, %45, %46, %47 in 2 : vector<16x16x4xf32>, vector<16x16x4xf32>, vector<16x16x4xf32>, vector<16x16x4xf32>, vector<16x16x4xf32>, vector<16x16x4xf32>, vector<16x16x4xf32>, vector<16x16x4xf32>, vector<16x16x4xf32> -> vector<16x16x36xf32>
    %49 = vector.shape_cast %48 : vector<16x16x36xf32> to vector<256x36xf32>
    %cst_42 = arith.constant dense<0.000000e+00> : vector<256x4xf32>
    %50 = tpu.matmul %49, %36, %cst_42 {dimension_numbers = #tpu.dot_dimension_numbers<[1], [0], [0], [1], [0, 0, 1, 1], [], []>} : vector<256x36xf32>, vector<36x4xf32>, vector<256x4xf32> -> vector<256x4xf32>
    %51 = vector.broadcast %37 : vector<1x4xf32> to vector<256x4xf32>
    %52 = arith.mulf %50, %51 : vector<256x4xf32>
    %53 = vector.broadcast %38 : vector<1x4xf32> to vector<256x4xf32>
    %54 = arith.addf %52, %53 : vector<256x4xf32>
    %cst_43 = arith.constant 0.000000e+00 : f32
    %55 = vector.broadcast %cst_43 : f32 to vector<256x4xf32>
    %56 = arith.maximumf %54, %55 : vector<256x4xf32>
    %57 = vector.shape_cast %56 : vector<256x4xf32> to vector<16x16x4xf32>
    %58 = arith.addf %57, %9 : vector<16x16x4xf32>
    %c0_44 = arith.constant 0 : index
    %c0_45 = arith.constant 0 : index
    %c0_46 = arith.constant 0 : index
    %c0_47 = arith.constant 0 : index
    %59 = vector.load %arg8[%c0_44, %c0_45, %c0_46, %c0_47] : memref<1x16x16x4xf32, #tpu.memory_space<vmem>>, vector<1x16x16x4xf32>
    %60 = vector.shape_cast %59 : vector<1x16x16x4xf32> to vector<16x16x4xf32>
    %61 = vector.shape_cast %58 : vector<16x16x4xf32> to vector<1x16x16x4xf32>
    tpu.vector_store %arg8[%c0_44, %c0_45, %c0_46, %c0_47], %61 {strides = array<i32>} : memref<1x16x16x4xf32, #tpu.memory_space<vmem>>, vector<1x16x16x4xf32>,
    return
  }
  func.func @transform_0(%arg0: i32) -> (i32, i32, i32, i32) {
    %c0_i32 = arith.constant 0 : i32
    %c0_i32_0 = arith.constant 0 : i32
    %c0_i32_1 = arith.constant 0 : i32
    %c0_i32_2 = arith.constant 0 : i32
    return %arg0, %c0_i32, %c0_i32_0, %c0_i32_1 : i32, i32, i32, i32
  }
  func.func @transform_1(%arg0: i32) -> (i32, i32) {
    %c0_i32 = arith.constant 0 : i32
    %c0_i32_0 = arith.constant 0 : i32
    %c0_i32_1 = arith.constant 0 : i32
    return %c0_i32, %c0_i32_0 : i32, i32
  }
  func.func @transform_2(%arg0: i32) -> (i32, i32) {
    %c0_i32 = arith.constant 0 : i32
    %c0_i32_0 = arith.constant 0 : i32
    %c0_i32_1 = arith.constant 0 : i32
    return %c0_i32, %c0_i32_0 : i32, i32
  }
  func.func @transform_3(%arg0: i32) -> (i32, i32) {
    %c0_i32 = arith.constant 0 : i32
    %c0_i32_0 = arith.constant 0 : i32
    %c0_i32_1 = arith.constant 0 : i32
    return %c0_i32, %c0_i32_0 : i32, i32
  }
  func.func @transform_4(%arg0: i32) -> (i32, i32) {
    %c0_i32 = arith.constant 0 : i32
    %c0_i32_0 = arith.constant 0 : i32
    %c0_i32_1 = arith.constant 0 : i32
    return %c0_i32, %c0_i32_0 : i32, i32
  }
  func.func @transform_5(%arg0: i32) -> (i32, i32) {
    %c0_i32 = arith.constant 0 : i32
    %c0_i32_0 = arith.constant 0 : i32
    %c0_i32_1 = arith.constant 0 : i32
    return %c0_i32, %c0_i32_0 : i32, i32
  }
  func.func @transform_6(%arg0: i32) -> (i32, i32) {
    %c0_i32 = arith.constant 0 : i32
    %c0_i32_0 = arith.constant 0 : i32
    %c0_i32_1 = arith.constant 0 : i32
    return %c0_i32, %c0_i32_0 : i32, i32
  }
  func.func @transform_7(%arg0: i32) -> (i32, i32, i32, i32) {
    %c0_i32 = arith.constant 0 : i32
    %c0_i32_0 = arith.constant 0 : i32
    %c0_i32_1 = arith.constant 0 : i32
    %c0_i32_2 = arith.constant 0 : i32
    return %arg0, %c0_i32, %c0_i32_0, %c0_i32_1 : i32, i32, i32, i32
  }
}

</mosaic_0001>

<bundles_post_ra>
// kernel: residual_block_nchw.1
= control target key start
LH: loop header
LB: loop body
LE: loop exit
PB: predicated region body
PF: predicated region fallthrough
CT: control target
= control target key end

     0   :  { %s4477_s24 = smov 0   ;;  %s8250_s0 = inlined_call_operand.vmem [shape: f32[2,16,16,4], index: 0, kind: input, shape index: {}]   ;;  %s8251_s1 = inlined_call_operand.vmem [shape: f32[36,4], index: 1, kind: input, shape index: {}]   ;;  %s8252_s2 = inlined_call_operand.vmem [shape: f32[1,4], index: 2, kind: input, shape index: {}]   ;;  %s8253_s3 = inlined_call_operand.vmem [shape: f32[1,4], index: 3, kind: input, shape index: {}]   ;;  %s8254_s4 = inlined_call_operand.vmem [shape: f32[36,4], index: 4, kind: input, shape index: {}]   ;;  %s8255_s5 = inlined_call_operand.vmem [shape: f32[1,4], index: 5, kind: input, shape index: {}]   ;;  %s8256_s6 = inlined_call_operand.vmem [shape: f32[1,4], index: 6, kind: input, shape index: {}]   ;;  %s8257_s7 = inlined_call_operand.vmem [shape: f32[2,16,16,4], index: 7, kind: output, shape index: {}]  }
   0x1 LB: > { %s4050_s25 = sadd.s32 4294967295, %s4426_s24   ;;  %p4054_p0 = scmp.ge.s32.totalorder %s4426_s24, 1  ;;  %s4426_s24 = sphi %s4477_s24, %s17_s24  }
   0x2   : > { %p237_p1 = scmp.lt.s32.totalorder %s4426_s24, 3 }
   0x4   : > { %p238_p2 = pnand %p4054_p0, %p237_p1 }
   0x6   : > { %241 = sbr.rel (%p238_p2) target bundleno = 1679 (0x68f), region = 48 }
   0xd   : > { %vm279_vm0 = vcmask 31744   ;;  %vm282_vm1 = vcmask 25600   ;;  %p269_p3 = scmp.lt.s32.totalorder %s4050_s25, 1  ;;  %v4428_v0 = vmov 0.0   ;;  %vm289_vm2 = vcmask 24576   ;;  %s4429_s30 = smov 4  }
   0xe   : > { %280 = vst.msk [vmem:[#allocation2] sm:$0xff] %vm279_vm0, %v4428_v0  ;;  %281 = vst.msk [vmem:[#allocation2 + $0x8] sm:$0xff] %vm279_vm0, %v4428_v0  ;;  %vm495_vm3 = vcmask 1046528   ;;  %vm672_vm4 = vcmask 1045504   ;;  %s4430_s8 = smov 8   ;;  %s4431_s9 = smov 12  }
   0xf   : > { %285 = vst.msk [vmem:[#allocation2 + $0x198] sm:$0xff] %vm279_vm0, %v4428_v0  ;;  %286 = vst.msk [vmem:[#allocation2 + $0x1a0] sm:$0xff] %vm279_vm0, %v4428_v0  ;;  %s9084_s25 = smov (!%p269_p3, %s4050_s25), 1  ;;  %s4432_s10 = smov 16   ;;  %vm1811_vm5 = vcmask 1043456   ;;  %vm1483_vm6 = vcmask 64512  }
  0x10   : > { %283 = vst.msk [vmem:[#allocation2 + $0x10] sm:$0x3] %vm282_vm1, %v4428_v0  ;;  %287 = vst.msk [vmem:[#allocation2 + $0x1a8] sm:$0x3] %vm282_vm1, %v4428_v0  ;;  %s4131_s26 = sshll.u32 %s9084_s25, 8  ;;  %s4433_s11 = smov 20  }
  0x11   : > { %290 = vst.msk [vmem:[#allocation2 + $0x18] sm:$0x1] %vm289_vm2, %v4428_v0  ;;  %291 = vst.msk [vmem:[#allocation2 + $0x30] sm:$0x1] %vm289_vm2, %v4428_v0  ;;  %s4529_s29 = scalar_lea.vmem %s8250_s0, %s4131_s26  ;;  %s4434_s12 = smov 24   ;;  %vm1516_vm7 = vcmask 97280  }
  0x12   : > { %292 = vst.msk [vmem:[#allocation2 + $0x48] sm:$0x1] %vm289_vm2, %v4428_v0  ;;  %293 = vst.msk [vmem:[#allocation2 + $0x60] sm:$0x1] %vm289_vm2, %v4428_v0  ;;  %v4532_v1 = vld [vmem:[%s4529_s29] sm:$0xff]  ;;  %v4535_v2 = vld [vmem:[%s4529_s29 + $0x8] sm:$0xff]  ;;  %s7973_s28 = scalar_lea.vmem %s8257_s7, %s4131_s26 }
  0x13   : > { %294 = vst.msk [vmem:[#allocation2 + $0x78] sm:$0x1] %vm289_vm2, %v4428_v0  ;;  %295 = vst.msk [vmem:[#allocation2 + $0x90] sm:$0x1] %vm289_vm2, %v4428_v0  ;;  %v4538_v3 = vld [vmem:[%s4529_s29 + $0x10] sm:$0xff]  ;;  %v4545_v4 = vld [vmem:[%s4529_s29 + $0x18] sm:$0xff] }
  0x14   : > { %296 = vst.msk [vmem:[#allocation2 + $0xa8] sm:$0x1] %vm289_vm2, %v4428_v0  ;;  %297 = vst.msk [vmem:[#allocation2 + $0xc0] sm:$0x1] %vm289_vm2, %v4428_v0  ;;  %v4550_v5 = vld [vmem:[%s4529_s29 + $0x20] sm:$0xff]  ;;  %v4553_v6 = vld [vmem:[%s4529_s29 + $0x28] sm:$0xff] }
  0x15   : > { %298 = vst.msk [vmem:[#allocation2 + $0xd8] sm:$0x1] %vm289_vm2, %v4428_v0  ;;  %299 = vst.msk [vmem:[#allocation2 + $0xf0] sm:$0x1] %vm289_vm2, %v4428_v0  ;;  %v4555_v7 = vld [vmem:[#allocation2] sm:$0xff]  ;;  %v4557_v8 = vld [vmem:[#allocation2 + $0x8] sm:$0xff] }
  0x16   : > { %300 = vst.msk [vmem:[#allocation2 + $0x108] sm:$0x1] %vm289_vm2, %v4428_v0  ;;  %301 = vst.msk [vmem:[#allocation2 + $0x120] sm:$0x1] %vm289_vm2, %v4428_v0  ;;  %v496_v10 = vrot.slane %v4555_v7, 1  ;;  %v497_v11 = vrot.slane %v4557_v8, 1 }
  0x17   : > { %302 = vst.msk [vmem:[#allocation2 + $0x138] sm:$0x1] %vm289_vm2, %v4428_v0  ;;  %303 = vst.msk [vmem:[#allocation2 + $0x150] sm:$0x1] %vm289_vm2, %v4428_v0  ;;  %v4559_v9 = vld [vmem:[#allocation2 + $0x10] sm:$0x3] }
  0x18   : > { %304 = vst.msk [vmem:[#allocation2 + $0x168] sm:$0x1] %vm289_vm2, %v4428_v0  ;;  %305 = vst.msk [vmem:[#allocation2 + $0x180] sm:$0x1] %vm289_vm2, %v4428_v0  ;;  %v499_v12 = vrot.slane %v4559_v9, 1  ;;  %v4571_v13 = vld [vmem:[%s4529_s29 + $0x30] sm:$0xff]  ;;  %v498_v19 = vsel %vm495_vm3, %v496_v10, %v497_v11 }
  0x19   : > { %306 = vst.msk [vmem:[#allocation2 + $0x29] sm:$0x1] %vm289_vm2, %v4428_v0  ;;  %307 = vst.msk [vmem:[#allocation2 + $0x41] sm:$0x1] %vm289_vm2, %v4428_v0  ;;  %v4574_v14 = vld [vmem:[%s4529_s29 + $0x38] sm:$0xff]  ;;  %v4577_v15 = vld [vmem:[%s4529_s29 + $0x40] sm:$0xff]  ;;  %576 = vrot.lane.b32.xlu0 %v498_v19, %s4429_s30 }
  0x1a   : > { %308 = vst.msk [vmem:[#allocation2 + $0x59] sm:$0x1] %vm289_vm2, %v4428_v0  ;;  %309 = vst.msk [vmem:[#allocation2 + $0x71] sm:$0x1] %vm289_vm2, %v4428_v0  ;;  %v4584_v16 = vld [vmem:[%s4529_s29 + $0x48] sm:$0xff]  ;;  %v4589_v17 = vld [vmem:[%s4529_s29 + $0x50] sm:$0xff]  ;;  %v500_v26 = vsel %vm495_vm3, %v497_v11, %v499_v12 }
  0x1b   : > { %310 = vst.msk [vmem:[#allocation2 + $0x89] sm:$0x1] %vm289_vm2, %v4428_v0  ;;  %311 = vst.msk [vmem:[#allocation2 + $0xa1] sm:$0x1] %vm289_vm2, %v4428_v0  ;;  %v4592_v18 = vld [vmem:[%s4529_s29 + $0x58] sm:$0xff]  ;;  %v4602_v20 = vld [vmem:[%s4529_s29 + $0x60] sm:$0xff] }
  0x1c   : > { %312 = vst.msk [vmem:[#allocation2 + $0xb9] sm:$0x1] %vm289_vm2, %v4428_v0  ;;  %313 = vst.msk [vmem:[#allocation2 + $0xd1] sm:$0x1] %vm289_vm2, %v4428_v0  ;;  %v4605_v21 = vld [vmem:[%s4529_s29 + $0x68] sm:$0xff]  ;;  %v4608_v22 = vld [vmem:[%s4529_s29 + $0x70] sm:$0xff] }
  0x1d   : > { %314 = vst.msk [vmem:[#allocation2 + $0xe9] sm:$0x1] %vm289_vm2, %v4428_v0  ;;  %315 = vst.msk [vmem:[#allocation2 + $0x101] sm:$0x1] %vm289_vm2, %v4428_v0  ;;  %v4616_v23 = vld [vmem:[%s4529_s29 + $0x78] sm:$0xff]  ;;  %v4621_v24 = vld [vmem:[%s4529_s29 + $0x80] sm:$0xff]  ;;  %578 = vrot.lane.b32.xlu0 %v500_v26, %s4429_s30 }
  0x1e   : > { %316 = vst.msk [vmem:[#allocation2 + $0x119] sm:$0x1] %vm289_vm2, %v4428_v0  ;;  %317 = vst.msk [vmem:[#allocation2 + $0x131] sm:$0x1] %vm289_vm2, %v4428_v0  ;;  %v4624_v25 = vld [vmem:[%s4529_s29 + $0x88] sm:$0xff]  ;;  %v4634_v27 = vld [vmem:[%s4529_s29 + $0x90] sm:$0xff] }
  0x1f   : > { %318 = vst.msk [vmem:[#allocation2 + $0x149] sm:$0x1] %vm289_vm2, %v4428_v0  ;;  %319 = vst.msk [vmem:[#allocation2 + $0x161] sm:$0x1] %vm289_vm2, %v4428_v0  ;;  %v4637_v28 = vld [vmem:[%s4529_s29 + $0x98] sm:$0xff]  ;;  %v4640_v29 = vld [vmem:[%s4529_s29 + $0xa0] sm:$0xff] }
  0x20   : > { %320 = vst.msk [vmem:[#allocation2 + $0x179] sm:$0x1] %vm289_vm2, %v4428_v0  ;;  %321 = vst.msk [vmem:[#allocation2 + $0x191] sm:$0x1] %vm289_vm2, %v4428_v0  ;;  %v4712_v60 = vld [vmem:[%s4529_s29 + $0xa8] sm:$0xff]  ;;  %v4728_v11 = vld [vmem:[%s4529_s29 + $0xb0] sm:$0xff] }
  0x21   : > { %8439 = vst [vmem:[#allocation3_spill] sm:$0xff] %v4532_v1  ;;  %8440 = vst [vmem:[#allocation4_spill] sm:$0xff] %v4535_v2  ;;  %v4731_v12 = vld [vmem:[%s4529_s29 + $0xb8] sm:$0xff]  ;;  %v4734_v19 = vld [vmem:[%s4529_s29 + $0xc0] sm:$0xff]  ;;  %s4435_s23 = smov 28   ;;  %s4436_s27 = smov 32  }
  0x22   : > { %8441 = vst [vmem:[#allocation5_spill] sm:$0xff] %v4538_v3  ;;  %354 = vst.msk [vmem:[#allocation2 + $0x19] sm:$0xff] %vm279_vm0, %v4532_v1  ;;  %vm1549_vm8 = vcmask 130048   ;;  %vm1582_vm9 = vcmask 162816   ;;  %vm1615_vm10 = vcmask 195584   ;;  %vm1648_vm11 = vcmask 228352  }
  0x23   : > { %355 = vst.msk [vmem:[#allocation2 + $0x21] sm:$0xff] %vm279_vm0, %v4535_v2  ;;  %8442 = vst [vmem:[#allocation6_spill] sm:$0xff] %v4545_v4  ;;  %vm1681_vm12 = vcmask 261120   ;;  %vm1714_vm13 = vcmask 293888  }
  0x24   : > { %356 = vst.msk [vmem:[#allocation2 + $0x31] sm:$0xff] %vm279_vm0, %v4538_v3  ;;  %8443 = vst [vmem:[#allocation7_spill] sm:$0xff] %v4550_v5 }
  0x25   : > { %8444 = vst [vmem:[#allocation8_spill] sm:$0xff] %v4553_v6  ;;  %357 = vst.msk [vmem:[#allocation2 + $0x39] sm:$0xff] %vm279_vm0, %v4545_v4 }
  0x26   : > { %358 = vst.msk [vmem:[#allocation2 + $0x49] sm:$0xff] %vm279_vm0, %v4550_v5  ;;  %359 = vst.msk [vmem:[#allocation2 + $0x51] sm:$0xff] %vm279_vm0, %v4553_v6 }
  0x27   : > { %8445 = vst [vmem:[#allocation9_spill] sm:$0xff] %v4571_v13  ;;  %8446 = vst [vmem:[#allocation10_spill] sm:$0xff] %v4574_v14 }
  0x28   : > { %8447 = vst [vmem:[#allocation11_spill] sm:$0xff] %v4577_v15  ;;  %360 = vst.msk [vmem:[#allocation2 + $0x61] sm:$0xff] %vm279_vm0, %v4571_v13 }
  0x29   : > { %361 = vst.msk [vmem:[#allocation2 + $0x69] sm:$0xff] %vm279_vm0, %v4574_v14  ;;  %8448 = vst [vmem:[#allocation12_spill] sm:$0xff] %v4584_v16  ;;  %v4642_v30 = vld [vmem:[#allocation2 + $0x18] sm:$0xff] }
  0x2a   : > { %362 = vst.msk [vmem:[#allocation2 + $0x79] sm:$0xff] %vm279_vm0, %v4577_v15  ;;  %8449 = vst [vmem:[#allocation13_spill] sm:$0xff] %v4589_v17  ;;  %v4644_v31 = vld [vmem:[#allocation2 + $0x20] sm:$0xff]  ;;  %v501_v33 = vrot.slane %v4642_v30, 1  ;;  %v4659_v37 = vld [vmem:[#allocation2 + $0x28] sm:$0x3] }
  0x2b   : > { %8450 = vst [vmem:[#allocation14_spill] sm:$0xff] %v4592_v18  ;;  %363 = vst.msk [vmem:[#allocation2 + $0x81] sm:$0xff] %vm279_vm0, %v4584_v16  ;;  %v4646_v32 = vld [vmem:[#allocation2 + $0x30] sm:$0xff]  ;;  %v502_v34 = vrot.slane %v4644_v31, 1  ;;  %v504_v39 = vrot.slane %v4659_v37, 1 }
  0x2c   : > { %364 = vst.msk [vmem:[#allocation2 + $0x91] sm:$0xff] %vm279_vm0, %v4589_v17  ;;  %365 = vst.msk [vmem:[#allocation2 + $0x99] sm:$0xff] %vm279_vm0, %v4592_v18  ;;  %v4656_v35 = vld [vmem:[#allocation2 + $0x38] sm:$0xff]  ;;  %v506_v36 = vrot.slane %v4646_v32, 1  ;;  %v4668_v42 = vld [vmem:[#allocation2 + $0x40] sm:$0x3] }
  0x2d   : > { %8451 = vst [vmem:[#allocation15_spill] sm:$0xff] %v4602_v20  ;;  %8452 = vst [vmem:[#allocation16_spill] sm:$0xff] %v4605_v21  ;;  %v507_v38 = vrot.slane %v4656_v35, 1  ;;  %v4664_v40 = vld [vmem:[#allocation2 + $0x48] sm:$0xff]  ;;  %v4666_v41 = vld [vmem:[#allocation2 + $0x50] sm:$0xff]  ;;  %v4671_v43 = vsel %vm495_vm3, %v501_v33, %v502_v34  ;;  %v4685_v49 = vsel %vm495_vm3, %v502_v34, %v504_v39  ;;  %v509_v50 = vrot.slane %v4668_v42, 1 }
  0x2e   : > { %8453 = vst [vmem:[#allocation17_spill] sm:$0xff] %v4608_v22  ;;  %366 = vst.msk [vmem:[#allocation2 + $0xa9] sm:$0xff] %vm279_vm0, %v4602_v20  ;;  %v511_v44 = vrot.slane %v4664_v40, 1  ;;  %v512_v45 = vrot.slane %v4666_v41, 1  ;;  %580 = vrot.lane.b32.xlu1 %v4671_v43, %s4429_s30  ;;  %v4690_v51 = vld [vmem:[#allocation2 + $0x58] sm:$0x3] }
  0x2f   : > { %367 = vst.msk [vmem:[#allocation2 + $0xb1] sm:$0xff] %vm279_vm0, %v4605_v21  ;;  %8454 = vst [vmem:[#allocation18_spill] sm:$0xff] %v4616_v23  ;;  %v4678_v46 = vsel %vm495_vm3, %v506_v36, %v507_v38  ;;  %v4680_v47 = vld [vmem:[#allocation2 + $0x60] sm:$0xff]  ;;  %v4704_v57 = vsel %vm495_vm3, %v507_v38, %v509_v50  ;;  %v514_v58 = vrot.slane %v4690_v51, 1  ;;  %v4745_v34 = vld [vmem:[%s4529_s29 + $0xc8] sm:$0xff] }
  0x30   : > { %368 = vst.msk [vmem:[#allocation2 + $0xc1] sm:$0xff] %vm279_vm0, %v4608_v22  ;;  %8455 = vst [vmem:[#allocation19_spill] sm:$0xff] %v4621_v24  ;;  %v4682_v48 = vld [vmem:[#allocation2 + $0x68] sm:$0xff]  ;;  %584 = vrot.lane.b32.xlu0 %v4678_v46, %s4429_s30  ;;  %v4693_v52 = vsel %vm495_vm3, %v511_v44, %v512_v45  ;;  %v516_v53 = vrot.slane %v4680_v47, 1  ;;  %v4709_v59 = vld [vmem:[#allocation2 + $0x70] sm:$0x3] }
  0x31   : > { %8456 = vst [vmem:[#allocation20_spill] sm:$0xff] %v4624_v25  ;;  %369 = vst.msk [vmem:[#allocation2 + $0xc9] sm:$0xff] %vm279_vm0, %v4616_v23  ;;  %v517_v54 = vrot.slane %v4682_v48, 1  ;;  %v4699_v55 = vld [vmem:[#allocation2 + $0x78] sm:$0xff]  ;;  %v4737_v26 = vsel %vm495_vm3, %v512_v45, %v514_v58  ;;  %v519_v33 = vrot.slane %v4709_v59, 1  ;;  %v4750_v36 = vld [vmem:[%s4529_s29 + $0xd0] sm:$0xff] }
  0x32   : > { %370 = vst.msk [vmem:[#allocation2 + $0xd9] sm:$0xff] %vm279_vm0, %v4621_v24  ;;  %371 = vst.msk [vmem:[#allocation2 + $0xe1] sm:$0xff] %vm279_vm0, %v4624_v25  ;;  %582 = vrot.lane.b32.xlu1 %v4685_v49, %s4429_s30  ;;  %v4701_v56 = vld [vmem:[#allocation2 + $0x80] sm:$0xff]  ;;  %v521_v62 = vrot.slane %v4699_v55, 1  ;;  %v4753_v38 = vld [vmem:[%s4529_s29 + $0xd8] sm:$0xff] }
  0x33   : > { %8457 = vst [vmem:[#allocation21_spill] sm:$0xff] %v4634_v27  ;;  %8458 = vst [vmem:[#allocation22_spill] sm:$0xff] %v4637_v28  ;;  %v4715_v61 = vsel %vm495_vm3, %v516_v53, %v517_v54  ;;  %v522_v63 = vrot.slane %v4701_v56, 1  ;;  %v4719_v0 = vld [vmem:[#allocation2 + $0x90] sm:$0xff]  ;;  %v4721_v10 = vld [vmem:[#allocation2 + $0x98] sm:$0xff] }
  0x34   : > { %8459 = vst [vmem:[#allocation23_spill] sm:$0xff] %v4640_v29  ;;  %372 = vst.msk [vmem:[#allocation2 + $0xf1] sm:$0xff] %vm279_vm0, %v4634_v27  ;;  %588 = vrot.lane.b32.xlu0 %v4693_v52, %s4429_s30  ;;  %v4757_v39 = vld [vmem:[#allocation2 + $0x88] sm:$0x3]  ;;  %v4766_v44 = vld [vmem:[%s4529_s29 + $0xe0] sm:$0xff]  ;;  %v526_v53 = vrot.slane %v4719_v0, 1 }
  0x35   : > { %373 = vst.msk [vmem:[#allocation2 + $0xf9] sm:$0xff] %vm279_vm0, %v4637_v28  ;;  %374 = vst.msk [vmem:[#allocation2 + $0x109] sm:$0xff] %vm279_vm0, %v4640_v29  ;;  %v4769_v45 = vld [vmem:[%s4529_s29 + $0xe8] sm:$0xff]  ;;  %v4772_v50 = vsel %vm495_vm3, %v521_v62, %v522_v63  ;;  %v527_v58 = vrot.slane %v4721_v10, 1  ;;  %v4787_v62 = vsel %vm495_vm3, %v517_v54, %v519_v33 }
  0x36   : > { %8460 = vst [vmem:[#allocation24_spill] sm:$0xff] %v4693_v52  ;;  %8461 = vst [vmem:[#allocation25_spill] sm:$0xff] %v4704_v57  ;;  %586 = vrot.lane.b32.xlu1 %v4704_v57, %s4429_s30  ;;  %v674_v57 = vrot.slane %v4557_v8, 2  ;;  %v4972_v52 = vld [vmem:[%s4529_s29 + $0xf8] sm:$0xff]  ;;  %v678_v8 = vrot.slane %v4642_v30, 2 }
  0x37   : > { %8462 = vst [vmem:[#allocation26_spill] sm:$0xff] %v4712_v60  ;;  %8463 = vst [vmem:[#allocation27_spill] sm:$0xff] %v4715_v61 }
  0x38   : > { %375 = vst.msk [vmem:[#allocation2 + $0x111] sm:$0xff] %vm279_vm0, %v4712_v60  ;;  %8464 = vst [vmem:[#allocation28_spill] sm:$0xff] %v4728_v11  ;;  %592 = vrot.lane.b32.xlu0 %v4715_v61, %s4429_s30  ;;  %v4803_v54 = vld [vmem:[#allocation2 + $0xc8] sm:$0xff] }
  0x39   : > { %8465 = vst [vmem:[#allocation29_spill] sm:$0xff] %v4731_v12  ;;  %8466 = vst [vmem:[#allocation30_spill] sm:$0xff] %v4734_v19  ;;  %v537_v28 = vrot.slane %v4803_v54, 1  ;;  %v4820_v24 = vld [vmem:[#allocation2 + $0xd8] sm:$0xff] }
  0x3a   : > { %8467 = vst [vmem:[#allocation31_spill] sm:$0xff] %v4737_v26  ;;  %376 = vst.msk [vmem:[#allocation2 + $0x121] sm:$0xff] %vm279_vm0, %v4728_v11  ;;  %590 = vrot.lane.b32.xlu1 %v4737_v26, %s4429_s30  ;;  %v541_v23 = vrot.slane %v4820_v24, 1 }
  0x3b   : > { %377 = vst.msk [vmem:[#allocation2 + $0x129] sm:$0xff] %vm279_vm0, %v4731_v12  ;;  %8468 = vst [vmem:[#allocation32_spill] sm:$0xff] %v4745_v34  ;;  %v4801_v12 = vld [vmem:[#allocation2 + $0xc0] sm:$0xff]  ;;  %v4839_v21 = vld [vmem:[#allocation2 + $0xf0] sm:$0xff] }
  0x3c   : > { %378 = vst.msk [vmem:[#allocation2 + $0x139] sm:$0xff] %vm279_vm0, %v4734_v19  ;;  %8469 = vst [vmem:[#allocation33_spill] sm:$0xff] %v4750_v36  ;;  %v524_v19 = vrot.slane %v4757_v39, 1  ;;  %596 = vrot.lane.b32.xlu0 %v4772_v50, %s4429_s30  ;;  %v536_v27 = vrot.slane %v4801_v12, 1  ;;  %v546_v15 = vrot.slane %v4839_v21, 1  ;;  %v4858_v13 = vld [vmem:[#allocation2 + $0x108] sm:$0xff] }
  0x3d   : > { %8470 = vst [vmem:[#allocation34_spill] sm:$0xff] %v4753_v38  ;;  %379 = vst.msk [vmem:[#allocation2 + $0x141] sm:$0xff] %vm279_vm0, %v4745_v34  ;;  %v4792_v34 = vld [vmem:[#allocation2 + $0xa0] sm:$0x3]  ;;  %v551_v6 = vrot.slane %v4858_v13, 1 }
  0x3e   : > { %380 = vst.msk [vmem:[#allocation2 + $0x151] sm:$0xff] %vm279_vm0, %v4750_v36  ;;  %381 = vst.msk [vmem:[#allocation2 + $0x159] sm:$0xff] %vm279_vm0, %v4753_v38  ;;  %v4782_v36 = vld [vmem:[#allocation2 + $0xa8] sm:$0xff]  ;;  %v4784_v38 = vld [vmem:[#allocation2 + $0xb0] sm:$0xff]  ;;  %594 = vrot.lane.b32.xlu1 %v4787_v62, %s4429_s30  ;;  %v4806_v33 = vsel %vm495_vm3, %v522_v63, %v524_v19  ;;  %v529_v29 = vrot.slane %v4792_v34, 1  ;;  %v4833_v22 = vsel %vm495_vm3, %v536_v27, %v537_v28 }
  0x3f   : > { %8471 = vst [vmem:[#allocation35_spill] sm:$0xff] %v4766_v44  ;;  %8472 = vst [vmem:[#allocation36_spill] sm:$0xff] %v4769_v45  ;;  %v532_v11 = vrot.slane %v4784_v38, 1  ;;  %v4822_v63 = vld [vmem:[#allocation2 + $0xe0] sm:$0xff]  ;;  %v4849_v27 = vld [vmem:[#allocation2 + $0xe8] sm:$0x3] }
  0x40   : > { %8473 = vst [vmem:[#allocation37_spill] sm:$0xff] %v4772_v50  ;;  %382 = vst.msk [vmem:[#allocation2 + $0x169] sm:$0xff] %vm279_vm0, %v4766_v44  ;;  %v4795_v44 = vsel %vm495_vm3, %v526_v53, %v527_v58  ;;  %v4811_v53 = vld [vmem:[#allocation2 + $0xb8] sm:$0x3]  ;;  %v4825_v19 = vsel %vm495_vm3, %v527_v58, %v529_v29  ;;  %v542_v20 = vrot.slane %v4822_v63, 1  ;;  %v544_v14 = vrot.slane %v4849_v27, 1 }
  0x41   : > { %383 = vst.msk [vmem:[#allocation2 + $0x171] sm:$0xff] %vm279_vm0, %v4769_v45  ;;  %8474 = vst [vmem:[#allocation38_spill] sm:$0xff] %v4787_v62  ;;  %v531_v45 = vrot.slane %v4782_v36, 1  ;;  %600 = vrot.lane.b32.xlu0 %v4795_v44, %s4429_s30  ;;  %v534_v25 = vrot.slane %v4811_v53, 1  ;;  %v4841_v29 = vld [vmem:[#allocation2 + $0xf8] sm:$0xff]  ;;  %v4877_v4 = vld [vmem:[#allocation2 + $0x120] sm:$0xff] }
  0x42   : > { %8475 = vst [vmem:[#allocation39_spill] sm:$0xff] %v4795_v44  ;;  %8476 = vst [vmem:[#allocation40_spill] sm:$0xff] %v4806_v33  ;;  %598 = vrot.lane.b32.xlu1 %v4806_v33, %s4429_s30  ;;  %v4852_v18 = vsel %vm495_vm3, %v541_v23, %v542_v20  ;;  %v547_v16 = vrot.slane %v4841_v29, 1  ;;  %v4868_v23 = vld [vmem:[#allocation2 + $0x100] sm:$0x3]  ;;  %v4943_v50 = vld [vmem:[%s4529_s29 + $0xf0] sm:$0xff] }
  0x43   : > { %v4814_v60 = vsel %vm495_vm3, %v531_v45, %v532_v11  ;;  %8478 = vst [vmem:[#allocation42_spill] sm:$0xff] %v4825_v19  ;;  %v4830_v45 = vld [vmem:[#allocation2 + $0xd0] sm:$0x3]  ;;  %8479 = vst [vmem:[#allocation43_spill] sm:$0xff] %v4833_v22  ;;  %v4844_v58 = vsel %vm495_vm3, %v532_v11, %v534_v25  ;;  %v549_v1 = vrot.slane %v4868_v23, 1 }
  0x44   : > { %8477 = vst [vmem:[#allocation41_spill] sm:$0xff] %v4814_v60  ;;  %8480 = vst [vmem:[#allocation44_spill] sm:$0xff] %v4844_v58  ;;  %v539_v17 = vrot.slane %v4830_v45, 1  ;;  %v4860_v25 = vld [vmem:[#allocation2 + $0x110] sm:$0xff]  ;;  %v4871_v5 = vsel %vm495_vm3, %v546_v15, %v547_v16  ;;  %v4887_v15 = vld [vmem:[#allocation2 + $0x118] sm:$0x3] }
  0x45   : > { %604 = vrot.lane.b32.xlu0 %v4814_v60, %s4429_s30  ;;  %8481 = vst [vmem:[#allocation45_spill] sm:$0xff] %v4852_v18  ;;  %8483 = vst [vmem:[#allocation47_spill] sm:$0xff] %v4871_v5  ;;  %v552_v3 = vrot.slane %v4860_v25, 1 }
  0x46   : > { %602 = vrot.lane.b32.xlu1 %v4825_v19, %s4429_s30  ;;  %v4863_v11 = vsel %vm495_vm3, %v537_v28, %v539_v17  ;;  %v4879_v17 = vld [vmem:[#allocation2 + $0x128] sm:$0xff]  ;;  %v4882_v28 = vsel %vm495_vm3, %v542_v20, %v544_v14  ;;  %v4898_v14 = vld [vmem:[#allocation2 + $0x140] sm:$0xff]  ;;  %v4901_v20 = vsel %vm495_vm3, %v547_v16, %v549_v1  ;;  %v4915_v1 = vld [vmem:[#allocation2 + $0x150] sm:$0xff]  ;;  %8491 = vst [vmem:[#allocation55_spill] sm:$0xff] %v4943_v50 }
  0x47   : > { %8482 = vst [vmem:[#allocation46_spill] sm:$0xff] %v4863_v11  ;;  %8484 = vst [vmem:[#allocation48_spill] sm:$0xff] %v4882_v28  ;;  %v4890_v2 = vsel %vm495_vm3, %v551_v6, %v552_v3  ;;  %v4906_v6 = vld [vmem:[#allocation2 + $0x130] sm:$0x3]  ;;  %v4917_v16 = vld [vmem:[#allocation2 + $0x158] sm:$0xff]  ;;  %v566_v44 = vrot.slane %v4915_v1, 1 }
  0x48   : > { %8485 = vst [vmem:[#allocation49_spill] sm:$0xff] %v4890_v2  ;;  %8486 = vst [vmem:[#allocation50_spill] sm:$0xff] %v4901_v20  ;;  %v4934_v62 = vld [vmem:[#allocation2 + $0x168] sm:$0xff]  ;;  %v4964_v61 = vld [vmem:[#allocation2 + $0x178] sm:$0x3] }
  0x49   : > { %608 = vrot.lane.b32.xlu0 %v4833_v22, %s4429_s30  ;;  %384 = vst.msk [vmem:[#allocation2 + $0x181] sm:$0xff] %vm279_vm0, %v4943_v50  ;;  %v571_v26 = vrot.slane %v4934_v62, 1  ;;  %v673_v50 = vrot.slane %v4555_v7, 2  ;;  %8495 = vst [vmem:[#allocation59_spill] sm:$0xff] %v4972_v52 }
  0x4a   : > { %606 = vrot.lane.b32.xlu1 %v4844_v58, %s4429_s30  ;;  %v4896_v58 = vld [vmem:[#allocation2 + $0x138] sm:$0xff]  ;;  %385 = vst.msk [vmem:[#allocation2 + $0x189] sm:$0xff] %vm279_vm0, %v4972_v52  ;;  %v684_v52 = vrot.slane %v4656_v35, 2 }
  0x4b   : > { %v561_v19 = vrot.slane %v4896_v58, 1  ;;  %v675_v7 = vsel %vm672_vm4, %v673_v50, %v674_v57  ;;  %v683_v50 = vrot.slane %v4646_v32, 2 }
  0x4d   : > { %612 = vrot.lane.b32.xlu0 %v4852_v18, %s4429_s30  ;;  %v556_v18 = vrot.slane %v4877_v4, 1 }
  0x4e   : > { %610 = vrot.lane.b32.xlu1 %v4863_v11, %s4429_s30  ;;  %v557_v11 = vrot.slane %v4879_v17, 1 }
  0x50   : > { %v4909_v22 = vsel %vm495_vm3, %v556_v18, %v557_v11  ;;  %v4925_v18 = vld [vmem:[#allocation2 + $0x148] sm:$0x3] }
  0x51   : > { %616 = vrot.lane.b32.xlu0 %v4871_v5, %s4429_s30  ;;  %v554_v5 = vrot.slane %v4887_v15, 1  ;;  %8487 = vst [vmem:[#allocation51_spill] sm:$0xff] %v4909_v22 }
  0x52   : > { %614 = vrot.lane.b32.xlu1 %v4882_v28, %s4429_s30  ;;  %v562_v28 = vrot.slane %v4898_v14, 1 }
  0x53   : > { %v4920_v60 = vsel %vm495_vm3, %v552_v3, %v554_v5  ;;  %v4936_v3 = vld [vmem:[#allocation2 + $0x170] sm:$0xff] }
  0x54   : > { %8488 = vst [vmem:[#allocation52_spill] sm:$0xff] %v4920_v60  ;;  %v4928_v33 = vsel %vm495_vm3, %v561_v19, %v562_v28  ;;  %v4947_v19 = vld [vmem:[#allocation2 + $0x160] sm:$0x3] }
  0x55   : > { %620 = vrot.lane.b32.xlu0 %v4890_v2, %s4429_s30  ;;  %v559_v2 = vrot.slane %v4906_v6, 1  ;;  %8489 = vst [vmem:[#allocation53_spill] sm:$0xff] %v4928_v33 }
  0x56   : > { %618 = vrot.lane.b32.xlu1 %v4901_v20, %s4429_s30  ;;  %v567_v20 = vrot.slane %v4917_v16, 1 }
  0x57   : > { %v4939_v5 = vsel %vm495_vm3, %v557_v11, %v559_v2  ;;  %v572_v2 = vrot.slane %v4936_v3, 1 }
  0x58   : > { %8490 = vst [vmem:[#allocation54_spill] sm:$0xff] %v4939_v5 }
  0x59   : > { %624 = vrot.lane.b32.xlu0 %v4909_v22, %s4429_s30  ;;  %v564_v22 = vrot.slane %v4925_v18, 1 }
  0x5a   : > { %622 = vrot.lane.b32.xlu1 %v4920_v60, %s4429_s30  ;;  %v4952_v60 = vsel %vm495_vm3, %v566_v44, %v567_v20  ;;  %v4967_v44 = vsel %vm495_vm3, %v571_v26, %v572_v2  ;;  %v679_v26 = vrot.slane %v4644_v31, 2 }
  0x5b   : > { %8492 = vst [vmem:[#allocation56_spill] sm:$0xff] %v4952_v60  ;;  %v4959_v11 = vsel %vm495_vm3, %v562_v28, %v564_v22  ;;  %8494 = vst [vmem:[#allocation58_spill] sm:$0xff] %v4967_v44  ;;  %v574_v28 = vrot.slane %v4964_v61, 1 }
  0x5c   : > { %8493 = vst [vmem:[#allocation57_spill] sm:$0xff] %v4959_v11 }
  0x5d   : > { %628 = vrot.lane.b32.xlu0 %v4928_v33, %s4429_s30  ;;  %v569_v33 = vrot.slane %v4947_v19, 1 }
  0x5e   : > { %626 = vrot.lane.b32.xlu1 %v4939_v5, %s4429_s30 }
  0x5f   : > { %v4979_v22 = vsel %vm495_vm3, %v567_v20, %v569_v33  ;;  %v676_v33 = vrot.slane %v4559_v9, 2  ;;  %v4995_v20 = vsel %vm672_vm4, %v678_v8, %v679_v26  ;;  %v5006_v9 = vsel %vm672_vm4, %v683_v50, %v684_v52 }
  0x60   : > { %8496 = vst [vmem:[#allocation60_spill] sm:$0xff] %v4979_v22  ;;  %v698_v50 = vrot.slane %v4699_v55, 2 }
  0x61   : > { %632 = vrot.lane.b32.xlu0 %v4952_v60, %s4429_s30 }
  0x62   : > { %630 = vrot.lane.b32.xlu1 %v4959_v11, %s4429_s30  ;;  %v4990_v11 = vsel %vm495_vm3, %v572_v2, %v574_v28  ;;  %v681_v2 = vrot.slane %v4659_v37, 2  ;;  %v688_v28 = vrot.slane %v4664_v40, 2 }
  0x63   : > { %8497 = vst [vmem:[#allocation61_spill] sm:$0xff] %v4990_v11 }
  0x64   : > { %v5012_v8 = vsel %vm672_vm4, %v679_v26, %v681_v2  ;;  %v691_v26 = vrot.slane %v4690_v51, 2  ;;  %v699_v2 = vrot.slane %v4701_v56, 2 }
  0x65   : > { %636 = vrot.lane.b32.xlu0 %v4967_v44, %s4429_s30 }
  0x66   : > { %634 = vrot.lane.b32.xlu1 %v4979_v22, %s4429_s30  ;;  %v677_v22 = vsel %vm672_vm4, %v674_v57, %v676_v33  ;;  %v693_v57 = vrot.slane %v4680_v47, 2  ;;  %v694_v33 = vrot.slane %v4682_v48, 2  ;;  %v5044_v51 = vsel %vm672_vm4, %v698_v50, %v699_v2 }
  0x67   : > { %v709_v50 = vrot.slane %v4784_v38, 2 }
  0x69   : > { %753 = vrot.lane.b32.xlu0 %v675_v7, %s4430_s8  ;;  %v689_v7 = vrot.slane %v4666_v41, 2 }
  0x6a   : > { %638 = vrot.lane.b32.xlu1 %v4990_v11, %s4429_s30  ;;  %v686_v11 = vrot.slane %v4668_v42, 2  ;;  %v5031_v42 = vsel %vm672_vm4, %v693_v57, %v694_v33  ;;  %v704_v57 = vrot.slane %v4721_v10, 2 }
  0x6b   : > { %v5018_v37 = vsel %vm672_vm4, %v688_v28, %v689_v7  ;;  %v5038_v28 = vsel %vm672_vm4, %v689_v7, %v691_v26  ;;  %v701_v7 = vrot.slane %v4757_v39, 2  ;;  %v708_v26 = vrot.slane %v4782_v36, 2 }
  0x6c   : > { %8499 = vst [vmem:[#allocation63_spill] sm:$0xff] %v5038_v28 }
  0x6d   : > { %757 = vrot.lane.b32.xlu0 %v4995_v20, %s4430_s8  ;;  %v5070_v39 = vsel %vm672_vm4, %v708_v26, %v709_v50  ;;  %v719_v26 = vrot.slane %v4822_v63, 2 }
  0x6e   : > { %755 = vrot.lane.b32.xlu1 %v677_v22, %s4430_s8  ;;  %v5025_v22 = vsel %vm672_vm4, %v684_v52, %v686_v11  ;;  %v696_v52 = vrot.slane %v4709_v59, 2  ;;  %v703_v11 = vrot.slane %v4719_v0, 2 }
  0x6f   : > { %8498 = vst [vmem:[#allocation62_spill] sm:$0xff] %v5025_v22 }
  0x70   : > { %v5057_v59 = vsel %vm672_vm4, %v703_v11, %v704_v57  ;;  %v714_v11 = vrot.slane %v4803_v54, 2 }
  0x71   : > { %761 = vrot.lane.b32.xlu0 %v5006_v9, %s4430_s8 }
  0x72   : > { %759 = vrot.lane.b32.xlu1 %v5012_v8, %s4430_s8 }
  0x75   : > { %765 = vrot.lane.b32.xlu0 %v5018_v37, %s4430_s8 }
  0x76   : > { %763 = vrot.lane.b32.xlu1 %v5025_v22, %s4430_s8  ;;  %v5051_v22 = vsel %vm672_vm4, %v694_v33, %v696_v52  ;;  %v706_v33 = vrot.slane %v4792_v34, 2  ;;  %v713_v52 = vrot.slane %v4801_v12, 2 }
  0x77   : > { %8500 = vst [vmem:[#allocation64_spill] sm:$0xff] %v5051_v22 }
  0x78   : > { %v5083_v34 = vsel %vm672_vm4, %v713_v52, %v714_v11  ;;  %v724_v52 = vrot.slane %v4841_v29, 2 }
  0x79   : > { %769 = vrot.lane.b32.xlu0 %v5031_v42, %s4430_s8 }
  0x7a   : > { %767 = vrot.lane.b32.xlu1 %v5038_v28, %s4430_s8  ;;  %v5064_v28 = vsel %vm672_vm4, %v699_v2, %v701_v7  ;;  %v711_v2 = vrot.slane %v4811_v53, 2  ;;  %v718_v7 = vrot.slane %v4820_v24, 2 }
  0x7b   : > { %8501 = vst [vmem:[#allocation65_spill] sm:$0xff] %v5064_v28 }
  0x7c   : > { %v5096_v53 = vsel %vm672_vm4, %v718_v7, %v719_v26  ;;  %v729_v7 = vrot.slane %v4860_v25, 2 }
  0x7d   : > { %773 = vrot.lane.b32.xlu0 %v5044_v51, %s4430_s8  ;;  %8504 = vst [vmem:[#allocation68_spill] sm:$0xff] %v5096_v53 }
  0x7e   : > { %771 = vrot.lane.b32.xlu1 %v5051_v22, %s4430_s8  ;;  %v5077_v22 = vsel %vm672_vm4, %v704_v57, %v706_v33  ;;  %v716_v57 = vrot.slane %v4830_v45, 2  ;;  %v723_v33 = vrot.slane %v4839_v21, 2 }
  0x7f   : > { %8502 = vst [vmem:[#allocation66_spill] sm:$0xff] %v5077_v22 }
  0x80   : > { %v5109_v45 = vsel %vm672_vm4, %v723_v33, %v724_v52  ;;  %v734_v33 = vrot.slane %v4879_v17, 2 }
  0x81   : > { %777 = vrot.lane.b32.xlu0 %v5057_v59, %s4430_s8  ;;  %8506 = vst [vmem:[#allocation70_spill] sm:$0xff] %v5109_v45 }
  0x82   : > { %775 = vrot.lane.b32.xlu1 %v5064_v28, %s4430_s8  ;;  %v5090_v28 = vsel %vm672_vm4, %v709_v50, %v711_v2  ;;  %v721_v50 = vrot.slane %v4849_v27, 2  ;;  %v728_v2 = vrot.slane %v4858_v13, 2 }
  0x83   : > { %8503 = vst [vmem:[#allocation67_spill] sm:$0xff] %v5090_v28 }
  0x84   : > { %v5122_v27 = vsel %vm672_vm4, %v728_v2, %v729_v7  ;;  %v739_v2 = vrot.slane %v4898_v14, 2 }
  0x85   : > { %781 = vrot.lane.b32.xlu0 %v5070_v39, %s4430_s8  ;;  %8508 = vst [vmem:[#allocation72_spill] sm:$0xff] %v5122_v27 }
  0x86   : > { %779 = vrot.lane.b32.xlu1 %v5077_v22, %s4430_s8  ;;  %v5103_v22 = vsel %vm672_vm4, %v714_v11, %v716_v57  ;;  %v726_v11 = vrot.slane %v4868_v23, 2  ;;  %v733_v57 = vrot.slane %v4877_v4, 2 }
  0x87   : > { %8505 = vst [vmem:[#allocation69_spill] sm:$0xff] %v5103_v22 }
  0x88   : > { %v5135_v23 = vsel %vm672_vm4, %v733_v57, %v734_v33  ;;  %v744_v57 = vrot.slane %v4917_v16, 2 }
  0x89   : > { %785 = vrot.lane.b32.xlu0 %v5083_v34, %s4430_s8  ;;  %8510 = vst [vmem:[#allocation74_spill] sm:$0xff] %v5135_v23 }
  0x8a   : > { %783 = vrot.lane.b32.xlu1 %v5090_v28, %s4430_s8  ;;  %v5116_v28 = vsel %vm672_vm4, %v719_v26, %v721_v50  ;;  %v731_v26 = vrot.slane %v4887_v15, 2  ;;  %v738_v50 = vrot.slane %v4896_v58, 2 }
  0x8b   : > { %8507 = vst [vmem:[#allocation71_spill] sm:$0xff] %v5116_v28 }
  0x8c   : > { %v5148_v15 = vsel %vm672_vm4, %v738_v50, %v739_v2  ;;  %v748_v50 = vrot.slane %v4934_v62, 2 }
  0x8d   : > { %789 = vrot.lane.b32.xlu0 %v5096_v53, %s4430_s8 }
  0x8e   : > { %787 = vrot.lane.b32.xlu1 %v5103_v22, %s4430_s8  ;;  %v5129_v22 = vsel %vm672_vm4, %v724_v52, %v726_v11  ;;  %v736_v52 = vrot.slane %v4906_v6, 2  ;;  %v743_v11 = vrot.slane %v4915_v1, 2  ;;  %v741_v6 = vrot.slane %v4925_v18, 2 }
  0x8f   : > { %8509 = vst [vmem:[#allocation73_spill] sm:$0xff] %v5129_v22  ;;  %v746_v18 = vrot.slane %v4947_v19, 2 }
  0x91   : > { %793 = vrot.lane.b32.xlu0 %v5109_v45, %s4430_s8 }
  0x92   : > { %791 = vrot.lane.b32.xlu1 %v5116_v28, %s4430_s8  ;;  %v5142_v28 = vsel %vm672_vm4, %v729_v7, %v731_v26  ;;  %v5157_v7 = vsel %vm672_vm4, %v734_v33, %v736_v52  ;;  %v5163_v26 = vsel %vm672_vm4, %v743_v11, %v744_v57  ;;  %v5172_v33 = vsel %vm672_vm4, %v739_v2, %v741_v6 }
  0x93   : > { %8512 = vst [vmem:[#allocation76_spill] sm:$0xff] %v5163_v26  ;;  %8514 = vst [vmem:[#allocation78_spill] sm:$0xff] %v5172_v33  ;;  %v751_v2 = vrot.slane %v4964_v61, 2 }
  0x95   : > { %797 = vrot.lane.b32.xlu0 %v5122_v27, %s4430_s8  ;;  %v5152_v27 = vpop.permute.xlu0 %576 }
  0x96   : > { %795 = vrot.lane.b32.xlu1 %v5129_v22, %s4430_s8  ;;  %8511 = vst [vmem:[#allocation75_spill] sm:$0xff] %v5152_v27 }
  0x99   : > { %801 = vrot.lane.b32.xlu0 %v5135_v23, %s4430_s8  ;;  %v749_v23 = vrot.slane %v4936_v3, 2  ;;  %v5167_v22 = vpop.permute.xlu0 %578 }
  0x9a   : > { %799 = vrot.lane.b32.xlu1 %v5142_v28, %s4430_s8  ;;  %8513 = vst [vmem:[#allocation77_spill] sm:$0xff] %v5167_v22  ;;  %v5187_v22 = vsel %vm672_vm4, %v744_v57, %v746_v18 }
  0x9b   : > { %v5180_v11 = vsel %vm672_vm4, %v748_v50, %v749_v23  ;;  %v5199_v50 = vsel %vm672_vm4, %v749_v23, %v751_v2 }
  0x9d   : > { %805 = vrot.lane.b32.xlu0 %v5148_v15, %s4430_s8 }
  0x9e   : > { %803 = vrot.lane.b32.xlu1 %v5157_v7, %s4430_s8 }
  0xa0   : > { %v5177_v52 = vpop.permute.xlu1 %580 }
  0xa1   : > { %809 = vrot.lane.b32.xlu0 %v5163_v26, %s4430_s8  ;;  %8515 = vst [vmem:[#allocation79_spill] sm:$0xff] %v5177_v52 }
  0xa2   : > { %v5182_v27 = vpop.permute.xlu0 %584  ;;  %807 = vrot.lane.b32.xlu1 %v5172_v33, %s4430_s8 }
  0xa3   : > { %8516 = vst [vmem:[#allocation80_spill] sm:$0xff] %v5182_v27 }
  0xa4   : > { %v5192_v19 = vpop.permute.xlu1 %582 }
  0xa5   : > { %813 = vrot.lane.b32.xlu0 %v5180_v11, %s4430_s8  ;;  %8517 = vst [vmem:[#allocation81_spill] sm:$0xff] %v5192_v19  ;;  %v8555_v19 = vld [vmem:[#allocation24_spill] sm:$0xff] }
  0xa6   : > { %v5194_v6 = vpop.permute.xlu0 %588  ;;  %811 = vrot.lane.b32.xlu1 %v5187_v22, %s4430_s8 }
  0xa7   : > { %8518 = vst [vmem:[#allocation82_spill] sm:$0xff] %v5194_v6 }
  0xa8   : > { %v5203_v57 = vpop.permute.xlu1 %586 }
  0xa9   : > { %851 = vrot.lane.b32.xlu0 %v4642_v30, %s4431_s9  ;;  %8519 = vst [vmem:[#allocation83_spill] sm:$0xff] %v5203_v57  ;;  %v5331_v57 = vld [vmem:[#allocation2 + $0x188] sm:$0xff] }
  0xaa   : > { %v5205_v61 = vpop.permute.xlu0 %592  ;;  %815 = vrot.lane.b32.xlu1 %v5199_v50, %s4430_s8 }
  0xab   : > { %8520 = vst [vmem:[#allocation84_spill] sm:$0xff] %v5205_v61 }
  0xac   : > { %v5211_v18 = vpop.permute.xlu1 %590 }
  0xad   : > { %855 = vrot.lane.b32.xlu0 %v4646_v32, %s4431_s9  ;;  %8521 = vst [vmem:[#allocation85_spill] sm:$0xff] %v5211_v18 }
  0xae   : > { %v5213_v6 = vpop.permute.xlu0 %596  ;;  %853 = vrot.lane.b32.xlu1 %v4644_v31, %s4431_s9 }
  0xaf   : > { %8522 = vst [vmem:[#allocation86_spill] sm:$0xff] %v5213_v6 }
  0xb0   : > { %v5219_v30 = vpop.permute.xlu1 %594 }
  0xb1   : > { %859 = vrot.lane.b32.xlu0 %v4664_v40, %s4431_s9  ;;  %8523 = vst [vmem:[#allocation87_spill] sm:$0xff] %v5219_v30 }
  0xb2   : > { %857 = vrot.lane.b32.xlu1 %v4656_v35, %s4431_s9 }
  0xb3   : > { %v5221_v23 = vpop.permute.xlu0 %600 }
  0xb4   : > { %8524 = vst [vmem:[#allocation88_spill] sm:$0xff] %v5221_v23  ;;  %v5227_v2 = vpop.permute.xlu1 %598 }
  0xb5   : > { %863 = vrot.lane.b32.xlu0 %v4680_v47, %s4431_s9  ;;  %8525 = vst [vmem:[#allocation89_spill] sm:$0xff] %v5227_v2 }
  0xb6   : > { %861 = vrot.lane.b32.xlu1 %v4666_v41, %s4431_s9 }
  0xb7   : > { %v5229_v61 = vpop.permute.xlu0 %604 }
  0xb8   : > { %8526 = vst [vmem:[#allocation90_spill] sm:$0xff] %v5229_v61  ;;  %v5235_v31 = vpop.permute.xlu1 %602 }
  0xb9   : > { %867 = vrot.lane.b32.xlu0 %v4699_v55, %s4431_s9  ;;  %8527 = vst [vmem:[#allocation91_spill] sm:$0xff] %v5235_v31 }
  0xba   : > { %865 = vrot.lane.b32.xlu1 %v4682_v48, %s4431_s9 }
  0xbb   : > { %v5237_v6 = vpop.permute.xlu0 %608 }
  0xbc   : > { %8528 = vst [vmem:[#allocation92_spill] sm:$0xff] %v5237_v6  ;;  %v5243_v23 = vpop.permute.xlu1 %606 }
  0xbd   : > { %871 = vrot.lane.b32.xlu0 %v4719_v0, %s4431_s9  ;;  %8529 = vst [vmem:[#allocation93_spill] sm:$0xff] %v5243_v23 }
  0xbe   : > { %869 = vrot.lane.b32.xlu1 %v4701_v56, %s4431_s9 }
  0xbf   : > { %v5245_v2 = vpop.permute.xlu0 %612 }
  0xc0   : > { %8530 = vst [vmem:[#allocation94_spill] sm:$0xff] %v5245_v2  ;;  %v5251_v61 = vpop.permute.xlu1 %610 }
  0xc1   : > { %875 = vrot.lane.b32.xlu0 %v4782_v36, %s4431_s9  ;;  %8531 = vst [vmem:[#allocation95_spill] sm:$0xff] %v5251_v61 }
  0xc2   : > { %873 = vrot.lane.b32.xlu1 %v4721_v10, %s4431_s9 }
  0xc3   : > { %v5253_v31 = vpop.permute.xlu0 %616 }
  0xc4   : > { %8532 = vst [vmem:[#allocation96_spill] sm:$0xff] %v5253_v31  ;;  %v5259_v6 = vpop.permute.xlu1 %614 }
  0xc5   : > { %879 = vrot.lane.b32.xlu0 %v4801_v12, %s4431_s9  ;;  %8533 = vst [vmem:[#allocation97_spill] sm:$0xff] %v5259_v6 }
  0xc6   : > { %877 = vrot.lane.b32.xlu1 %v4784_v38, %s4431_s9 }
  0xc7   : > { %v5261_v23 = vpop.permute.xlu0 %620 }
  0xc8   : > { %8534 = vst [vmem:[#allocation98_spill] sm:$0xff] %v5261_v23  ;;  %v5267_v2 = vpop.permute.xlu1 %618 }
  0xc9   : > { %883 = vrot.lane.b32.xlu0 %v4820_v24, %s4431_s9  ;;  %8535 = vst [vmem:[#allocation99_spill] sm:$0xff] %v5267_v2 }
  0xca   : > { %881 = vrot.lane.b32.xlu1 %v4803_v54, %s4431_s9 }
  0xcb   : > { %v5269_v61 = vpop.permute.xlu0 %624 }
  0xcc   : > { %8536 = vst [vmem:[#allocation100_spill] sm:$0xff] %v5269_v61  ;;  %v5275_v31 = vpop.permute.xlu1 %622 }
  0xcd   : > { %887 = vrot.lane.b32.xlu0 %v4839_v21, %s4431_s9  ;;  %8537 = vst [vmem:[#allocation101_spill] sm:$0xff] %v5275_v31 }
  0xce   : > { %885 = vrot.lane.b32.xlu1 %v4822_v63, %s4431_s9 }
  0xcf   : > { %v5277_v6 = vpop.permute.xlu0 %628 }
  0xd0   : > { %8538 = vst [vmem:[#allocation102_spill] sm:$0xff] %v5277_v6  ;;  %v5283_v23 = vpop.permute.xlu1 %626 }
  0xd1   : > { %891 = vrot.lane.b32.xlu0 %v4858_v13, %s4431_s9  ;;  %8539 = vst [vmem:[#allocation103_spill] sm:$0xff] %v5283_v23 }
  0xd2   : > { %889 = vrot.lane.b32.xlu1 %v4841_v29, %s4431_s9 }
  0xd3   : > { %v5285_v2 = vpop.permute.xlu0 %632 }
  0xd4   : > { %8540 = vst [vmem:[#allocation104_spill] sm:$0xff] %v5285_v2  ;;  %v5291_v61 = vpop.permute.xlu1 %630 }
  0xd5   : > { %895 = vrot.lane.b32.xlu0 %v4877_v4, %s4431_s9  ;;  %8541 = vst [vmem:[#allocation105_spill] sm:$0xff] %v5291_v61 }
  0xd6   : > { %893 = vrot.lane.b32.xlu1 %v4860_v25, %s4431_s9 }
  0xd7   : > { %v5293_v31 = vpop.permute.xlu0 %636 }
  0xd8   : > { %8542 = vst [vmem:[#allocation106_spill] sm:$0xff] %v5293_v31  ;;  %v5299_v6 = vpop.permute.xlu1 %634 }
  0xd9   : > { %899 = vrot.lane.b32.xlu0 %v4896_v58, %s4431_s9  ;;  %8543 = vst [vmem:[#allocation107_spill] sm:$0xff] %v5299_v6  ;;  %v5317_v6 = vld [vmem:[#allocation2 + $0x180] sm:$0xff] }
  0xda   : > { %897 = vrot.lane.b32.xlu1 %v4879_v17, %s4431_s9 }
  0xdb   : > { %v5301_v23 = vpop.permute.xlu0 %753 }
  0xdc   : > { %8544 = vst [vmem:[#allocation108_spill] sm:$0xff] %v5301_v23  ;;  %v5307_v2 = vpop.permute.xlu1 %638  ;;  %v8567_v23 = vld [vmem:[#allocation39_spill] sm:$0xff] }
  0xdd   : > { %903 = vrot.lane.b32.xlu0 %v4915_v1, %s4431_s9  ;;  %8545 = vst [vmem:[#allocation109_spill] sm:$0xff] %v5307_v2 }
  0xde   : > { %901 = vrot.lane.b32.xlu1 %v4898_v14, %s4431_s9 }
  0xdf   : > { %v5309_v61 = vpop.permute.xlu0 %757 }
  0xe0   : > { %8546 = vst [vmem:[#allocation110_spill] sm:$0xff] %v5309_v61  ;;  %v5315_v31 = vpop.permute.xlu1 %755  ;;  %v8559_v61 = vld [vmem:[#allocation27_spill] sm:$0xff] }
  0xe1   : > { %907 = vrot.lane.b32.xlu0 %v4934_v62, %s4431_s9  ;;  %8547 = vst [vmem:[#allocation111_spill] sm:$0xff] %v5315_v31 }
  0xe2   : > { %905 = vrot.lane.b32.xlu1 %v4917_v16, %s4431_s9 }
  0xe3   : > { %v5319_v30 = vpop.permute.xlu0 %761 }
  0xe4   : > { %8548 = vst [vmem:[#allocation112_spill] sm:$0xff] %v5319_v30  ;;  %v5325_v2 = vpop.permute.xlu1 %759 }
  0xe5   : > { %911 = vrot.lane.b32.xlu0 %v5317_v6, %s4431_s9  ;;  %8549 = vst [vmem:[#allocation113_spill] sm:$0xff] %v5325_v2 }
  0xe6   : > { %909 = vrot.lane.b32.xlu1 %v4936_v3, %s4431_s9 }
  0xe7   : > { %v5327_v18 = vpop.permute.xlu0 %765 }
  0xe8   : > { %8550 = vst [vmem:[#allocation114_spill] sm:$0xff] %v5327_v18  ;;  %v5335_v30 = vpop.permute.xlu1 %763 }
  0xe9   : > { %953 = vrot.lane.b32.xlu0 %v4671_v43, %s4432_s10  ;;  %8551 = vst [vmem:[#allocation115_spill] sm:$0xff] %v5335_v30 }
  0xea   : > { %913 = vrot.lane.b32.xlu1 %v5331_v57, %s4431_s9 }
  0xeb   : > { %v5337_v27 = vpop.permute.xlu0 %769 }
  0xec   : > { %8552 = vst [vmem:[#allocation116_spill] sm:$0xff] %v5337_v27  ;;  %v5343_v18 = vpop.permute.xlu1 %767  ;;  %v8558_v27 = vld [vmem:[#allocation25_spill] sm:$0xff] }
  0xed   : > { %957 = vrot.lane.b32.xlu0 %v4678_v46, %s4432_s10  ;;  %8553 = vst [vmem:[#allocation117_spill] sm:$0xff] %v5343_v18 }
  0xee   : > { %955 = vrot.lane.b32.xlu1 %v4685_v49, %s4432_s10  ;;  %v8563_v49 = vld [vmem:[#allocation37_spill] sm:$0xff] }
  0xef   : > { %v5345_v2 = vpop.permute.xlu0 %773 }
  0xf0   : > { %8554 = vst [vmem:[#allocation118_spill] sm:$0xff] %v5345_v2  ;;  %v5351_v43 = vpop.permute.xlu1 %771  ;;  %v8562_v2 = vld [vmem:[#allocation31_spill] sm:$0xff] }
  0xf1   : > { %961 = vrot.lane.b32.xlu0 %v8555_v19, %s4432_s10  ;;  %8556 = vst [vmem:[#allocation24_spill] sm:$0xff] %v5351_v43 }
  0xf2   : > { %959 = vrot.lane.b32.xlu1 %v8558_v27, %s4432_s10 }
  0xf3   : > { %v5353_v30 = vpop.permute.xlu0 %777 }
  0xf4   : > { %8557 = vst [vmem:[#allocation119_spill] sm:$0xff] %v5353_v30  ;;  %v5359_v52 = vpop.permute.xlu1 %775  ;;  %v8566_v30 = vld [vmem:[#allocation38_spill] sm:$0xff] }
  0xf5   : > { %965 = vrot.lane.b32.xlu0 %v8559_v61, %s4432_s10  ;;  %8560 = vst [vmem:[#allocation25_spill] sm:$0xff] %v5359_v52 }
  0xf6   : > { %963 = vrot.lane.b32.xlu1 %v8562_v2, %s4432_s10  ;;  %v8571_v2 = vld [vmem:[#allocation41_spill] sm:$0xff] }
  0xf7   : > { %v5361_v18 = vpop.permute.xlu0 %781 }
  0xf8   : > { %8561 = vst [vmem:[#allocation120_spill] sm:$0xff] %v5361_v18  ;;  %v5367_v31 = vpop.permute.xlu1 %779  ;;  %v8570_v18 = vld [vmem:[#allocation40_spill] sm:$0xff] }
  0xf9   : > { %969 = vrot.lane.b32.xlu0 %v8563_v49, %s4432_s10  ;;  %8564 = vst [vmem:[#allocation121_spill] sm:$0xff] %v5367_v31 }
  0xfa   : > { %967 = vrot.lane.b32.xlu1 %v8566_v30, %s4432_s10  ;;  %v8575_v30 = vld [vmem:[#allocation43_spill] sm:$0xff] }
  0xfb   : > { %v5369_v43 = vpop.permute.xlu0 %785 }
  0xfc   : > { %8565 = vst [vmem:[#allocation122_spill] sm:$0xff] %v5369_v43  ;;  %v5375_v61 = vpop.permute.xlu1 %783  ;;  %v8574_v43 = vld [vmem:[#allocation42_spill] sm:$0xff] }
  0xfd   : > { %973 = vrot.lane.b32.xlu0 %v8567_v23, %s4432_s10  ;;  %8568 = vst [vmem:[#allocation123_spill] sm:$0xff] %v5375_v61 }
  0xfe   : > { %971 = vrot.lane.b32.xlu1 %v8570_v18, %s4432_s10  ;;  %v8579_v18 = vld [vmem:[#allocation45_spill] sm:$0xff] }
  0xff   : > { %v5377_v52 = vpop.permute.xlu0 %789 }
 0x100   : > { %8569 = vst [vmem:[#allocation124_spill] sm:$0xff] %v5377_v52  ;;  %v5383_v49 = vpop.permute.xlu1 %787  ;;  %v8578_v52 = vld [vmem:[#allocation44_spill] sm:$0xff] }
 0x101   : > { %977 = vrot.lane.b32.xlu0 %v8571_v2, %s4432_s10  ;;  %8572 = vst [vmem:[#allocation125_spill] sm:$0xff] %v5383_v49 }
 0x102   : > { %975 = vrot.lane.b32.xlu1 %v8574_v43, %s4432_s10  ;;  %v8583_v43 = vld [vmem:[#allocation47_spill] sm:$0xff] }
 0x103   : > { %v5385_v31 = vpop.permute.xlu0 %793 }
 0x104   : > { %8573 = vst [vmem:[#allocation126_spill] sm:$0xff] %v5385_v31  ;;  %v5391_v23 = vpop.permute.xlu1 %791  ;;  %v8582_v31 = vld [vmem:[#allocation46_spill] sm:$0xff] }
 0x105   : > { %981 = vrot.lane.b32.xlu0 %v8575_v30, %s4432_s10  ;;  %8576 = vst [vmem:[#allocation127_spill] sm:$0xff] %v5391_v23 }
 0x106   : > { %979 = vrot.lane.b32.xlu1 %v8578_v52, %s4432_s10  ;;  %v8587_v52 = vld [vmem:[#allocation49_spill] sm:$0xff] }
 0x107   : > { %v5393_v61 = vpop.permute.xlu0 %797 }
 0x108   : > { %8577 = vst [vmem:[#allocation128_spill] sm:$0xff] %v5393_v61  ;;  %v5399_v2 = vpop.permute.xlu1 %795  ;;  %v8586_v61 = vld [vmem:[#allocation48_spill] sm:$0xff] }
 0x109   : > { %985 = vrot.lane.b32.xlu0 %v8579_v18, %s4432_s10  ;;  %8580 = vst [vmem:[#allocation129_spill] sm:$0xff] %v5399_v2 }
 0x10a   : > { %983 = vrot.lane.b32.xlu1 %v8582_v31, %s4432_s10  ;;  %v8591_v31 = vld [vmem:[#allocation51_spill] sm:$0xff] }
 0x10b   : > { %v5401_v49 = vpop.permute.xlu0 %801 }
 0x10c   : > { %8581 = vst [vmem:[#allocation130_spill] sm:$0xff] %v5401_v49  ;;  %v5407_v30 = vpop.permute.xlu1 %799  ;;  %v8590_v49 = vld [vmem:[#allocation50_spill] sm:$0xff] }
 0x10d   : > { %989 = vrot.lane.b32.xlu0 %v8583_v43, %s4432_s10  ;;  %8584 = vst [vmem:[#allocation131_spill] sm:$0xff] %v5407_v30 }
 0x10e   : > { %987 = vrot.lane.b32.xlu1 %v8586_v61, %s4432_s10  ;;  %v8595_v61 = vld [vmem:[#allocation53_spill] sm:$0xff] }
 0x10f   : > { %v5409_v23 = vpop.permute.xlu0 %805 }
 0x110   : > { %8585 = vst [vmem:[#allocation132_spill] sm:$0xff] %v5409_v23  ;;  %v5415_v18 = vpop.permute.xlu1 %803  ;;  %v8594_v23 = vld [vmem:[#allocation52_spill] sm:$0xff] }
 0x111   : > { %993 = vrot.lane.b32.xlu0 %v8587_v52, %s4432_s10  ;;  %8588 = vst [vmem:[#allocation133_spill] sm:$0xff] %v5415_v18 }
 0x112   : > { %991 = vrot.lane.b32.xlu1 %v8590_v49, %s4432_s10  ;;  %v8637_v49 = vld [vmem:[#allocation72_spill] sm:$0xff] }
 0x113   : > { %v5417_v2 = vpop.permute.xlu0 %809 }
 0x114   : > { %8589 = vst [vmem:[#allocation134_spill] sm:$0xff] %v5417_v2  ;;  %v5423_v43 = vpop.permute.xlu1 %807 }
 0x115   : > { %997 = vrot.lane.b32.xlu0 %v8591_v31, %s4432_s10  ;;  %8592 = vst [vmem:[#allocation135_spill] sm:$0xff] %v5423_v43  ;;  %v949_v43 = vrot.slane %v5331_v57, 1 }
 0x116   : > { %995 = vrot.lane.b32.xlu1 %v8594_v23, %s4432_s10 }
 0x117   : > { %v5425_v30 = vpop.permute.xlu0 %813 }
 0x118   : > { %8593 = vst [vmem:[#allocation136_spill] sm:$0xff] %v5425_v30  ;;  %v5431_v52 = vpop.permute.xlu1 %811  ;;  %v948_v30 = vrot.slane %v5317_v6, 1 }
 0x119   : > { %1001 = vrot.lane.b32.xlu0 %v8595_v61, %s4432_s10  ;;  %8596 = vst [vmem:[#allocation137_spill] sm:$0xff] %v5431_v52  ;;  %v8600_v61 = vld [vmem:[#allocation57_spill] sm:$0xff] }
 0x11a   : > { %999 = vrot.lane.b32.xlu1 %v4939_v5, %s4432_s10  ;;  %v8604_v5 = vld [vmem:[#allocation60_spill] sm:$0xff] }
 0x11b   : > { %v5433_v18 = vpop.permute.xlu0 %851 }
 0x11c   : > { %8597 = vst [vmem:[#allocation138_spill] sm:$0xff] %v5433_v18  ;;  %v5439_v2 = vpop.permute.xlu1 %815  ;;  %v5451_v18 = vld [vmem:[#allocation2 + $0x190] sm:$0x3] }
 0x11d   : > { %1005 = vrot.lane.b32.xlu0 %v4952_v60, %s4432_s10  ;;  %8598 = vst [vmem:[#allocation139_spill] sm:$0xff] %v5439_v2  ;;  %v5454_v60 = vsel %vm495_vm3, %v948_v30, %v949_v43 }
 0x11e   : > { %1003 = vrot.lane.b32.xlu1 %v8600_v61, %s4432_s10  ;;  %8602 = vst [vmem:[#allocation142_spill] sm:$0xff] %v5454_v60 }
 0x11f   : > { %v5443_v31 = vpop.permute.xlu0 %855 }
 0x120   : > { %8599 = vst [vmem:[#allocation140_spill] sm:$0xff] %v5443_v31  ;;  %v5449_v52 = vpop.permute.xlu1 %853  ;;  %v951_v31 = vrot.slane %v5451_v18, 1 }
 0x121   : > { %1009 = vrot.lane.b32.xlu0 %v4967_v44, %s4432_s10  ;;  %8601 = vst [vmem:[#allocation141_spill] sm:$0xff] %v5449_v52  ;;  %v8607_v52 = vld [vmem:[#allocation61_spill] sm:$0xff] }
 0x122   : > { %1007 = vrot.lane.b32.xlu1 %v8604_v5, %s4432_s10  ;;  %v5470_v30 = vsel %vm495_vm3, %v949_v43, %v951_v31  ;;  %v8615_v43 = vld [vmem:[#allocation62_spill] sm:$0xff] }
 0x123   : > { %v5456_v2 = vpop.permute.xlu0 %859  ;;  %8608 = vst [vmem:[#allocation146_spill] sm:$0xff] %v5470_v30 }
 0x124   : > { %8603 = vst [vmem:[#allocation143_spill] sm:$0xff] %v5456_v2  ;;  %v5463_v61 = vpop.permute.xlu1 %857 }
 0x125   : > { %1013 = vrot.lane.b32.xlu0 %v5454_v60, %s4432_s10  ;;  %8605 = vst [vmem:[#allocation144_spill] sm:$0xff] %v5463_v61 }
 0x126   : > { %1011 = vrot.lane.b32.xlu1 %v8607_v52, %s4432_s10 }
 0x127   : > { %v5465_v44 = vpop.permute.xlu0 %863 }
 0x128   : > { %8606 = vst [vmem:[#allocation145_spill] sm:$0xff] %v5465_v44  ;;  %v5474_v2 = vpop.permute.xlu1 %861 }
 0x129   : > { %1054 = vrot.lane.b32.xlu0 %v4995_v20, %s4433_s11  ;;  %8609 = vst [vmem:[#allocation147_spill] sm:$0xff] %v5474_v2 }
 0x12a   : > { %1015 = vrot.lane.b32.xlu1 %v5470_v30, %s4432_s10 }
 0x12b   : > { %v5476_v5 = vpop.permute.xlu0 %867 }
 0x12c   : > { %8610 = vst [vmem:[#allocation148_spill] sm:$0xff] %v5476_v5  ;;  %v5482_v44 = vpop.permute.xlu1 %865 }
 0x12d   : > { %1058 = vrot.lane.b32.xlu0 %v5006_v9, %s4433_s11  ;;  %8611 = vst [vmem:[#allocation149_spill] sm:$0xff] %v5482_v44 }
 0x12e   : > { %1056 = vrot.lane.b32.xlu1 %v5012_v8, %s4433_s11 }
 0x12f   : > { %v5484_v61 = vpop.permute.xlu0 %871 }
 0x130   : > { %8612 = vst [vmem:[#allocation150_spill] sm:$0xff] %v5484_v61  ;;  %v5490_v20 = vpop.permute.xlu1 %869  ;;  %v8618_v61 = vld [vmem:[#allocation63_spill] sm:$0xff] }
 0x131   : > { %1062 = vrot.lane.b32.xlu0 %v5018_v37, %s4433_s11  ;;  %8613 = vst [vmem:[#allocation151_spill] sm:$0xff] %v5490_v20 }
 0x132   : > { %1060 = vrot.lane.b32.xlu1 %v8615_v43, %s4433_s11 }
 0x133   : > { %v5492_v31 = vpop.permute.xlu0 %875 }
 0x134   : > { %8614 = vst [vmem:[#allocation152_spill] sm:$0xff] %v5492_v31  ;;  %v5498_v5 = vpop.permute.xlu1 %873  ;;  %v8621_v31 = vld [vmem:[#allocation64_spill] sm:$0xff] }
 0x135   : > { %1066 = vrot.lane.b32.xlu0 %v5031_v42, %s4433_s11  ;;  %8616 = vst [vmem:[#allocation62_spill] sm:$0xff] %v5498_v5 }
 0x136   : > { %1064 = vrot.lane.b32.xlu1 %v8618_v61, %s4433_s11 }
 0x137   : > { %v5500_v44 = vpop.permute.xlu0 %879 }
 0x138   : > { %8617 = vst [vmem:[#allocation153_spill] sm:$0xff] %v5500_v44  ;;  %v5506_v8 = vpop.permute.xlu1 %877  ;;  %v8624_v44 = vld [vmem:[#allocation65_spill] sm:$0xff] }
 0x139   : > { %1070 = vrot.lane.b32.xlu0 %v5044_v51, %s4433_s11  ;;  %8619 = vst [vmem:[#allocation63_spill] sm:$0xff] %v5506_v8 }
 0x13a   : > { %1068 = vrot.lane.b32.xlu1 %v8621_v31, %s4433_s11 }
 0x13b   : > { %v5508_v20 = vpop.permute.xlu0 %883 }
 0x13c   : > { %8620 = vst [vmem:[#allocation154_spill] sm:$0xff] %v5508_v20  ;;  %v5514_v2 = vpop.permute.xlu1 %881  ;;  %v8627_v20 = vld [vmem:[#allocation66_spill] sm:$0xff] }
 0x13d   : > { %1074 = vrot.lane.b32.xlu0 %v5057_v59, %s4433_s11  ;;  %8622 = vst [vmem:[#allocation64_spill] sm:$0xff] %v5514_v2 }
 0x13e   : > { %1072 = vrot.lane.b32.xlu1 %v8624_v44, %s4433_s11 }
 0x13f   : > { %v5516_v5 = vpop.permute.xlu0 %887 }
 0x140   : > { %8623 = vst [vmem:[#allocation155_spill] sm:$0xff] %v5516_v5  ;;  %v5522_v30 = vpop.permute.xlu1 %885  ;;  %v8630_v5 = vld [vmem:[#allocation67_spill] sm:$0xff] }
 0x141   : > { %1078 = vrot.lane.b32.xlu0 %v5070_v39, %s4433_s11  ;;  %8625 = vst [vmem:[#allocation65_spill] sm:$0xff] %v5522_v30 }
 0x142   : > { %1076 = vrot.lane.b32.xlu1 %v8627_v20, %s4433_s11 }
 0x143   : > { %v5524_v8 = vpop.permute.xlu0 %891 }
 0x144   : > { %8626 = vst [vmem:[#allocation156_spill] sm:$0xff] %v5524_v8  ;;  %v5530_v60 = vpop.permute.xlu1 %889  ;;  %v8633_v8 = vld [vmem:[#allocation69_spill] sm:$0xff] }
 0x145   : > { %1082 = vrot.lane.b32.xlu0 %v5083_v34, %s4433_s11  ;;  %8628 = vst [vmem:[#allocation66_spill] sm:$0xff] %v5530_v60 }
 0x146   : > { %1080 = vrot.lane.b32.xlu1 %v8630_v5, %s4433_s11 }
 0x147   : > { %v5532_v2 = vpop.permute.xlu0 %895 }
 0x148   : > { %8629 = vst [vmem:[#allocation157_spill] sm:$0xff] %v5532_v2  ;;  %v5538_v52 = vpop.permute.xlu1 %893  ;;  %v8636_v2 = vld [vmem:[#allocation71_spill] sm:$0xff] }
 0x149   : > { %1086 = vrot.lane.b32.xlu0 %v5096_v53, %s4433_s11  ;;  %8631 = vst [vmem:[#allocation67_spill] sm:$0xff] %v5538_v52 }
 0x14a   : > { %1084 = vrot.lane.b32.xlu1 %v8633_v8, %s4433_s11  ;;  %v8641_v8 = vld [vmem:[#allocation74_spill] sm:$0xff] }
 0x14b   : > { %v5540_v30 = vpop.permute.xlu0 %899 }
 0x14c   : > { %8632 = vst [vmem:[#allocation158_spill] sm:$0xff] %v5540_v30  ;;  %v5546_v23 = vpop.permute.xlu1 %897  ;;  %v8640_v30 = vld [vmem:[#allocation73_spill] sm:$0xff] }
 0x14d   : > { %1090 = vrot.lane.b32.xlu0 %v5109_v45, %s4433_s11  ;;  %8634 = vst [vmem:[#allocation159_spill] sm:$0xff] %v5546_v23 }
 0x14e   : > { %1088 = vrot.lane.b32.xlu1 %v8636_v2, %s4433_s11 }
 0x14f   : > { %v5548_v60 = vpop.permute.xlu0 %903 }
 0x150   : > { %8635 = vst [vmem:[#allocation160_spill] sm:$0xff] %v5548_v60  ;;  %v5554_v53 = vpop.permute.xlu1 %901 }
 0x151   : > { %1094 = vrot.lane.b32.xlu0 %v8637_v49, %s4433_s11  ;;  %8638 = vst [vmem:[#allocation71_spill] sm:$0xff] %v5554_v53 }
 0x152   : > { %1092 = vrot.lane.b32.xlu1 %v8640_v30, %s4433_s11 }
 0x153   : > { %v5556_v52 = vpop.permute.xlu0 %907 }
 0x154   : > { %8639 = vst [vmem:[#allocation72_spill] sm:$0xff] %v5556_v52  ;;  %v5562_v45 = vpop.permute.xlu1 %905 }
 0x155   : > { %1098 = vrot.lane.b32.xlu0 %v8641_v8, %s4433_s11  ;;  %8642 = vst [vmem:[#allocation73_spill] sm:$0xff] %v5562_v45  ;;  %v1050_v45 = vrot.slane %v5331_v57, 2 }
 0x156   : > { %1096 = vrot.lane.b32.xlu1 %v5142_v28, %s4433_s11 }
 0x157   : > { %v5564_v23 = vpop.permute.xlu0 %911 }
 0x158   : > { %8643 = vst [vmem:[#allocation161_spill] sm:$0xff] %v5564_v23  ;;  %v5570_v60 = vpop.permute.xlu1 %909  ;;  %v1049_v23 = vrot.slane %v5317_v6, 2 }
 0x159   : > { %1102 = vrot.lane.b32.xlu0 %v5148_v15, %s4433_s11  ;;  %8644 = vst [vmem:[#allocation162_spill] sm:$0xff] %v5570_v60 }
 0x15a   : > { %1100 = vrot.lane.b32.xlu1 %v5157_v7, %s4433_s11 }
 0x15b   : > { %v5572_v53 = vpop.permute.xlu0 %953 }
 0x15c   : > { %8645 = vst [vmem:[#allocation163_spill] sm:$0xff] %v5572_v53  ;;  %v5578_v52 = vpop.permute.xlu1 %913  ;;  %v5591_v53 = vsel %vm672_vm4, %v1049_v23, %v1050_v45 }
 0x15d   : > { %1106 = vrot.lane.b32.xlu0 %v5163_v26, %s4433_s11  ;;  %8646 = vst [vmem:[#allocation164_spill] sm:$0xff] %v5578_v52  ;;  %v1052_v52 = vrot.slane %v5451_v18, 2 }
 0x15e   : > { %1104 = vrot.lane.b32.xlu1 %v5172_v33, %s4433_s11 }
 0x15f   : > { %v5582_v8 = vpop.permute.xlu0 %957  ;;  %v5607_v23 = vsel %vm672_vm4, %v1050_v45, %v1052_v52 }
 0x160   : > { %8647 = vst [vmem:[#allocation165_spill] sm:$0xff] %v5582_v8  ;;  %v5588_v60 = vpop.permute.xlu1 %955 }
 0x161   : > { %1110 = vrot.lane.b32.xlu0 %v5180_v11, %s4433_s11 }
 0x162   : > { %1108 = vrot.lane.b32.xlu1 %v5187_v22, %s4433_s11 }
 0x163   : > { %v5593_v26 = vpop.permute.xlu0 %961 }
 0x164   : > { %8648 = vst [vmem:[#allocation166_spill] sm:$0xff] %v5593_v26  ;;  %v5600_v8 = vpop.permute.xlu1 %959 }
 0x165   : > { %1114 = vrot.lane.b32.xlu0 %v5591_v53, %s4433_s11  ;;  %8649 = vst [vmem:[#allocation167_spill] sm:$0xff] %v5600_v8 }
 0x166   : > { %1112 = vrot.lane.b32.xlu1 %v5199_v50, %s4433_s11 }
 0x167   : > { %v5602_v33 = vpop.permute.xlu0 %965 }
 0x168   : > { %8650 = vst [vmem:[#allocation168_spill] sm:$0xff] %v5602_v33  ;;  %v5611_v26 = vpop.permute.xlu1 %963 }
 0x169   : > { %1152 = vrot.lane.b32.xlu0 %v4646_v32, %s4434_s12 }
 0x16a   : > { %1116 = vrot.lane.b32.xlu1 %v5607_v23, %s4433_s11 }
 0x16b   : > { %v5613_v18 = vpop.permute.xlu0 %969 }
 0x16c   : > { %v5619_v33 = vpop.permute.xlu1 %967 }
 0x16d   : > { %1156 = vrot.lane.b32.xlu0 %v4664_v40, %s4434_s12 }
 0x16e   : > { %1154 = vrot.lane.b32.xlu1 %v4656_v35, %s4434_s12 }
 0x16f   : > { %v5621_v8 = vpop.permute.xlu0 %973 }
 0x170   : > { %v5627_v32 = vpop.permute.xlu1 %971 }
 0x171   : > { %1160 = vrot.lane.b32.xlu0 %v4680_v47, %s4434_s12 }
 0x172   : > { %1158 = vrot.lane.b32.xlu1 %v4666_v41, %s4434_s12 }
 0x173   : > { %v5629_v45 = vpop.permute.xlu0 %977 }
 0x174   : > { %v5635_v40 = vpop.permute.xlu1 %975 }
 0x175   : > { %1164 = vrot.lane.b32.xlu0 %v4699_v55, %s4434_s12 }
 0x176   : > { %1162 = vrot.lane.b32.xlu1 %v4682_v48, %s4434_s12 }
 0x177   : > { %v5637_v52 = vpop.permute.xlu0 %981 }
 0x178   : > { %v5643_v35 = vpop.permute.xlu1 %979 }
 0x179   : > { %1168 = vrot.lane.b32.xlu0 %v4719_v0, %s4434_s12 }
 0x17a   : > { %1166 = vrot.lane.b32.xlu1 %v4701_v56, %s4434_s12 }
 0x17b   : > { %v5645_v47 = vpop.permute.xlu0 %985 }
 0x17c   : > { %v5651_v41 = vpop.permute.xlu1 %983 }
 0x17d   : > { %1172 = vrot.lane.b32.xlu0 %v4782_v36, %s4434_s12 }
 0x17e   : > { %1170 = vrot.lane.b32.xlu1 %v4721_v10, %s4434_s12 }
 0x17f   : > { %v5653_v55 = vpop.permute.xlu0 %989 }
 0x180   : > { %8651 = vst [vmem:[#allocation169_spill] sm:$0xff] %v5653_v55  ;;  %v5659_v48 = vpop.permute.xlu1 %987 }
 0x181   : > { %1176 = vrot.lane.b32.xlu0 %v4801_v12, %s4434_s12  ;;  %8652 = vst [vmem:[#allocation170_spill] sm:$0xff] %v5659_v48 }
 0x182   : > { %1174 = vrot.lane.b32.xlu1 %v4784_v38, %s4434_s12 }
 0x183   : > { %v5661_v0 = vpop.permute.xlu0 %993 }
 0x184   : > { %8653 = vst [vmem:[#allocation171_spill] sm:$0xff] %v5661_v0  ;;  %v5667_v56 = vpop.permute.xlu1 %991  ;;  %v8701_v0 = vld [vmem:[#allocation52_spill] sm:$0xff] }
 0x185   : > { %1180 = vrot.lane.b32.xlu0 %v4820_v24, %s4434_s12  ;;  %8654 = vst [vmem:[#allocation172_spill] sm:$0xff] %v5667_v56 }
 0x186   : > { %1178 = vrot.lane.b32.xlu1 %v4803_v54, %s4434_s12 }
 0x187   : > { %v5669_v36 = vpop.permute.xlu0 %997 }
 0x188   : > { %8655 = vst [vmem:[#allocation173_spill] sm:$0xff] %v5669_v36  ;;  %v5675_v10 = vpop.permute.xlu1 %995 }
 0x189   : > { %1184 = vrot.lane.b32.xlu0 %v4839_v21, %s4434_s12  ;;  %8656 = vst [vmem:[#allocation174_spill] sm:$0xff] %v5675_v10  ;;  %v8699_v10 = vld [vmem:[#allocation50_spill] sm:$0xff] }
 0x18a   : > { %1182 = vrot.lane.b32.xlu1 %v4822_v63, %s4434_s12 }
 0x18b   : > { %v5677_v12 = vpop.permute.xlu0 %1001 }
 0x18c   : > { %8657 = vst [vmem:[#allocation175_spill] sm:$0xff] %v5677_v12  ;;  %v5683_v24 = vpop.permute.xlu1 %999 }
 0x18d   : > { %1188 = vrot.lane.b32.xlu0 %v4858_v13, %s4434_s12  ;;  %8658 = vst [vmem:[#allocation176_spill] sm:$0xff] %v5683_v24  ;;  %v8676_v24 = vld [vmem:[#allocation40_spill] sm:$0xff] }
 0x18e   : > { %1186 = vrot.lane.b32.xlu1 %v4841_v29, %s4434_s12  ;;  %v440_v29 = vld [vmem:[%s8251_s1] sm:$0xff] }
 0x18f   : > { %v5685_v38 = vpop.permute.xlu0 %1005 }
 0x190   : > { %8659 = vst [vmem:[#allocation177_spill] sm:$0xff] %v5685_v38  ;;  %v5691_v21 = vpop.permute.xlu1 %1003 }
 0x191   : > { %1192 = vrot.lane.b32.xlu0 %v4877_v4, %s4434_s12  ;;  %8660 = vst [vmem:[#allocation178_spill] sm:$0xff] %v5691_v21  ;;  %v8670_v21 = vld [vmem:[#allocation38_spill] sm:$0xff] }
 0x192   : > { %1190 = vrot.lane.b32.xlu1 %v4860_v25, %s4434_s12 }
 0x193   : > { %v5693_v54 = vpop.permute.xlu0 %1009 }
 0x194   : > { %8661 = vst [vmem:[#allocation179_spill] sm:$0xff] %v5693_v54  ;;  %v5699_v13 = vpop.permute.xlu1 %1007 }
 0x195   : > { %1196 = vrot.lane.b32.xlu0 %v4896_v58, %s4434_s12  ;;  %8662 = vst [vmem:[#allocation180_spill] sm:$0xff] %v5699_v13  ;;  %v441_v58 = vld [vmem:[%s8251_s1 + $0x8] sm:$0xff]  ;;  %v8666_v13 = vld [vmem:[#allocation31_spill] sm:$0xff] }
 0x196   : > { %1194 = vrot.lane.b32.xlu1 %v4879_v17, %s4434_s12 }
 0x197   : > { %v5701_v63 = vpop.permute.xlu0 %1013 }
 0x198   : > { %8663 = vst [vmem:[#allocation181_spill] sm:$0xff] %v5701_v63  ;;  %v5707_v4 = vpop.permute.xlu1 %1011  ;;  %v4323_v63 = vpack.c.bf16 %v441_v58, %v440_v29  ;;  %v444_v58 = vld [vmem:[%s8251_s1 + $0x20] sm:$0xf] }
 0x199   : > { %1200 = vrot.lane.b32.xlu0 %v4915_v1, %s4434_s12  ;;  %8664 = vst [vmem:[#allocation182_spill] sm:$0xff] %v5707_v4  ;;  %v442_v1 = vld [vmem:[%s8251_s1 + $0x10] sm:$0xff]  ;;  %v443_v4 = vld [vmem:[%s8251_s1 + $0x18] sm:$0xff] }
 0x19a   : > { %1198 = vrot.lane.b32.xlu1 %v4898_v14, %s4434_s12  ;;  %4324 = vmatprep.subr.bf16.mxu0 %v4323_v63  ;;  %v4327_v14 = vpack.c.bf16 %v443_v4, %v442_v1 }
 0x19b   : > { %v5715_v25 = vpop.permute.xlu0 %1054  ;;  %4326 = vmatpush3.bf16.msra.mxu0 %v4323_v63  ;;  %v5737_v63 = vld [vmem:[#allocation2 + $0x198] sm:$0xff] }
 0x19c   : > { %v5721_v17 = vpop.permute.xlu1 %1015  ;;  %4328 = vmatprep.subr.bf16.mxu0 %v4327_v14 }
 0x19d   : > { %1204 = vrot.lane.b32.xlu0 %v4934_v62, %s4434_s12  ;;  %8665 = vst [vmem:[#allocation183_spill] sm:$0xff] %v5721_v17 }
 0x19e   : > { %1202 = vrot.lane.b32.xlu1 %v4917_v16, %s4434_s12 }
 0x19f   : > { %v5729_v54 = vpop.permute.xlu0 %1058  ;;  %4330 = vmatpush3.bf16.msra.mxu0 %v4327_v14 }
 0x1a0   : > { %v5735_v62 = vpop.permute.xlu1 %1056  ;;  %4215 = vmatprep.subr.msk.mxu0 %vm1811_vm5, %v444_v58 }
 0x1a1   : > { %1208 = vrot.lane.b32.xlu0 %v5317_v6, %s4434_s12 }
 0x1a2   : > { %1206 = vrot.lane.b32.xlu1 %v4936_v3, %s4434_s12  ;;  %v5756_v3 = vld [vmem:[#allocation2 + $0x1a0] sm:$0xff] }
 0x1a3   : > { %v5739_v29 = vpop.permute.xlu0 %1062  ;;  %4216 = vmatpush3.msk.msra.mxu0 %vm1811_vm5, %v444_v58 }
 0x1a4   : > { %v5748_v16 = vpop.permute.xlu1 %1060 }
 0x1a5   : > { %1212 = vrot.lane.b32.xlu0 %v5737_v63, %s4434_s12 }
 0x1a6   : > { %1210 = vrot.lane.b32.xlu1 %v5331_v57, %s4434_s12 }
 0x1a7   : > { %v5752_v6 = vpop.permute.xlu0 %1066 }
 0x1a8   : > { %v5760_v4 = vpop.permute.xlu1 %1064 }
 0x1a9   : > { %1254 = vrot.lane.b32.xlu0 %v4678_v46, %s4435_s23 }
 0x1aa   : > { %1214 = vrot.lane.b32.xlu1 %v5756_v3, %s4434_s12 }
 0x1ab   : > { %v5762_v1 = vpop.permute.xlu0 %1070 }
 0x1ac   : > { %v5768_v14 = vpop.permute.xlu1 %1068 }
 0x1ad   : > { %1355 = vrot.lane.b32.xlu0 %v5006_v9, %s4436_s27 }
 0x1ae   : > { %1256 = vrot.lane.b32.xlu1 %v8558_v27, %s4435_s23  ;;  %v8667_v27 = vld [vmem:[#allocation27_spill] sm:$0xff] }
 0x1af   : > { %v5770_v57 = vpop.permute.xlu0 %1074 }
 0x1b0   : > { %v5776_v46 = vpop.permute.xlu1 %1072 }
 0x1b1   : > { %1258 = vrot.lane.b32.xlu0 %v8555_v19, %s4435_s23 }
 0x1b2   : > { %1357 = vrot.lane.b32.xlu1 %v8615_v43, %s4436_s27 }
 0x1b3   : > { %v5778_v58 = vpop.permute.xlu0 %1078 }
 0x1b4   : > { %v5784_v9 = vpop.permute.xlu1 %1076 }
 0x1b5   : > { %1359 = vrot.lane.b32.xlu0 %v5018_v37, %s4436_s27 }
 0x1b6   : > { %1260 = vrot.lane.b32.xlu1 %v8666_v13, %s4435_s23  ;;  %v8671_v13 = vld [vmem:[#allocation37_spill] sm:$0xff] }
 0x1b7   : > { %v5786_v17 = vpop.permute.xlu0 %1082 }
 0x1b8   : > { %v5792_v19 = vpop.permute.xlu1 %1080 }
 0x1b9   : > { %1262 = vrot.lane.b32.xlu0 %v8667_v27, %s4435_s23 }
 0x1ba   : > { %1361 = vrot.lane.b32.xlu1 %v8618_v61, %s4436_s27 }
 0x1bb   : > { %v5794_v38 = vpop.permute.xlu0 %1086 }
 0x1bc   : > { %8668 = vst [vmem:[#allocation31_spill] sm:$0xff] %v5794_v38  ;;  %v5800_v37 = vpop.permute.xlu1 %1084  ;;  %v8739_v38 = vld [vmem:[#allocation141_spill] sm:$0xff] }
 0x1bd   : > { %1363 = vrot.lane.b32.xlu0 %v5031_v42, %s4436_s27 }
 0x1be   : > { %1264 = vrot.lane.b32.xlu1 %v8670_v21, %s4435_s23  ;;  %v8677_v21 = vld [vmem:[#allocation39_spill] sm:$0xff] }
 0x1bf   : > { %v5802_v43 = vpop.permute.xlu0 %1090 }
 0x1c0   : > { %8669 = vst [vmem:[#allocation27_spill] sm:$0xff] %v5802_v43  ;;  %v5808_v27 = vpop.permute.xlu1 %1088  ;;  %v8707_v43 = vld [vmem:[#allocation54_spill] sm:$0xff] }
 0x1c1   : > { %1266 = vrot.lane.b32.xlu0 %v8671_v13, %s4435_s23  ;;  %8672 = vst [vmem:[#allocation38_spill] sm:$0xff] %v5808_v27 }
 0x1c2   : > { %1365 = vrot.lane.b32.xlu1 %v8621_v31, %s4436_s27 }
 0x1c3   : > { %v5810_v12 = vpop.permute.xlu0 %1094 }
 0x1c4   : > { %8673 = vst [vmem:[#allocation37_spill] sm:$0xff] %v5810_v12  ;;  %v5816_v42 = vpop.permute.xlu1 %1092 }
 0x1c5   : > { %1367 = vrot.lane.b32.xlu0 %v5044_v51, %s4436_s27  ;;  %8674 = vst [vmem:[#allocation184_spill] sm:$0xff] %v5816_v42 }
 0x1c6   : > { %1268 = vrot.lane.b32.xlu1 %v8676_v24, %s4435_s23  ;;  %v8683_v24 = vld [vmem:[#allocation41_spill] sm:$0xff] }
 0x1c7   : > { %v5818_v61 = vpop.permute.xlu0 %1098 }
 0x1c8   : > { %8675 = vst [vmem:[#allocation185_spill] sm:$0xff] %v5818_v61  ;;  %v5824_v13 = vpop.permute.xlu1 %1096  ;;  %v8682_v61 = vld [vmem:[#allocation42_spill] sm:$0xff] }
 0x1c9   : > { %1270 = vrot.lane.b32.xlu0 %v8677_v21, %s4435_s23  ;;  %8678 = vst [vmem:[#allocation40_spill] sm:$0xff] %v5824_v13 }
 0x1ca   : > { %1369 = vrot.lane.b32.xlu1 %v8624_v44, %s4436_s27 }
 0x1cb   : > { %v5826_v36 = vpop.permute.xlu0 %1102 }
 0x1cc   : > { %8679 = vst [vmem:[#allocation39_spill] sm:$0xff] %v5826_v36  ;;  %v5832_v51 = vpop.permute.xlu1 %1100 }
 0x1cd   : > { %1371 = vrot.lane.b32.xlu0 %v5057_v59, %s4436_s27  ;;  %8680 = vst [vmem:[#allocation186_spill] sm:$0xff] %v5832_v51 }
 0x1ce   : > { %1272 = vrot.lane.b32.xlu1 %v8682_v61, %s4435_s23  ;;  %v8689_v61 = vld [vmem:[#allocation43_spill] sm:$0xff] }
 0x1cf   : > { %v5834_v31 = vpop.permute.xlu0 %1106 }
 0x1d0   : > { %8681 = vst [vmem:[#allocation187_spill] sm:$0xff] %v5834_v31  ;;  %v5840_v21 = vpop.permute.xlu1 %1104  ;;  %v8688_v31 = vld [vmem:[#allocation44_spill] sm:$0xff] }
 0x1d1   : > { %1274 = vrot.lane.b32.xlu0 %v8683_v24, %s4435_s23  ;;  %8684 = vst [vmem:[#allocation42_spill] sm:$0xff] %v5840_v21 }
 0x1d2   : > { %1373 = vrot.lane.b32.xlu1 %v8627_v20, %s4436_s27 }
 0x1d3   : > { %v5842_v13 = vpop.permute.xlu0 %1110 }
 0x1d4   : > { %8685 = vst [vmem:[#allocation41_spill] sm:$0xff] %v5842_v13  ;;  %v5848_v44 = vpop.permute.xlu1 %1108  ;;  %v8694_v13 = vld [vmem:[#allocation69_spill] sm:$0xff] }
 0x1d5   : > { %1375 = vrot.lane.b32.xlu0 %v5070_v39, %s4436_s27  ;;  %8686 = vst [vmem:[#allocation188_spill] sm:$0xff] %v5848_v44  ;;  %v8696_v44 = vld [vmem:[#allocation48_spill] sm:$0xff] }
 0x1d6   : > { %1276 = vrot.lane.b32.xlu1 %v8688_v31, %s4435_s23  ;;  %v8693_v31 = vld [vmem:[#allocation45_spill] sm:$0xff] }
 0x1d7   : > { %v5850_v59 = vpop.permute.xlu0 %1114 }
 0x1d8   : > { %8687 = vst [vmem:[#allocation189_spill] sm:$0xff] %v5850_v59  ;;  %v5856_v24 = vpop.permute.xlu1 %1112  ;;  %v8692_v59 = vld [vmem:[#allocation46_spill] sm:$0xff] }
 0x1d9   : > { %1278 = vrot.lane.b32.xlu0 %v8689_v61, %s4435_s23  ;;  %8690 = vst [vmem:[#allocation44_spill] sm:$0xff] %v5856_v24 }
 0x1da   : > { %1377 = vrot.lane.b32.xlu1 %v8630_v5, %s4436_s27  ;;  %v8695_v5 = vld [vmem:[#allocation68_spill] sm:$0xff] }
 0x1db   : > { %v5858_v21 = vpop.permute.xlu0 %1152 }
 0x1dc   : > { %v5864_v39 = vpop.permute.xlu1 %1116 }
 0x1dd   : > { %1379 = vrot.lane.b32.xlu0 %v5083_v34, %s4436_s27  ;;  %8691 = vst [vmem:[#allocation43_spill] sm:$0xff] %v5864_v39 }
 0x1de   : > { %1280 = vrot.lane.b32.xlu1 %v8692_v59, %s4435_s23  ;;  %v8697_v59 = vld [vmem:[#allocation47_spill] sm:$0xff] }
 0x1df   : > { %v5866_v20 = vpop.permute.xlu0 %1156 }
 0x1e0   : > { %v5872_v61 = vpop.permute.xlu1 %1154 }
 0x1e1   : > { %1282 = vrot.lane.b32.xlu0 %v8693_v31, %s4435_s23 }
 0x1e2   : > { %1381 = vrot.lane.b32.xlu1 %v8694_v13, %s4436_s27  ;;  %v8698_v13 = vld [vmem:[#allocation70_spill] sm:$0xff] }
 0x1e3   : > { %v5874_v24 = vpop.permute.xlu0 %1160 }
 0x1e4   : > { %v5880_v34 = vpop.permute.xlu1 %1158 }
 0x1e5   : > { %1383 = vrot.lane.b32.xlu0 %v8695_v5, %s4436_s27 }
 0x1e6   : > { %1284 = vrot.lane.b32.xlu1 %v8696_v44, %s4435_s23  ;;  %v8700_v44 = vld [vmem:[#allocation49_spill] sm:$0xff] }
 0x1e7   : > { %v5882_v39 = vpop.permute.xlu0 %1164 }
 0x1e8   : > { %v5888_v31 = vpop.permute.xlu1 %1162 }
 0x1e9   : > { %1286 = vrot.lane.b32.xlu0 %v8697_v59, %s4435_s23 }
 0x1ea   : > { %1385 = vrot.lane.b32.xlu1 %v8636_v2, %s4436_s27 }
 0x1eb   : > { %v5890_v36 = vpop.permute.xlu0 %1168 }
 0x1ec   : > { %v5896_v5 = vpop.permute.xlu1 %1166 }
 0x1ed   : > { %1387 = vrot.lane.b32.xlu0 %v8698_v13, %s4436_s27 }
 0x1ee   : > { %1288 = vrot.lane.b32.xlu1 %v8699_v10, %s4435_s23  ;;  %v8702_v10 = vld [vmem:[#allocation51_spill] sm:$0xff] }
 0x1ef   : > { %v5898_v51 = vpop.permute.xlu0 %1172 }
 0x1f0   : > { %v5904_v59 = vpop.permute.xlu1 %1170 }
 0x1f1   : > { %1290 = vrot.lane.b32.xlu0 %v8700_v44, %s4435_s23 }
 0x1f2   : > { %1389 = vrot.lane.b32.xlu1 %v8640_v30, %s4436_s27  ;;  %v8704_v30 = vld [vmem:[#allocation74_spill] sm:$0xff] }
 0x1f3   : > { %v5906_v12 = vpop.permute.xlu0 %1176 }
 0x1f4   : > { %v5912_v2 = vpop.permute.xlu1 %1174 }
 0x1f5   : > { %1391 = vrot.lane.b32.xlu0 %v8637_v49, %s4436_s27 }
 0x1f6   : > { %1292 = vrot.lane.b32.xlu1 %v8701_v0, %s4435_s23  ;;  %v8708_v0 = vld [vmem:[#allocation53_spill] sm:$0xff] }
 0x1f7   : > { %v5914_v13 = vpop.permute.xlu0 %1180 }
 0x1f8   : > { %v5920_v44 = vpop.permute.xlu1 %1178 }
 0x1f9   : > { %1294 = vrot.lane.b32.xlu0 %v8702_v10, %s4435_s23 }
 0x1fa   : > { %1393 = vrot.lane.b32.xlu1 %v5142_v28, %s4436_s27 }
 0x1fb   : > { %v5922_v42 = vpop.permute.xlu0 %1184 }
 0x1fc   : > { %8703 = vst [vmem:[#allocation46_spill] sm:$0xff] %v5922_v42  ;;  %v5928_v49 = vpop.permute.xlu1 %1182 }
 0x1fd   : > { %1395 = vrot.lane.b32.xlu0 %v8704_v30, %s4436_s27  ;;  %8705 = vst [vmem:[#allocation45_spill] sm:$0xff] %v5928_v49 }
 0x1fe   : > { %1296 = vrot.lane.b32.xlu1 %v8707_v43, %s4435_s23  ;;  %v8714_v43 = vld [vmem:[#allocation56_spill] sm:$0xff] }
 0x1ff   : > { %v5930_v56 = vpop.permute.xlu0 %1188 }
 0x200   : > { %8706 = vst [vmem:[#allocation69_spill] sm:$0xff] %v5930_v56  ;;  %v5936_v10 = vpop.permute.xlu1 %1186  ;;  %v8713_v56 = vld [vmem:[#allocation57_spill] sm:$0xff] }
 0x201   : > { %1298 = vrot.lane.b32.xlu0 %v8708_v0, %s4435_s23  ;;  %8709 = vst [vmem:[#allocation68_spill] sm:$0xff] %v5936_v10 }
 0x202   : > { %1397 = vrot.lane.b32.xlu1 %v5157_v7, %s4436_s27  ;;  %v8718_v7 = vld [vmem:[#allocation76_spill] sm:$0xff] }
 0x203   : > { %v5938_v55 = vpop.permute.xlu0 %1192 }
 0x204   : > { %8710 = vst [vmem:[#allocation48_spill] sm:$0xff] %v5938_v55  ;;  %v5944_v28 = vpop.permute.xlu1 %1190  ;;  %v8717_v55 = vld [vmem:[#allocation78_spill] sm:$0xff] }
 0x205   : > { %1399 = vrot.lane.b32.xlu0 %v5148_v15, %s4436_s27  ;;  %8711 = vst [vmem:[#allocation47_spill] sm:$0xff] %v5944_v28 }
 0x206   : > { %1300 = vrot.lane.b32.xlu1 %v8713_v56, %s4435_s23  ;;  %v8722_v56 = vld [vmem:[#allocation58_spill] sm:$0xff] }
 0x207   : > { %v5946_v30 = vpop.permute.xlu0 %1196 }
 0x208   : > { %8712 = vst [vmem:[#allocation70_spill] sm:$0xff] %v5946_v30  ;;  %v5952_v0 = vpop.permute.xlu1 %1194  ;;  %v8721_v30 = vld [vmem:[#allocation60_spill] sm:$0xff] }
 0x209   : > { %1302 = vrot.lane.b32.xlu0 %v8714_v43, %s4435_s23  ;;  %8715 = vst [vmem:[#allocation50_spill] sm:$0xff] %v5952_v0 }
 0x20a   : > { %1401 = vrot.lane.b32.xlu1 %v8717_v55, %s4436_s27 }
 0x20b   : > { %v5954_v10 = vpop.permute.xlu0 %1200 }
 0x20c   : > { %8716 = vst [vmem:[#allocation49_spill] sm:$0xff] %v5954_v10  ;;  %v5960_v15 = vpop.permute.xlu1 %1198  ;;  %v1250_v10 = vrot.slane %v5756_v3, 1 }
 0x20d   : > { %1403 = vrot.lane.b32.xlu0 %v8718_v7, %s4436_s27  ;;  %8719 = vst [vmem:[#allocation52_spill] sm:$0xff] %v5960_v15 }
 0x20e   : > { %1304 = vrot.lane.b32.xlu1 %v8721_v30, %s4435_s23  ;;  %v8727_v30 = vld [vmem:[#allocation61_spill] sm:$0xff] }
 0x20f   : > { %v5962_v28 = vpop.permute.xlu0 %1204 }
 0x210   : > { %8720 = vst [vmem:[#allocation51_spill] sm:$0xff] %v5962_v28  ;;  %v5968_v43 = vpop.permute.xlu1 %1202  ;;  %v8728_v28 = vld [vmem:[#allocation75_spill] sm:$0xff] }
 0x211   : > { %1306 = vrot.lane.b32.xlu0 %v8722_v56, %s4435_s23  ;;  %8723 = vst [vmem:[#allocation74_spill] sm:$0xff] %v5968_v43  ;;  %v4356_v56 = vld [vmem:[#allocation2] sm:$0xff] }
 0x212   : > { %1405 = vrot.lane.b32.xlu1 %v5187_v22, %s4436_s27  ;;  %v1451_v43 = vsel %vm279_vm0, %v4356_v56, %v8728_v28  ;;  %v8733_v28 = vld [vmem:[#allocation163_spill] sm:$0xff]  ;;  %v1350_v56 = vrot.slane %v5737_v63, 2 }
 0x213   : > { %v5970_v0 = vpop.permute.xlu0 %1208 }
 0x214   : > { %8724 = vst [vmem:[#allocation54_spill] sm:$0xff] %v5970_v0  ;;  %v5976_v55 = vpop.permute.xlu1 %1206  ;;  %v8729_v0 = vld [vmem:[#allocation142_spill] sm:$0xff] }
 0x215   : > { %1407 = vrot.lane.b32.xlu0 %v5180_v11, %s4436_s27  ;;  %8725 = vst [vmem:[#allocation53_spill] sm:$0xff] %v5976_v55  ;;  %v8731_v11 = vld [vmem:[#allocation108_spill] sm:$0xff] }
 0x216   : > { %1308 = vrot.lane.b32.xlu1 %v8727_v30, %s4435_s23  ;;  %v1484_v55 = vsel %vm1483_vm6, %v1451_v43, %v8731_v11  ;;  %v8732_v30 = vld [vmem:[#allocation138_spill] sm:$0xff] }
 0x217   : > { %v5978_v7 = vpop.permute.xlu0 %1212  ;;  %v1517_v15 = vsel %vm1516_vm7, %v1484_v55, %v8732_v30  ;;  %v439_v55 = vld [vmem:[#allocation2 + $0x1a8] sm:$0x3]  ;;  %v1351_v30 = vrot.slane %v5756_v3, 2 }
 0x218   : > { %8726 = vst [vmem:[#allocation57_spill] sm:$0xff] %v5978_v7  ;;  %v5986_v22 = vpop.permute.xlu1 %1210  ;;  %v1249_v7 = vrot.slane %v5737_v63, 1  ;;  %v1252_v42 = vrot.slane %v439_v55, 1 }
 0x219   : > { %1310 = vrot.lane.b32.xlu0 %v8729_v0, %s4435_s23  ;;  %8730 = vst [vmem:[#allocation56_spill] sm:$0xff] %v5986_v22  ;;  %v1550_v0 = vsel %vm1549_vm8, %v1517_v15, %v8733_v28  ;;  %v4357_v28 = vld [vmem:[#allocation2 + $0x8] sm:$0xff]  ;;  %v8735_v22 = vld [vmem:[#allocation77_spill] sm:$0xff] }
 0x21a   : > { %1409 = vrot.lane.b32.xlu1 %v5199_v50, %s4436_s27  ;;  %v1583_v43 = vsel %vm1582_vm9, %v1550_v0, %v5715_v25  ;;  %v1251_v15 = vsel %vm495_vm3, %v1249_v7, %v1250_v10  ;;  %v1452_v25 = vsel %vm279_vm0, %v4357_v28, %v8735_v22  ;;  %v8740_v22 = vld [vmem:[#allocation110_spill] sm:$0xff]  ;;  %v1352_v28 = vsel %vm672_vm4, %v1350_v56, %v1351_v30 }
 0x21b   : > { %v1255_v27 = vpop.permute.xlu0 %1254  ;;  %v1616_v50 = vsel %vm1615_vm10, %v1583_v43, %v5858_v21  ;;  %v4358_v21 = vld [vmem:[#allocation2 + $0x18] sm:$0xff]  ;;  %v8738_v43 = vld [vmem:[#allocation79_spill] sm:$0xff] }
 0x21c   : > { %v6003_v11 = vpop.permute.xlu1 %1214  ;;  %v1649_v63 = vsel %vm1648_vm11, %v1616_v50, %v1255_v27  ;;  %v1453_v7 = vsel %vm279_vm0, %v4358_v21, %v8738_v43  ;;  %v4359_v43 = vld [vmem:[#allocation2 + $0x20] sm:$0xff] }
 0x21d   : > { %1411 = vrot.lane.b32.xlu0 %v5591_v53, %s4436_s27  ;;  %8734 = vst [vmem:[#allocation78_spill] sm:$0xff] %v6003_v11  ;;  %v8736_v53 = vld [vmem:[#allocation146_spill] sm:$0xff]  ;;  %v8737_v11 = vld [vmem:[#allocation111_spill] sm:$0xff]  ;;  %v1486_v50 = vsel %vm1483_vm6, %v1453_v7, %v8740_v22  ;;  %v8743_v7 = vld [vmem:[#allocation81_spill] sm:$0xff] }
 0x21e   : > { %1312 = vrot.lane.b32.xlu1 %v8736_v53, %s4435_s23  ;;  %v1485_v48 = vsel %vm1483_vm6, %v1452_v25, %v8737_v11  ;;  %v8741_v25 = vld [vmem:[#allocation140_spill] sm:$0xff]  ;;  %v4360_v22 = vld [vmem:[#allocation2 + $0x30] sm:$0xff] }
 0x21f   : > { %v1356_v0 = vpop.permute.xlu0 %1355  ;;  %v1518_v49 = vsel %vm1516_vm7, %v1485_v48, %v8739_v38  ;;  %v8742_v38 = vld [vmem:[#allocation165_spill] sm:$0xff] }
 0x220   : > { %v1682_v3 = vsel %vm1681_vm12, %v1649_v63, %v1356_v0  ;;  %v1257_v27 = vpop.permute.xlu1 %1256  ;;  %v1551_v11 = vsel %vm1549_vm8, %v1518_v49, %v5588_v60  ;;  %v1519_v63 = vsel %vm1516_vm7, %v1486_v50, %v8741_v25  ;;  %v1253_v60 = vsel %vm495_vm3, %v1250_v10, %v1252_v42  ;;  %v8745_v50 = vld [vmem:[#allocation80_spill] sm:$0xff] }
 0x221   : > { %1314 = vrot.lane.b32.xlu0 %v1251_v15, %s4435_s23  ;;  %4217 = vmatprep.mubr.msk.f32.mxu0 %vm1714_vm13, %v1682_v3  ;;  %v1584_v0 = vsel %vm1582_vm9, %v1551_v11, %v5735_v62  ;;  %v1552_v15 = vsel %vm1549_vm8, %v1519_v63, %v8742_v38  ;;  %v1353_v49 = vrot.slane %v439_v55, 2  ;;  %v1455_v11 = vsel %vm279_vm0, %v4360_v22, %v8745_v50  ;;  %v8748_v38 = vld [vmem:[#allocation167_spill] sm:$0xff]  ;;  %v8753_v22 = vld [vmem:[#allocation82_spill] sm:$0xff] }
 0x222   : > { %1413 = vrot.lane.b32.xlu1 %v5607_v23, %s4436_s27  ;;  %v1617_v53 = vsel %vm1615_vm10, %v1584_v0, %v5872_v61  ;;  %v1585_v56 = vsel %vm1582_vm9, %v1552_v15, %v5729_v54  ;;  %v1454_v61 = vsel %vm279_vm0, %v4359_v43, %v8743_v7  ;;  %v8744_v54 = vld [vmem:[#allocation113_spill] sm:$0xff]  ;;  %v8747_v0 = vld [vmem:[#allocation112_spill] sm:$0xff]  ;;  %v8754_v50 = vld [vmem:[#allocation147_spill] sm:$0xff] }
 0x223   : > { %v1259_v48 = vpop.permute.xlu0 %1258  ;;  %v1650_v3 = vsel %vm1648_vm11, %v1617_v53, %v1257_v27  ;;  %v1618_v23 = vsel %vm1615_vm10, %v1585_v56, %v5866_v20  ;;  %v1487_v55 = vsel %vm1483_vm6, %v1454_v61, %v8744_v54  ;;  %v1354_v20 = vsel %vm672_vm4, %v1351_v30, %v1353_v49  ;;  %v8749_v53 = vld [vmem:[#allocation143_spill] sm:$0xff]  ;;  %v8750_v56 = vld [vmem:[#allocation166_spill] sm:$0xff]  ;;  %v4361_v61 = vld [vmem:[#allocation2 + $0x38] sm:$0xff] }
 0x224   : > { %v1358_v62 = vpop.permute.xlu1 %1357  ;;  %v1651_v42 = vsel %vm1648_vm11, %v1618_v23, %v1259_v48  ;;  %v1488_v48 = vsel %vm1483_vm6, %v1455_v11, %v8747_v0 }
 0x225   : > { %1415 = vrot.lane.b32.xlu0 %v1352_v28, %s4436_s27  ;;  %v1683_v21 = vsel %vm1681_vm12, %v1650_v3, %v1358_v62  ;;  %v8746_v28 = vld [vmem:[#allocation144_spill] sm:$0xff] }
 0x226   : > { %1316 = vrot.lane.b32.xlu1 %v1253_v60, %s4435_s23  ;;  %4218 = vmatmul.mubr.msk.f32.vlgmr.msra.gmra.mrb[0].mxu0 %vm1714_vm13, %v1683_v21  ;;  %v1520_v25 = vsel %vm1516_vm7, %v1487_v55, %v8746_v28  ;;  %v1521_v60 = vsel %vm1516_vm7, %v1488_v48, %v8749_v53  ;;  %v8756_v48 = vld [vmem:[#allocation145_spill] sm:$0xff] }
 0x227   : > { %v1360_v10 = vpop.permute.xlu0 %1359  ;;  %v1553_v15 = vsel %vm1549_vm8, %v1520_v25, %v8748_v38  ;;  %v1554_v3 = vsel %vm1549_vm8, %v1521_v60, %v8750_v56  ;;  %v8755_v25 = vld [vmem:[#allocation114_spill] sm:$0xff]  ;;  %v8757_v60 = vld [vmem:[#allocation168_spill] sm:$0xff] }
 0x228   : > { %v1684_v27 = vsel %vm1681_vm12, %v1651_v42, %v1360_v10  ;;  %v1261_v63 = vpop.permute.xlu1 %1260  ;;  %v1586_v30 = vsel %vm1582_vm9, %v1553_v15, %v5748_v16  ;;  %v1587_v23 = vsel %vm1582_vm9, %v1554_v3, %v5739_v29  ;;  %v8751_v42 = vld [vmem:[#allocation83_spill] sm:$0xff] }
 0x229   : > { %4220 = vmatprep.mubr.msk.f32.mxu0 %vm1714_vm13, %v1684_v27  ;;  %v1619_v62 = vsel %vm1615_vm10, %v1586_v30, %v5880_v34  ;;  %v1620_v7 = vsel %vm1615_vm10, %v1587_v23, %v5874_v24  ;;  %v1456_v10 = vsel %vm279_vm0, %v4361_v61, %v8751_v42  ;;  %v8752_v34 = vld [vmem:[#allocation115_spill] sm:$0xff]  ;;  %v4364_v42 = vld [vmem:[#allocation2 + $0x60] sm:$0xff] }
 0x22a   : > { %1417 = vrot.lane.b32.xlu1 %v1354_v20, %s4436_s27  ;;  %v1652_v21 = vsel %vm1648_vm11, %v1619_v62, %v1261_v63  ;;  %v1489_v29 = vsel %vm1483_vm6, %v1456_v10, %v8752_v34  ;;  %v4362_v20 = vld [vmem:[#allocation2 + $0x48] sm:$0xff]  ;;  %v8760_v10 = vld [vmem:[#allocation84_spill] sm:$0xff] }
 0x22b   : > { %v1263_v49 = vpop.permute.xlu0 %1262  ;;  %v1457_v24 = vsel %vm279_vm0, %v4362_v20, %v8753_v22  ;;  %v1522_v11 = vsel %vm1516_vm7, %v1489_v29, %v8754_v50  ;;  %v8762_v29 = vld [vmem:[#allocation116_spill] sm:$0xff] }
 0x22c   : > { %v1362_v43 = vpop.permute.xlu1 %1361  ;;  %v1653_v54 = vsel %vm1648_vm11, %v1620_v7, %v1263_v49  ;;  %v1490_v63 = vsel %vm1483_vm6, %v1457_v24, %v8755_v25  ;;  %v1555_v0 = vsel %vm1549_vm8, %v1522_v11, %v5611_v26  ;;  %v8763_v22 = vld [vmem:[#allocation148_spill] sm:$0xff] }
 0x22d   : > { %v1685_v16 = vsel %vm1681_vm12, %v1652_v21, %v1362_v43  ;;  %v1523_v38 = vsel %vm1516_vm7, %v1490_v63, %v8756_v48  ;;  %v1588_v15 = vsel %vm1582_vm9, %v1555_v0, %v5760_v4  ;;  %v4363_v21 = vld [vmem:[#allocation2 + $0x50] sm:$0xff]  ;;  %v8758_v4 = vld [vmem:[#allocation85_spill] sm:$0xff] }
 0x22e   : > { %4221 = vmatmul.mubr.msk.f32.gmra.mrb[2].mxu0 %vm1714_vm13, %v1685_v16  ;;  %v1556_v30 = vsel %vm1549_vm8, %v1523_v38, %v8757_v60  ;;  %v1621_v49 = vsel %vm1615_vm10, %v1588_v15, %v5888_v31  ;;  %v1458_v43 = vsel %vm279_vm0, %v4363_v21, %v8758_v4  ;;  %v8759_v31 = vld [vmem:[#allocation117_spill] sm:$0xff]  ;;  %v4365_v15 = vld [vmem:[#allocation2 + $0x68] sm:$0xff] }
 0x22f   : > { %v1364_v55 = vpop.permute.xlu0 %1363  ;;  %v1589_v56 = vsel %vm1582_vm9, %v1556_v30, %v5752_v6  ;;  %v1491_v6 = vsel %vm1483_vm6, %v1458_v43, %v8759_v31  ;;  %v8769_v43 = vld [vmem:[#allocation150_spill] sm:$0xff] }
 0x230   : > { %v1686_v27 = vsel %vm1681_vm12, %v1653_v54, %v1364_v55  ;;  %v1265_v28 = vpop.permute.xlu1 %1264  ;;  %v1622_v26 = vsel %vm1615_vm10, %v1589_v56, %v5882_v39  ;;  %v1459_v39 = vsel %vm279_vm0, %v4364_v42, %v8760_v10  ;;  %v8761_v54 = vld [vmem:[#allocation149_spill] sm:$0xff]  ;;  %v8766_v56 = vld [vmem:[#allocation86_spill] sm:$0xff] }
 0x231   : > { %4223 = vmatprep.mubr.msk.f32.mxu0 %vm1714_vm13, %v1686_v27  ;;  %v1654_v3 = vsel %vm1648_vm11, %v1621_v49, %v1265_v28  ;;  %v1524_v55 = vsel %vm1516_vm7, %v1491_v6, %v8761_v54  ;;  %v1492_v27 = vsel %vm1483_vm6, %v1459_v39, %v8762_v29  ;;  %v4366_v49 = vld [vmem:[#allocation2 + $0x78] sm:$0xff] }
 0x232   : > { %v1557_v20 = vsel %vm1549_vm8, %v1524_v55, %v5619_v33  ;;  %v1525_v24 = vsel %vm1516_vm7, %v1492_v27, %v8763_v22  ;;  %v4367_v55 = vld [vmem:[#allocation2 + $0x80] sm:$0xff]  ;;  %v8772_v22 = vld [vmem:[#allocation88_spill] sm:$0xff] }
 0x233   : > { %v1267_v53 = vpop.permute.xlu0 %1266  ;;  %v1590_v50 = vsel %vm1582_vm9, %v1557_v20, %v5768_v14  ;;  %v1558_v28 = vsel %vm1549_vm8, %v1525_v24, %v5613_v18  ;;  %v8764_v14 = vld [vmem:[#allocation87_spill] sm:$0xff]  ;;  %v8773_v24 = vld [vmem:[#allocation62_spill] sm:$0xff] }
 0x234   : > { %v1366_v62 = vpop.permute.xlu1 %1365  ;;  %v1655_v7 = vsel %vm1648_vm11, %v1622_v26, %v1267_v53  ;;  %v1623_v25 = vsel %vm1615_vm10, %v1590_v50, %v5896_v5  ;;  %v1591_v63 = vsel %vm1582_vm9, %v1558_v28, %v5762_v1  ;;  %v1460_v53 = vsel %vm279_vm0, %v4365_v15, %v8764_v14  ;;  %v8765_v5 = vld [vmem:[#allocation24_spill] sm:$0xff]  ;;  %v4368_v20 = vld [vmem:[#allocation2 + $0x90] sm:$0xff] }
 0x235   : > { %v1687_v23 = vsel %vm1681_vm12, %v1654_v3, %v1366_v62  ;;  %v1624_v33 = vsel %vm1615_vm10, %v1591_v63, %v5890_v36  ;;  %v1493_v1 = vsel %vm1483_vm6, %v1460_v53, %v8765_v5  ;;  %v1461_v36 = vsel %vm279_vm0, %v4366_v49, %v8766_v56  ;;  %v8767_v3 = vld [vmem:[#allocation151_spill] sm:$0xff] }
 0x236   : > { %4224 = vmatmul.mubr.msk.f32.gmra.mrb[4].mxu0 %vm1714_vm13, %v1687_v23  ;;  %v1526_v62 = vsel %vm1516_vm7, %v1493_v1, %v8767_v3  ;;  %v8768_v23 = vld [vmem:[#allocation118_spill] sm:$0xff]  ;;  %v8774_v28 = vld [vmem:[#allocation119_spill] sm:$0xff]  ;;  %v4369_v1 = vld [vmem:[#allocation2 + $0x98] sm:$0xff] }
 0x237   : > { %v1368_v16 = vpop.permute.xlu0 %1367  ;;  %v1494_v21 = vsel %vm1483_vm6, %v1461_v36, %v8768_v23  ;;  %v1559_v4 = vsel %vm1549_vm8, %v1526_v62, %v5627_v32  ;;  %v4370_v36 = vld [vmem:[#allocation2 + $0xa8] sm:$0xff]  ;;  %v8779_v62 = vld [vmem:[#allocation63_spill] sm:$0xff] }
 0x238   : > { %v1688_v61 = vsel %vm1681_vm12, %v1655_v7, %v1368_v16  ;;  %v1269_v34 = vpop.permute.xlu1 %1268  ;;  %v1527_v7 = vsel %vm1516_vm7, %v1494_v21, %v8769_v43  ;;  %v1592_v16 = vsel %vm1582_vm9, %v1559_v4, %v5776_v46  ;;  %v8770_v46 = vld [vmem:[#allocation89_spill] sm:$0xff]  ;;  %v8778_v3 = vld [vmem:[#allocation90_spill] sm:$0xff]  ;;  %v8780_v21 = vld [vmem:[#allocation120_spill] sm:$0xff] }
 0x239   : > { %4226 = vmatprep.mubr.msk.f32.mxu0 %vm1714_vm13, %v1688_v61  ;;  %v1656_v0 = vsel %vm1648_vm11, %v1623_v25, %v1269_v34  ;;  %v1560_v6 = vsel %vm1549_vm8, %v1527_v7, %v5621_v8  ;;  %v1625_v61 = vsel %vm1615_vm10, %v1592_v16, %v5904_v59  ;;  %v1462_v34 = vsel %vm279_vm0, %v4367_v55, %v8770_v46  ;;  %v8771_v59 = vld [vmem:[#allocation25_spill] sm:$0xff]  ;;  %v4371_v55 = vld [vmem:[#allocation2 + $0xb0] sm:$0xff] }
 0x23a   : > { %v1593_v42 = vsel %vm1582_vm9, %v1560_v6, %v5770_v57  ;;  %v1495_v57 = vsel %vm1483_vm6, %v1462_v34, %v8771_v59  ;;  %v8781_v7 = vld [vmem:[#allocation153_spill] sm:$0xff]  ;;  %v8784_v59 = vld [vmem:[#allocation92_spill] sm:$0xff] }
 0x23b   : > { %v1271_v11 = vpop.permute.xlu0 %1270  ;;  %v1626_v32 = vsel %vm1615_vm10, %v1593_v42, %v5898_v51  ;;  %v1463_v51 = vsel %vm279_vm0, %v4368_v20, %v8772_v22  ;;  %v1528_v50 = vsel %vm1516_vm7, %v1495_v57, %v8773_v24  ;;  %v8785_v57 = vld [vmem:[#allocation64_spill] sm:$0xff]  ;;  %v8786_v22 = vld [vmem:[#allocation122_spill] sm:$0xff] }
 0x23c   : > { %v1370_v48 = vpop.permute.xlu1 %1369  ;;  %v1657_v18 = vsel %vm1648_vm11, %v1624_v33, %v1271_v11  ;;  %v1496_v25 = vsel %vm1483_vm6, %v1463_v51, %v8774_v28  ;;  %v1561_v63 = vsel %vm1549_vm8, %v1528_v50, %v5635_v40  ;;  %v8787_v50 = vld [vmem:[#allocation154_spill] sm:$0xff] }
 0x23d   : > { %v1689_v38 = vsel %vm1681_vm12, %v1656_v0, %v1370_v48  ;;  %v8775_v0 = vld [vmem:[#allocation152_spill] sm:$0xff]  ;;  %v1594_v33 = vsel %vm1582_vm9, %v1561_v63, %v5784_v9  ;;  %v8776_v9 = vld [vmem:[#allocation91_spill] sm:$0xff] }
 0x23e   : > { %4227 = vmatmul.mubr.msk.f32.gmra.mrb[6].mxu0 %vm1714_vm13, %v1689_v38  ;;  %v1529_v48 = vsel %vm1516_vm7, %v1496_v25, %v8775_v0  ;;  %v1627_v14 = vsel %vm1615_vm10, %v1594_v33, %v5912_v2  ;;  %v8777_v2 = vld [vmem:[#allocation121_spill] sm:$0xff]  ;;  %v8789_v33 = vld [vmem:[#allocation31_spill] sm:$0xff] }
 0x23f   : > { %v1372_v60 = vpop.permute.xlu0 %1371  ;;  %v1562_v15 = vsel %vm1549_vm8, %v1529_v48, %v5629_v45  ;;  %v8788_v0 = vld [vmem:[#allocation45_spill] sm:$0xff] }
 0x240   : > { %v1690_v30 = vsel %vm1681_vm12, %v1657_v18, %v1372_v60  ;;  %v1273_v26 = vpop.permute.xlu1 %1272  ;;  %v1595_v53 = vsel %vm1582_vm9, %v1562_v15, %v5778_v58 }
 0x241   : > { %4229 = vmatprep.mubr.msk.f32.mxu0 %vm1714_vm13, %v1690_v30  ;;  %v1658_v10 = vsel %vm1648_vm11, %v1625_v61, %v1273_v26  ;;  %v1628_v40 = vsel %vm1615_vm10, %v1595_v53, %v5906_v12  ;;  %v1464_v30 = vsel %vm279_vm0, %v4369_v1, %v8776_v9  ;;  %v1465_v12 = vsel %vm279_vm0, %v4370_v36, %v8778_v3  ;;  %v8792_v1 = vld [vmem:[#allocation125_spill] sm:$0xff]  ;;  %v8795_v3 = vld [vmem:[#allocation124_spill] sm:$0xff] }
 0x242   : > { %v1497_v58 = vsel %vm1483_vm6, %v1464_v30, %v8777_v2  ;;  %v1498_v4 = vsel %vm1483_vm6, %v1465_v12, %v8780_v21 }
 0x243   : > { %v1275_v31 = vpop.permute.xlu0 %1274  ;;  %v1530_v26 = vsel %vm1516_vm7, %v1497_v58, %v8779_v62  ;;  %v1531_v16 = vsel %vm1516_vm7, %v1498_v4, %v8781_v7  ;;  %v8794_v58 = vld [vmem:[#allocation65_spill] sm:$0xff]  ;;  %v8796_v62 = vld [vmem:[#allocation170_spill] sm:$0xff] }
 0x244   : > { %v1374_v39 = vpop.permute.xlu1 %1373  ;;  %v1659_v8 = vsel %vm1648_vm11, %v1626_v32, %v1275_v31  ;;  %v1563_v43 = vsel %vm1549_vm8, %v1530_v26, %v5643_v35  ;;  %v1564_v61 = vsel %vm1549_vm8, %v1531_v16, %v5637_v52  ;;  %v8798_v4 = vld [vmem:[#allocation38_spill] sm:$0xff]  ;;  %v8799_v16 = vld [vmem:[#allocation169_spill] sm:$0xff] }
 0x245   : > { %v1691_v54 = vsel %vm1681_vm12, %v1658_v10, %v1374_v39  ;;  %v1596_v31 = vsel %vm1582_vm9, %v1563_v43, %v5792_v19  ;;  %v1597_v10 = vsel %vm1582_vm9, %v1564_v61, %v5786_v17  ;;  %v8782_v19 = vld [vmem:[#allocation93_spill] sm:$0xff] }
 0x246   : > { %4230 = vmatmul.mubr.msk.f32.gmra.mrb[8].mxu0 %vm1714_vm13, %v1691_v54  ;;  %v1629_v42 = vsel %vm1615_vm10, %v1596_v31, %v5920_v44  ;;  %v1630_v35 = vsel %vm1615_vm10, %v1597_v10, %v5914_v13  ;;  %v1466_v46 = vsel %vm279_vm0, %v4371_v55, %v8782_v19  ;;  %v8783_v44 = vld [vmem:[#allocation123_spill] sm:$0xff]  ;;  %v4375_v19 = vld [vmem:[#allocation2 + $0xe0] sm:$0xff] }
 0x247   : > { %v1376_v29 = vpop.permute.xlu0 %1375  ;;  %v1499_v17 = vsel %vm1483_vm6, %v1466_v46, %v8783_v44  ;;  %v8803_v46 = vld [vmem:[#allocation97_spill] sm:$0xff] }
 0x248   : > { %v1692_v27 = vsel %vm1681_vm12, %v1659_v8, %v1376_v29  ;;  %v1277_v11 = vpop.permute.xlu1 %1276  ;;  %v4372_v29 = vld [vmem:[#allocation2 + $0xc0] sm:$0xff] }
 0x249   : > { %4232 = vmatprep.mubr.msk.f32.mxu0 %vm1714_vm13, %v1692_v27  ;;  %v1660_v18 = vsel %vm1648_vm11, %v1627_v14, %v1277_v11  ;;  %v1467_v13 = vsel %vm279_vm0, %v4372_v29, %v8784_v59  ;;  %v1532_v27 = vsel %vm1516_vm7, %v1499_v17, %v8785_v57  ;;  %v8804_v17 = vld [vmem:[#allocation127_spill] sm:$0xff] }
 0x24a   : > { %v1500_v51 = vsel %vm1483_vm6, %v1467_v13, %v8786_v22  ;;  %v1565_v24 = vsel %vm1549_vm8, %v1532_v27, %v5651_v41  ;;  %v8790_v41 = vld [vmem:[#allocation46_spill] sm:$0xff]  ;;  %v4376_v59 = vld [vmem:[#allocation2 + $0xf0] sm:$0xff]  ;;  %v8805_v13 = vld [vmem:[#allocation96_spill] sm:$0xff] }
 0x24b   : > { %v1279_v38 = vpop.permute.xlu0 %1278  ;;  %v1533_v11 = vsel %vm1516_vm7, %v1500_v51, %v8787_v50  ;;  %v1598_v28 = vsel %vm1582_vm9, %v1565_v24, %v5800_v37  ;;  %v8791_v37 = vld [vmem:[#allocation95_spill] sm:$0xff]  ;;  %v1471_v57 = vsel %vm279_vm0, %v4376_v59, %v8805_v13  ;;  %v8806_v27 = vld [vmem:[#allocation66_spill] sm:$0xff]  ;;  %v8808_v50 = vld [vmem:[#allocation172_spill] sm:$0xff] }
 0x24c   : > { %v1378_v60 = vpop.permute.xlu1 %1377  ;;  %v1661_v45 = vsel %vm1648_vm11, %v1628_v40, %v1279_v38  ;;  %v1566_v63 = vsel %vm1549_vm8, %v1533_v11, %v5645_v47  ;;  %v1631_v48 = vsel %vm1615_vm10, %v1598_v28, %v8788_v0  ;;  %v8807_v51 = vld [vmem:[#allocation126_spill] sm:$0xff]  ;;  %v8809_v28 = vld [vmem:[#allocation156_spill] sm:$0xff]  ;;  %v8828_v13 = vld [vmem:[#allocation131_spill] sm:$0xff] }
 0x24d   : > { %v1693_v5 = vsel %vm1681_vm12, %v1660_v18, %v1378_v60  ;;  %v1599_v38 = vsel %vm1582_vm9, %v1566_v63, %v8789_v33  ;;  %v4373_v60 = vld [vmem:[#allocation2 + $0xc8] sm:$0xff]  ;;  %v1504_v24 = vsel %vm1483_vm6, %v1471_v57, %v8807_v51  ;;  %v8810_v63 = vld [vmem:[#allocation184_spill] sm:$0xff]  ;;  %v8811_v33 = vld [vmem:[#allocation171_spill] sm:$0xff] }
 0x24e   : > { %4233 = vmatmul.mubr.msk.f32.gmra.mrb[10].mxu0 %vm1714_vm13, %v1693_v5  ;;  %v1632_v53 = vsel %vm1615_vm10, %v1599_v38, %v8790_v41  ;;  %v1468_v40 = vsel %vm279_vm0, %v4373_v60, %v8791_v37  ;;  %v8813_v41 = vld [vmem:[#allocation37_spill] sm:$0xff]  ;;  %v8814_v37 = vld [vmem:[#allocation48_spill] sm:$0xff] }
 0x24f   : > { %v1380_v49 = vpop.permute.xlu0 %1379  ;;  %v1501_v9 = vsel %vm1483_vm6, %v1468_v40, %v8792_v1  ;;  %v8815_v1 = vld [vmem:[#allocation99_spill] sm:$0xff] }
 0x250   : > { %v1694_v56 = vsel %vm1681_vm12, %v1661_v45, %v1380_v49  ;;  %v1281_v23 = vpop.permute.xlu1 %1280  ;;  %v4374_v45 = vld [vmem:[#allocation2 + $0xd8] sm:$0xff]  ;;  %v8793_v49 = vld [vmem:[#allocation94_spill] sm:$0xff] }
 0x251   : > { %4235 = vmatprep.mubr.msk.f32.mxu0 %vm1714_vm13, %v1694_v56  ;;  %v1662_v39 = vsel %vm1648_vm11, %v1629_v42, %v1281_v23  ;;  %v1469_v2 = vsel %vm279_vm0, %v4374_v45, %v8793_v49  ;;  %v1534_v56 = vsel %vm1516_vm7, %v1501_v9, %v8794_v58  ;;  %v8797_v23 = vld [vmem:[#allocation155_spill] sm:$0xff]  ;;  %v8816_v49 = vld [vmem:[#allocation129_spill] sm:$0xff] }
 0x252   : > { %v1502_v12 = vsel %vm1483_vm6, %v1469_v2, %v8795_v3  ;;  %v1567_v26 = vsel %vm1549_vm8, %v1534_v56, %v8796_v62  ;;  %v8801_v42 = vld [vmem:[#allocation27_spill] sm:$0xff]  ;;  %v4378_v56 = vld [vmem:[#allocation2 + $0x108] sm:$0xff] }
 0x253   : > { %v1283_v6 = vpop.permute.xlu0 %1282  ;;  %v1535_v21 = vsel %vm1516_vm7, %v1502_v12, %v8797_v23  ;;  %v1600_v43 = vsel %vm1582_vm9, %v1567_v26, %v8798_v4  ;;  %v8818_v12 = vld [vmem:[#allocation67_spill] sm:$0xff]  ;;  %v8819_v23 = vld [vmem:[#allocation128_spill] sm:$0xff]  ;;  %v8820_v4 = vld [vmem:[#allocation174_spill] sm:$0xff] }
 0x254   : > { %v1382_v32 = vpop.permute.xlu1 %1381  ;;  %v1663_v52 = vsel %vm1648_vm11, %v1630_v35, %v1283_v6  ;;  %v1568_v31 = vsel %vm1549_vm8, %v1535_v21, %v8799_v16  ;;  %v8800_v6 = vld [vmem:[#allocation68_spill] sm:$0xff]  ;;  %v8802_v35 = vld [vmem:[#allocation69_spill] sm:$0xff] }
 0x255   : > { %v1695_v54 = vsel %vm1681_vm12, %v1662_v39, %v1382_v32  ;;  %v1633_v61 = vsel %vm1615_vm10, %v1600_v43, %v8800_v6  ;;  %v1601_v10 = vsel %vm1582_vm9, %v1568_v31, %v8801_v42  ;;  %v8822_v31 = vld [vmem:[#allocation40_spill] sm:$0xff]  ;;  %v8823_v42 = vld [vmem:[#allocation173_spill] sm:$0xff] }
 0x256   : > { %4236 = vmatmul.mubr.msk.f32.gmra.mrb[12].mxu0 %vm1714_vm13, %v1695_v54  ;;  %v1634_v54 = vsel %vm1615_vm10, %v1601_v10, %v8802_v35  ;;  %v8825_v35 = vld [vmem:[#allocation185_spill] sm:$0xff] }
 0x257   : > { %v1384_v34 = vpop.permute.xlu0 %1383 }
 0x258   : > { %v1696_v8 = vsel %vm1681_vm12, %v1663_v52, %v1384_v34  ;;  %v1285_v20 = vpop.permute.xlu1 %1284  ;;  %v1470_v52 = vsel %vm279_vm0, %v4375_v19, %v8803_v46  ;;  %v8826_v46 = vld [vmem:[#allocation70_spill] sm:$0xff] }
 0x259   : > { %4238 = vmatprep.mubr.msk.f32.mxu0 %vm1714_vm13, %v1696_v8  ;;  %v1664_v15 = vsel %vm1648_vm11, %v1631_v48, %v1285_v20  ;;  %v1503_v8 = vsel %vm1483_vm6, %v1470_v52, %v8804_v17  ;;  %v8827_v17 = vld [vmem:[#allocation101_spill] sm:$0xff] }
 0x25a   : > { %v1536_v20 = vsel %vm1516_vm7, %v1503_v8, %v8806_v27 }
 0x25b   : > { %v1287_v25 = vpop.permute.xlu0 %1286  ;;  %v1569_v11 = vsel %vm1549_vm8, %v1536_v20, %v8808_v50  ;;  %v4380_v20 = vld [vmem:[#allocation2 + $0x120] sm:$0xff] }
 0x25c   : > { %v1386_v14 = vpop.permute.xlu1 %1385  ;;  %v1665_v47 = vsel %vm1648_vm11, %v1632_v53, %v1287_v25  ;;  %v1537_v25 = vsel %vm1516_vm7, %v1504_v24, %v8809_v28  ;;  %v1602_v0 = vsel %vm1582_vm9, %v1569_v11, %v8810_v63  ;;  %v8830_v24 = vld [vmem:[#allocation159_spill] sm:$0xff]  ;;  %v8831_v28 = vld [vmem:[#allocation130_spill] sm:$0xff]  ;;  %v8832_v63 = vld [vmem:[#allocation176_spill] sm:$0xff] }
 0x25d   : > { %v1697_v18 = vsel %vm1681_vm12, %v1664_v15, %v1386_v14  ;;  %v1570_v38 = vsel %vm1549_vm8, %v1537_v25, %v8811_v33  ;;  %v8812_v15 = vld [vmem:[#allocation47_spill] sm:$0xff] }
 0x25e   : > { %4239 = vmatmul.mubr.msk.f32.gmra.mrb[14].mxu0 %vm1714_vm13, %v1697_v18  ;;  %v1635_v14 = vsel %vm1615_vm10, %v1602_v0, %v8812_v15  ;;  %v1603_v53 = vsel %vm1582_vm9, %v1570_v38, %v8813_v41  ;;  %v8834_v38 = vld [vmem:[#allocation186_spill] sm:$0xff]  ;;  %v8835_v41 = vld [vmem:[#allocation175_spill] sm:$0xff] }
 0x25f   : > { %v1388_v5 = vpop.permute.xlu0 %1387  ;;  %v1636_v40 = vsel %vm1615_vm10, %v1603_v53, %v8814_v37  ;;  %v8837_v37 = vld [vmem:[#allocation39_spill] sm:$0xff] }
 0x260   : > { %v1698_v30 = vsel %vm1681_vm12, %v1665_v47, %v1388_v5  ;;  %v1289_v36 = vpop.permute.xlu1 %1288  ;;  %v4377_v5 = vld [vmem:[#allocation2 + $0xf8] sm:$0xff] }
 0x261   : > { %4241 = vmatprep.mubr.msk.f32.mxu0 %vm1714_vm13, %v1698_v30  ;;  %v1666_v39 = vsel %vm1648_vm11, %v1633_v61, %v1289_v36  ;;  %v1472_v9 = vsel %vm279_vm0, %v4377_v5, %v8815_v1  ;;  %v8817_v36 = vld [vmem:[#allocation98_spill] sm:$0xff]  ;;  %v8838_v1 = vld [vmem:[#allocation49_spill] sm:$0xff] }
 0x262   : > { %v1505_v2 = vsel %vm1483_vm6, %v1472_v9, %v8816_v49  ;;  %v1473_v3 = vsel %vm279_vm0, %v4378_v56, %v8817_v36  ;;  %v8839_v49 = vld [vmem:[#allocation103_spill] sm:$0xff]  ;;  %v4382_v36 = vld [vmem:[#allocation2 + $0x138] sm:$0xff] }
 0x263   : > { %v1291_v7 = vpop.permute.xlu0 %1290  ;;  %v1538_v62 = vsel %vm1516_vm7, %v1505_v2, %v8818_v12  ;;  %v1506_v21 = vsel %vm1483_vm6, %v1473_v3, %v8819_v23  ;;  %v8840_v3 = vld [vmem:[#allocation102_spill] sm:$0xff] }
 0x264   : > { %v1390_v32 = vpop.permute.xlu1 %1389  ;;  %v1667_v34 = vsel %vm1648_vm11, %v1634_v54, %v1291_v7  ;;  %v1571_v43 = vsel %vm1549_vm8, %v1538_v62, %v8820_v4  ;;  %v8821_v7 = vld [vmem:[#allocation157_spill] sm:$0xff]  ;;  %v1477_v12 = vsel %vm279_vm0, %v4382_v36, %v8840_v3 }
 0x265   : > { %v1699_v55 = vsel %vm1681_vm12, %v1666_v39, %v1390_v32  ;;  %v1539_v16 = vsel %vm1516_vm7, %v1506_v21, %v8821_v7  ;;  %v1604_v6 = vsel %vm1582_vm9, %v1571_v43, %v8822_v31  ;;  %v8824_v39 = vld [vmem:[#allocation50_spill] sm:$0xff]  ;;  %v8841_v62 = vld [vmem:[#allocation133_spill] sm:$0xff]  ;;  %v8842_v21 = vld [vmem:[#allocation132_spill] sm:$0xff] }
 0x266   : > { %4242 = vmatmul.mubr.msk.f32.gmra.mrb[16].mxu0 %vm1714_vm13, %v1699_v55  ;;  %v1572_v10 = vsel %vm1549_vm8, %v1539_v16, %v8823_v42  ;;  %v1637_v32 = vsel %vm1615_vm10, %v1604_v6, %v8824_v39  ;;  %v1510_v4 = vsel %vm1483_vm6, %v1477_v12, %v8842_v21  ;;  %v8843_v43 = vld [vmem:[#allocation71_spill] sm:$0xff]  ;;  %v8844_v31 = vld [vmem:[#allocation160_spill] sm:$0xff]  ;;  %v8861_v36 = vld [vmem:[#allocation41_spill] sm:$0xff] }
 0x267   : > { %v1392_v44 = vpop.permute.xlu0 %1391  ;;  %v1605_v54 = vsel %vm1582_vm9, %v1572_v10, %v8825_v35  ;;  %v1543_v6 = vsel %vm1516_vm7, %v1510_v4, %v8844_v31  ;;  %v8846_v10 = vld [vmem:[#allocation177_spill] sm:$0xff]  ;;  %v4385_v4 = vld [vmem:[#allocation2 + $0x158] sm:$0xff] }
 0x268   : > { %v1700_v29 = vsel %vm1681_vm12, %v1667_v34, %v1392_v44  ;;  %v1293_v22 = vpop.permute.xlu1 %1292  ;;  %v1638_v52 = vsel %vm1615_vm10, %v1605_v54, %v8826_v46  ;;  %v4379_v44 = vld [vmem:[#allocation2 + $0x110] sm:$0xff]  ;;  %v1576_v39 = vsel %vm1549_vm8, %v1543_v6, %v8846_v10  ;;  %v8849_v46 = vld [vmem:[#allocation74_spill] sm:$0xff]  ;;  %v8864_v6 = vld [vmem:[#allocation137_spill] sm:$0xff] }
 0x269   : > { %4244 = vmatprep.mubr.msk.f32.mxu0 %vm1714_vm13, %v1700_v29  ;;  %v1668_v18 = vsel %vm1648_vm11, %v1635_v14, %v1293_v22  ;;  %v1474_v8 = vsel %vm279_vm0, %v4379_v44, %v8827_v17  ;;  %v8829_v22 = vld [vmem:[#allocation100_spill] sm:$0xff]  ;;  %v4386_v10 = vld [vmem:[#allocation2 + $0x168] sm:$0xff] }
 0x26a   : > { %v1507_v57 = vsel %vm1483_vm6, %v1474_v8, %v8828_v13  ;;  %v1475_v51 = vsel %vm279_vm0, %v4380_v20, %v8829_v22  ;;  %v6412_v13 = vld [vmem:[#allocation2 + $0x10] sm:$0x3] }
 0x26b   : > { %v1295_v48 = vpop.permute.xlu0 %1294  ;;  %v1540_v50 = vsel %vm1516_vm7, %v1507_v57, %v8830_v24  ;;  %v1508_v25 = vsel %vm1483_vm6, %v1475_v51, %v8831_v28  ;;  %v2292_v22 = vrot.slane %v6412_v13, 1  ;;  %v4383_v51 = vld [vmem:[#allocation2 + $0x140] sm:$0xff] }
 0x26c   : > { %v1394_v60 = vpop.permute.xlu1 %1393  ;;  %v1669_v30 = vsel %vm1648_vm11, %v1636_v40, %v1295_v48  ;;  %v1573_v0 = vsel %vm1549_vm8, %v1540_v50, %v8832_v63  ;;  %v8833_v48 = vld [vmem:[#allocation158_spill] sm:$0xff]  ;;  %v8851_v24 = vld [vmem:[#allocation105_spill] sm:$0xff] }
 0x26d   : > { %v1701_v47 = vsel %vm1681_vm12, %v1668_v18, %v1394_v60  ;;  %v1541_v33 = vsel %vm1516_vm7, %v1508_v25, %v8833_v48  ;;  %v1606_v15 = vsel %vm1582_vm9, %v1573_v0, %v8834_v38  ;;  %v8836_v18 = vld [vmem:[#allocation52_spill] sm:$0xff]  ;;  %v1478_v50 = vsel %vm279_vm0, %v4383_v51, %v8851_v24  ;;  %v8852_v25 = vld [vmem:[#allocation135_spill] sm:$0xff] }
 0x26e   : > { %4245 = vmatmul.mubr.msk.f32.gmra.mrb[18].mxu0 %vm1714_vm13, %v1701_v47  ;;  %v1574_v53 = vsel %vm1549_vm8, %v1541_v33, %v8835_v41  ;;  %v1639_v60 = vsel %vm1615_vm10, %v1606_v15, %v8836_v18  ;;  %v1511_v63 = vsel %vm1483_vm6, %v1478_v50, %v8852_v25  ;;  %v4384_v38 = vld [vmem:[#allocation2 + $0x150] sm:$0xff]  ;;  %v8853_v15 = vld [vmem:[#allocation104_spill] sm:$0xff]  ;;  %v8854_v41 = vld [vmem:[#allocation73_spill] sm:$0xff] }
 0x26f   : > { %v1396_v45 = vpop.permute.xlu0 %1395  ;;  %v1607_v40 = vsel %vm1582_vm9, %v1574_v53, %v8837_v37  ;;  %v1544_v53 = vsel %vm1516_vm7, %v1511_v63, %v8854_v41  ;;  %v8872_v51 = vld [vmem:[#allocation56_spill] sm:$0xff]  ;;  %v8873_v50 = vld [vmem:[#allocation189_spill] sm:$0xff] }
 0x270   : > { %v1702_v58 = vsel %vm1681_vm12, %v1669_v30, %v1396_v45  ;;  %v1297_v26 = vpop.permute.xlu1 %1296  ;;  %v1640_v9 = vsel %vm1615_vm10, %v1607_v40, %v8838_v1  ;;  %v4381_v45 = vld [vmem:[#allocation2 + $0x128] sm:$0xff]  ;;  %v8856_v40 = vld [vmem:[#allocation180_spill] sm:$0xff]  ;;  %v8874_v63 = vld [vmem:[#allocation57_spill] sm:$0xff] }
 0x271   : > { %4247 = vmatprep.mubr.msk.f32.mxu0 %vm1714_vm13, %v1702_v58  ;;  %v1670_v55 = vsel %vm1648_vm11, %v1637_v32, %v1297_v26  ;;  %v1476_v2 = vsel %vm279_vm0, %v4381_v45, %v8839_v49  ;;  %v8847_v32 = vld [vmem:[#allocation42_spill] sm:$0xff]  ;;  %v8859_v49 = vld [vmem:[#allocation179_spill] sm:$0xff] }
 0x272   : > { %v1509_v26 = vsel %vm1483_vm6, %v1476_v2, %v8841_v62 }
 0x273   : > { %v1299_v61 = vpop.permute.xlu0 %1298  ;;  %v1542_v7 = vsel %vm1516_vm7, %v1509_v26, %v8843_v43  ;;  %v8862_v26 = vld [vmem:[#allocation54_spill] sm:$0xff]  ;;  %v8863_v43 = vld [vmem:[#allocation107_spill] sm:$0xff] }
 0x274   : > { %v1398_v19 = vpop.permute.xlu1 %1397  ;;  %v1671_v29 = vsel %vm1648_vm11, %v1638_v52, %v1299_v61  ;;  %v8845_v61 = vld [vmem:[#allocation178_spill] sm:$0xff] }
 0x275   : > { %v1703_v34 = vsel %vm1681_vm12, %v1670_v55, %v1398_v19  ;;  %v1575_v42 = vsel %vm1549_vm8, %v1542_v7, %v8845_v61  ;;  %v8848_v55 = vld [vmem:[#allocation187_spill] sm:$0xff]  ;;  %v1480_v7 = vsel %vm279_vm0, %v4385_v4, %v8863_v43 }
 0x276   : > { %4248 = vmatmul.mubr.msk.f32.gmra.mrb[20].mxu0 %vm1714_vm13, %v1703_v34  ;;  %v1608_v35 = vsel %vm1582_vm9, %v1575_v42, %v8847_v32  ;;  %v1609_v19 = vsel %vm1582_vm9, %v1576_v39, %v8848_v55  ;;  %v8850_v34 = vld [vmem:[#allocation51_spill] sm:$0xff]  ;;  %v1513_v61 = vsel %vm1483_vm6, %v1480_v7, %v8864_v6  ;;  %v8865_v39 = vld [vmem:[#allocation106_spill] sm:$0xff] }
 0x277   : > { %v1400_v59 = vpop.permute.xlu0 %1399  ;;  %v1641_v52 = vsel %vm1615_vm10, %v1608_v35, %v8849_v46  ;;  %v1642_v44 = vsel %vm1615_vm10, %v1609_v19, %v8850_v34  ;;  %v1481_v32 = vsel %vm279_vm0, %v4386_v10, %v8865_v39  ;;  %v8866_v35 = vld [vmem:[#allocation162_spill] sm:$0xff]  ;;  %v8867_v19 = vld [vmem:[#allocation136_spill] sm:$0xff] }
 0x278   : > { %v1704_v27 = vsel %vm1681_vm12, %v1671_v29, %v1400_v59  ;;  %v1301_v11 = vpop.permute.xlu1 %1300  ;;  %v6408_v29 = vld [vmem:[#allocation2] sm:$0xff]  ;;  %v6410_v59 = vld [vmem:[#allocation2 + $0x8] sm:$0xff]  ;;  %v1514_v46 = vsel %vm1483_vm6, %v1481_v32, %v8867_v19 }
 0x279   : > { %4250 = vmatprep.mubr.msk.f32.mxu0 %vm1714_vm13, %v1704_v27  ;;  %v1672_v47 = vsel %vm1648_vm11, %v1639_v60, %v1301_v11  ;;  %v2289_v27 = vrot.slane %v6408_v29, 1  ;;  %v2290_v20 = vrot.slane %v6410_v59, 1  ;;  %v8855_v60 = vld [vmem:[#allocation134_spill] sm:$0xff] }
 0x27b   : > { %v1303_v14 = vpop.permute.xlu0 %1302  ;;  %v2291_v48 = vsel %vm495_vm3, %v2289_v27, %v2290_v20  ;;  %v2293_v33 = vsel %vm495_vm3, %v2290_v20, %v2292_v22  ;;  %v8871_v20 = vld [vmem:[#allocation181_spill] sm:$0xff] }
 0x27c   : > { %v1402_v5 = vpop.permute.xlu1 %1401  ;;  %v1673_v58 = vsel %vm1648_vm11, %v1640_v9, %v1303_v14  ;;  %v1479_v14 = vsel %vm279_vm0, %v4384_v38, %v8853_v15  ;;  %2369 = vrot.lane.b32.xlu0 %v2291_v48, %s4429_s30  ;;  %2371 = vrot.lane.b32.xlu1 %v2293_v33, %s4429_s30  ;;  %v8858_v9 = vld [vmem:[#allocation188_spill] sm:$0xff]  ;;  %v4387_v33 = vld [vmem:[#allocation2 + $0x170] sm:$0xff]  ;;  %v8875_v38 = vld [vmem:[#allocation109_spill] sm:$0xff] }
 0x27d   : > { %v1705_v30 = vsel %vm1681_vm12, %v1672_v47, %v1402_v5  ;;  %v1512_v37 = vsel %vm1483_vm6, %v1479_v14, %v8855_v60  ;;  %v1577_v47 = vsel %vm1549_vm8, %v1544_v53, %v8856_v40  ;;  %v8857_v5 = vld [vmem:[#allocation72_spill] sm:$0xff]  ;;  %v1482_v15 = vsel %vm279_vm0, %v4387_v33, %v8875_v38  ;;  %v8876_v53 = vld [vmem:[#allocation139_spill] sm:$0xff] }
 0x27e   : > { %4251 = vmatmul.mubr.msk.f32.gmra.mrb[22].mxu0 %vm1714_vm13, %v1705_v30  ;;  %v1545_v1 = vsel %vm1516_vm7, %v1512_v37, %v8857_v5  ;;  %v1610_v30 = vsel %vm1582_vm9, %v1577_v47, %v8858_v9  ;;  %v8877_v37 = vld [vmem:[#allocation164_spill] sm:$0xff]  ;;  %v8878_v5 = vld [vmem:[#allocation183_spill] sm:$0xff] }
 0x27f   : > { %v1404_v56 = vpop.permute.xlu0 %1403  ;;  %v1578_v2 = vsel %vm1549_vm8, %v1545_v1, %v8859_v49  ;;  %v8879_v9 = vld [vmem:[#allocation43_spill] sm:$0xff] }
 0x280   : > { %v1706_v23 = vsel %vm1681_vm12, %v1673_v58, %v1404_v56  ;;  %v1305_v16 = vpop.permute.xlu1 %1304  ;;  %v8860_v58 = vld [vmem:[#allocation53_spill] sm:$0xff]  ;;  %v1611_v3 = vsel %vm1582_vm9, %v1578_v2, %v8861_v36 }
 0x281   : > { %4253 = vmatprep.mubr.msk.f32.mxu0 %vm1714_vm13, %v1706_v23  ;;  %v1674_v17 = vsel %vm1648_vm11, %v1641_v52, %v1305_v16  ;;  %v1643_v56 = vsel %vm1615_vm10, %v1610_v30, %v8860_v58  ;;  %v1644_v23 = vsel %vm1615_vm10, %v1611_v3, %v8862_v26  ;;  %v8868_v52 = vld [vmem:[#allocation182_spill] sm:$0xff]  ;;  %v6504_v36 = vld [vmem:[%s8252_s2] ss:$0 sm:$0xff] }
 0x282   : > { %v6509_v3 = vld [vmem:[%s8253_s3] ss:$0 sm:$0xff] }
 0x283   : > { %v1307_v54 = vpop.permute.xlu0 %1306 }
 0x284   : > { %v1406_v8 = vpop.permute.xlu1 %1405  ;;  %v1675_v11 = vsel %vm1648_vm11, %v1642_v44, %v1307_v54  ;;  %v1546_v54 = vsel %vm1516_vm7, %v1513_v61, %v8866_v35  ;;  %v8869_v44 = vld [vmem:[#allocation161_spill] sm:$0xff] }
 0x285   : > { %v1707_v57 = vsel %vm1681_vm12, %v1674_v17, %v1406_v8  ;;  %v1579_v34 = vsel %vm1549_vm8, %v1546_v54, %v8868_v52  ;;  %v1547_v17 = vsel %vm1516_vm7, %v1514_v46, %v8869_v44  ;;  %v8870_v8 = vld [vmem:[#allocation44_spill] sm:$0xff] }
 0x286   : > { %4254 = vmatmul.mubr.msk.f32.gmra.mrb[24].mxu0 %vm1714_vm13, %v1707_v57  ;;  %v1612_v57 = vsel %vm1582_vm9, %v1579_v34, %v8870_v8  ;;  %v1580_v22 = vsel %vm1549_vm8, %v1547_v17, %v8871_v20 }
 0x287   : > { %v1408_v28 = vpop.permute.xlu0 %1407  ;;  %v1645_v24 = vsel %vm1615_vm10, %v1612_v57, %v8872_v51 }
 0x288   : > { %v1708_v0 = vsel %vm1681_vm12, %v1675_v11, %v1408_v28  ;;  %v1309_v18 = vpop.permute.xlu1 %1308  ;;  %v1613_v11 = vsel %vm1582_vm9, %v1580_v22, %v8873_v50 }
 0x289   : > { %4256 = vmatprep.mubr.msk.f32.mxu0 %vm1714_vm13, %v1708_v0  ;;  %v1676_v12 = vsel %vm1648_vm11, %v1643_v56, %v1309_v18  ;;  %v1646_v0 = vsel %vm1615_vm10, %v1613_v11, %v8874_v63  ;;  %v1515_v18 = vsel %vm1483_vm6, %v1482_v15, %v8876_v53 }
 0x28a   : > { %v1548_v40 = vsel %vm1516_vm7, %v1515_v18, %v8877_v37 }
 0x28b   : > { %v1311_v45 = vpop.permute.xlu0 %1310  ;;  %v1581_v1 = vsel %vm1549_vm8, %v1548_v40, %v8878_v5 }
 0x28c   : > { %v1410_v62 = vpop.permute.xlu1 %1409  ;;  %v1677_v16 = vsel %vm1648_vm11, %v1644_v23, %v1311_v45  ;;  %v1614_v30 = vsel %vm1582_vm9, %v1581_v1, %v8879_v9  ;;  %v8880_v45 = vld [vmem:[#allocation78_spill] sm:$0xff] }
 0x28d   : > { %v1709_v21 = vsel %vm1681_vm12, %v1676_v12, %v1410_v62  ;;  %v1647_v49 = vsel %vm1615_vm10, %v1614_v30, %v8880_v45 }
 0x28e   : > { %4257 = vmatmul.mubr.msk.f32.gmra.mrb[26].mxu0 %vm1714_vm13, %v1709_v21 }
 0x28f   : > { %v1412_v31 = vpop.permute.xlu0 %1411 }
 0x290   : > { %v1710_v42 = vsel %vm1681_vm12, %v1677_v16, %v1412_v31  ;;  %v1313_v55 = vpop.permute.xlu1 %1312 }
 0x291   : > { %4259 = vmatprep.mubr.msk.f32.mxu0 %vm1714_vm13, %v1710_v42  ;;  %v1678_v28 = vsel %vm1648_vm11, %v1645_v24, %v1313_v55 }
 0x293   : > { %v1315_v27 = vpop.permute.xlu0 %1314 }
 0x294   : > { %v1414_v25 = vpop.permute.xlu1 %1413  ;;  %v1679_v14 = vsel %vm1648_vm11, %v1646_v0, %v1315_v27 }
 0x295   : > { %v1711_v48 = vsel %vm1681_vm12, %v1678_v28, %v1414_v25 }
 0x296   : > { %4260 = vmatmul.mubr.msk.f32.gmra.mrb[28].mxu0 %vm1714_vm13, %v1711_v48 }
 0x297   : > { %v1416_v41 = vpop.permute.xlu0 %1415 }
 0x298   : > { %v1712_v60 = vsel %vm1681_vm12, %v1679_v14, %v1416_v41  ;;  %v1317_v47 = vpop.permute.xlu1 %1316 }
 0x299   : > { %4262 = vmatprep.mubr.msk.f32.mxu0 %vm1714_vm13, %v1712_v60  ;;  %v1680_v2 = vsel %vm1648_vm11, %v1647_v49, %v1317_v47 }
 0x29c   : > { %v1418_v58 = vpop.permute.xlu1 %1417 }
 0x29d   : > { %v1713_v56 = vsel %vm1681_vm12, %v1680_v2, %v1418_v58 }
 0x29e   : > { %4263 = vmatmul.mubr.msk.f32.gmra.mrb[30].mxu0 %vm1714_vm13, %v1713_v56 }
 0x2f9   : > { %v4219_v12 = vpop.f32.mrb[0].mxu0 }
 0x2fa   : > { %v2047_v62 = vmul.f32 %v4219_v12, %v6504_v36  ;;  %v1881_v26 = vpop.f32.mrb[1].mxu0 }
 0x2fb   : > { %v2046_v23 = vmul.f32 %v6504_v36, %v1881_v26 }
 0x2fc   : > { %v2085_v21 = vadd.f32 %v6509_v3, %v2047_v62 }
 0x2fd   : > { %v2084_v4 = vadd.f32 %v6509_v3, %v2046_v23 }
 0x2fe   : > { %v2117_v43 = vmax.f32 %v2085_v21, 0.0 }
 0x2ff   : > { %v2116_v7 = vmax.f32 %v2084_v4, 0.0 }
 0x300   : > { %2149 = vst.msk [vmem:[#allocation2 + $0x21] sm:$0xff] %vm279_vm0, %v2117_v43 }
 0x301   : > { %2148 = vst.msk [vmem:[#allocation2 + $0x19] sm:$0xff] %vm279_vm0, %v2116_v7  ;;  %v4222_v16 = vpop.f32.mrb[2].mxu0 }
 0x302   : > { %v2049_v31 = vmul.f32 %v4222_v16, %v6504_v36  ;;  %v1891_v6 = vpop.f32.mrb[3].mxu0 }
 0x303   : > { %v2048_v61 = vmul.f32 %v6504_v36, %v1891_v6 }
 0x304   : > { %v2087_v42 = vadd.f32 %v6509_v3, %v2049_v31 }
 0x305   : > { %v2086_v10 = vadd.f32 %v6509_v3, %v2048_v61 }
 0x306   : > { %v2119_v39 = vmax.f32 %v2087_v42, 0.0 }
 0x307   : > { %v2118_v32 = vmax.f32 %v2086_v10, 0.0  ;;  %v6521_v35 = vld [vmem:[#allocation2 + $0x28] sm:$0x3] }
 0x308   : > { %2151 = vst.msk [vmem:[#allocation2 + $0x39] sm:$0xff] %vm279_vm0, %v2119_v39  ;;  %v6524_v54 = vld [vmem:[#allocation2 + $0x20] sm:$0xff]  ;;  %v2297_v55 = vrot.slane %v6521_v35, 1  ;;  %v6527_v19 = vld [vmem:[#allocation2 + $0x18] sm:$0xff] }
 0x309   : > { %2150 = vst.msk [vmem:[#allocation2 + $0x31] sm:$0xff] %vm279_vm0, %v2118_v32  ;;  %v4225_v46 = vpop.f32.mrb[4].mxu0  ;;  %v2295_v52 = vrot.slane %v6524_v54, 1  ;;  %v2294_v34 = vrot.slane %v6527_v19, 1 }
 0x30a   : > { %v2051_v44 = vmul.f32 %v4225_v46, %v6504_v36  ;;  %v1901_v17 = vpop.f32.mrb[5].mxu0 }
 0x30b   : > { %v2050_v8 = vmul.f32 %v6504_v36, %v1901_v17  ;;  %v6535_v57 = vsel %vm495_vm3, %v2295_v52, %v2297_v55  ;;  %v6538_v27 = vsel %vm495_vm3, %v2294_v34, %v2295_v52 }
 0x30c   : > { %v2089_v20 = vadd.f32 %v6509_v3, %v2051_v44  ;;  %2375 = vrot.lane.b32.xlu1 %v6535_v57, %s4429_s30  ;;  %2373 = vrot.lane.b32.xlu0 %v6538_v27, %s4429_s30 }
 0x30d   : > { %v2088_v22 = vadd.f32 %v6509_v3, %v2050_v8 }
 0x30e   : > { %v2121_v51 = vmax.f32 %v2089_v20, 0.0 }
 0x30f   : > { %v2120_v24 = vmax.f32 %v2088_v22, 0.0  ;;  %v6546_v50 = vld [vmem:[#allocation2 + $0x40] sm:$0x3] }
 0x310   : > { %2153 = vst.msk [vmem:[#allocation2 + $0x51] sm:$0xff] %vm279_vm0, %v2121_v51  ;;  %v6549_v11 = vld [vmem:[#allocation2 + $0x38] sm:$0xff]  ;;  %v2302_v28 = vrot.slane %v6546_v50, 1  ;;  %v6552_v25 = vld [vmem:[#allocation2 + $0x30] sm:$0xff] }
 0x311   : > { %2152 = vst.msk [vmem:[#allocation2 + $0x49] sm:$0xff] %vm279_vm0, %v2120_v24  ;;  %v4228_v63 = vpop.f32.mrb[6].mxu0  ;;  %v2300_v0 = vrot.slane %v6549_v11, 1  ;;  %v2299_v48 = vrot.slane %v6552_v25, 1 }
 0x312   : > { %v2053_v33 = vmul.f32 %v4228_v63, %v6504_v36  ;;  %v1911_v38 = vpop.f32.mrb[7].mxu0 }
 0x313   : > { %v2052_v15 = vmul.f32 %v6504_v36, %v1911_v38  ;;  %v6560_v14 = vsel %vm495_vm3, %v2300_v0, %v2302_v28  ;;  %v6563_v41 = vsel %vm495_vm3, %v2299_v48, %v2300_v0 }
 0x314   : > { %v2091_v53 = vadd.f32 %v6509_v3, %v2053_v33  ;;  %2379 = vrot.lane.b32.xlu1 %v6560_v14, %s4429_s30  ;;  %2377 = vrot.lane.b32.xlu0 %v6563_v41, %s4429_s30 }
 0x315   : > { %v2090_v18 = vadd.f32 %v6509_v3, %v2052_v15 }
 0x316   : > { %v2123_v60 = vmax.f32 %v2091_v53, 0.0 }
 0x317   : > { %v2122_v37 = vmax.f32 %v2090_v18, 0.0  ;;  %v6571_v40 = vld [vmem:[#allocation2 + $0x58] sm:$0x3] }
 0x318   : > { %2155 = vst.msk [vmem:[#allocation2 + $0x69] sm:$0xff] %vm279_vm0, %v2123_v60  ;;  %v6574_v47 = vld [vmem:[#allocation2 + $0x50] sm:$0xff]  ;;  %v2307_v5 = vrot.slane %v6571_v40, 1  ;;  %v6577_v1 = vld [vmem:[#allocation2 + $0x48] sm:$0xff] }
 0x319   : > { %2154 = vst.msk [vmem:[#allocation2 + $0x61] sm:$0xff] %vm279_vm0, %v2122_v37  ;;  %v4231_v9 = vpop.f32.mrb[8].mxu0  ;;  %v2305_v30 = vrot.slane %v6574_v47, 1  ;;  %v2304_v45 = vrot.slane %v6577_v1, 1 }
 0x31a   : > { %v2055_v49 = vmul.f32 %v4231_v9, %v6504_v36  ;;  %v1921_v2 = vpop.f32.mrb[9].mxu0 }
 0x31b   : > { %v2054_v58 = vmul.f32 %v6504_v36, %v1921_v2  ;;  %v6585_v56 = vsel %vm495_vm3, %v2305_v30, %v2307_v5  ;;  %v6588_v12 = vsel %vm495_vm3, %v2304_v45, %v2305_v30 }
 0x31c   : > { %8881 = vst [vmem:[#allocation76_spill] sm:$0xff] %v6585_v56  ;;  %8882 = vst [vmem:[#allocation60_spill] sm:$0xff] %v6588_v12  ;;  %v2093_v62 = vadd.f32 %v6509_v3, %v2055_v49  ;;  %2383 = vrot.lane.b32.xlu1 %v6585_v56, %s4429_s30  ;;  %2381 = vrot.lane.b32.xlu0 %v6588_v12, %s4429_s30 }
 0x31d   : > { %v2092_v26 = vadd.f32 %v6509_v3, %v2054_v58 }
 0x31e   : > { %v2125_v23 = vmax.f32 %v2093_v62, 0.0 }
 0x31f   : > { %v2124_v21 = vmax.f32 %v2092_v26, 0.0  ;;  %v6596_v4 = vld [vmem:[#allocation2 + $0x70] sm:$0x3] }
 0x320   : > { %2157 = vst.msk [vmem:[#allocation2 + $0x81] sm:$0xff] %vm279_vm0, %v2125_v23  ;;  %v6599_v43 = vld [vmem:[#allocation2 + $0x68] sm:$0xff]  ;;  %v2312_v7 = vrot.slane %v6596_v4, 1  ;;  %v6602_v16 = vld [vmem:[#allocation2 + $0x60] sm:$0xff] }
 0x321   : > { %2156 = vst.msk [vmem:[#allocation2 + $0x79] sm:$0xff] %vm279_vm0, %v2124_v21  ;;  %v4234_v31 = vpop.f32.mrb[10].mxu0  ;;  %v2310_v6 = vrot.slane %v6599_v43, 1  ;;  %v2309_v61 = vrot.slane %v6602_v16, 1 }
 0x322   : > { %v2057_v42 = vmul.f32 %v4234_v31, %v6504_v36  ;;  %v1931_v10 = vpop.f32.mrb[11].mxu0 }
 0x323   : > { %v2056_v39 = vmul.f32 %v6504_v36, %v1931_v10  ;;  %v6610_v32 = vsel %vm495_vm3, %v2310_v6, %v2312_v7  ;;  %v6613_v55 = vsel %vm495_vm3, %v2309_v61, %v2310_v6 }
 0x324   : > { %8883 = vst [vmem:[#allocation58_spill] sm:$0xff] %v6610_v32  ;;  %8884 = vst [vmem:[#allocation61_spill] sm:$0xff] %v6613_v55  ;;  %v2095_v46 = vadd.f32 %v6509_v3, %v2057_v42  ;;  %2387 = vrot.lane.b32.xlu1 %v6610_v32, %s4429_s30  ;;  %2385 = vrot.lane.b32.xlu0 %v6613_v55, %s4429_s30 }
 0x325   : > { %v2094_v52 = vadd.f32 %v6509_v3, %v2056_v39 }
 0x326   : > { %v2127_v34 = vmax.f32 %v2095_v46, 0.0 }
 0x327   : > { %v2126_v44 = vmax.f32 %v2094_v52, 0.0  ;;  %v6621_v17 = vld [vmem:[#allocation2 + $0x88] sm:$0x3] }
 0x328   : > { %2159 = vst.msk [vmem:[#allocation2 + $0x99] sm:$0xff] %vm279_vm0, %v2127_v34  ;;  %v6624_v8 = vld [vmem:[#allocation2 + $0x80] sm:$0xff]  ;;  %v2317_v20 = vrot.slane %v6621_v17, 1  ;;  %v6627_v22 = vld [vmem:[#allocation2 + $0x78] sm:$0xff] }
 0x329   : > { %2158 = vst.msk [vmem:[#allocation2 + $0x91] sm:$0xff] %vm279_vm0, %v2126_v44  ;;  %v4237_v51 = vpop.f32.mrb[12].mxu0  ;;  %v2315_v24 = vrot.slane %v6624_v8, 1  ;;  %v2314_v28 = vrot.slane %v6627_v22, 1 }
 0x32a   : > { %v2059_v63 = vmul.f32 %v4237_v51, %v6504_v36  ;;  %v1941_v0 = vpop.f32.mrb[13].mxu0 }
 0x32b   : > { %v2058_v48 = vmul.f32 %v6504_v36, %v1941_v0  ;;  %v6635_v33 = vsel %vm495_vm3, %v2315_v24, %v2317_v20  ;;  %v6638_v38 = vsel %vm495_vm3, %v2314_v28, %v2315_v24 }
 0x32c   : > { %8885 = vst [vmem:[#allocation75_spill] sm:$0xff] %v6635_v33  ;;  %8886 = vst [vmem:[#allocation142_spill] sm:$0xff] %v6638_v38  ;;  %v2097_v15 = vadd.f32 %v6509_v3, %v2059_v63  ;;  %2391 = vrot.lane.b32.xlu1 %v6635_v33, %s4429_s30  ;;  %2389 = vrot.lane.b32.xlu0 %v6638_v38, %s4429_s30 }
 0x32d   : > { %v2096_v53 = vadd.f32 %v6509_v3, %v2058_v48 }
 0x32e   : > { %v2129_v18 = vmax.f32 %v2097_v15, 0.0 }
 0x32f   : > { %v2128_v60 = vmax.f32 %v2096_v53, 0.0  ;;  %v6646_v37 = vld [vmem:[#allocation2 + $0xa0] sm:$0x3] }
 0x330   : > { %2161 = vst.msk [vmem:[#allocation2 + $0xb1] sm:$0xff] %vm279_vm0, %v2129_v18  ;;  %v6649_v5 = vld [vmem:[#allocation2 + $0x98] sm:$0xff]  ;;  %v2322_v9 = vrot.slane %v6646_v37, 1  ;;  %v6652_v30 = vld [vmem:[#allocation2 + $0x90] sm:$0xff] }
 0x331   : > { %2160 = vst.msk [vmem:[#allocation2 + $0xa9] sm:$0xff] %vm279_vm0, %v2128_v60  ;;  %v4240_v45 = vpop.f32.mrb[14].mxu0  ;;  %v2320_v49 = vrot.slane %v6649_v5, 1  ;;  %v2319_v2 = vrot.slane %v6652_v30, 1 }
 0x332   : > { %v2061_v58 = vmul.f32 %v4240_v45, %v6504_v36  ;;  %v1951_v62 = vpop.f32.mrb[15].mxu0 }
 0x333   : > { %v2060_v26 = vmul.f32 %v6504_v36, %v1951_v62  ;;  %v6660_v23 = vsel %vm495_vm3, %v2320_v49, %v2322_v9  ;;  %v6663_v21 = vsel %vm495_vm3, %v2319_v2, %v2320_v49 }
 0x334   : > { %8887 = vst [vmem:[#allocation108_spill] sm:$0xff] %v6660_v23  ;;  %8888 = vst [vmem:[#allocation138_spill] sm:$0xff] %v6663_v21  ;;  %v2099_v7 = vadd.f32 %v6509_v3, %v2061_v58  ;;  %2395 = vrot.lane.b32.xlu1 %v6660_v23, %s4429_s30  ;;  %2393 = vrot.lane.b32.xlu0 %v6663_v21, %s4429_s30 }
 0x335   : > { %v2098_v31 = vadd.f32 %v6509_v3, %v2060_v26 }
 0x336   : > { %v2131_v6 = vmax.f32 %v2099_v7, 0.0 }
 0x337   : > { %v2130_v61 = vmax.f32 %v2098_v31, 0.0  ;;  %v6671_v42 = vld [vmem:[#allocation2 + $0xb8] sm:$0x3] }
 0x338   : > { %2163 = vst.msk [vmem:[#allocation2 + $0xc9] sm:$0xff] %vm279_vm0, %v2131_v6  ;;  %v6674_v10 = vld [vmem:[#allocation2 + $0xb0] sm:$0xff]  ;;  %v2327_v39 = vrot.slane %v6671_v42, 1  ;;  %v6677_v46 = vld [vmem:[#allocation2 + $0xa8] sm:$0xff] }
 0x339   : > { %2162 = vst.msk [vmem:[#allocation2 + $0xc1] sm:$0xff] %vm279_vm0, %v2130_v61  ;;  %v4243_v52 = vpop.f32.mrb[16].mxu0  ;;  %v2325_v34 = vrot.slane %v6674_v10, 1  ;;  %v2324_v44 = vrot.slane %v6677_v46, 1 }
 0x33a   : > { %v2063_v20 = vmul.f32 %v4243_v52, %v6504_v36  ;;  %v1961_v51 = vpop.f32.mrb[17].mxu0 }
 0x33b   : > { %v2062_v24 = vmul.f32 %v6504_v36, %v1961_v51  ;;  %v6685_v28 = vsel %vm495_vm3, %v2325_v34, %v2327_v39  ;;  %v6688_v63 = vsel %vm495_vm3, %v2324_v44, %v2325_v34 }
 0x33c   : > { %8889 = vst [vmem:[#allocation163_spill] sm:$0xff] %v6685_v28  ;;  %8890 = vst [vmem:[#allocation77_spill] sm:$0xff] %v6688_v63  ;;  %v2101_v0 = vadd.f32 %v6509_v3, %v2063_v20  ;;  %2399 = vrot.lane.b32.xlu1 %v6685_v28, %s4429_s30  ;;  %2397 = vrot.lane.b32.xlu0 %v6688_v63, %s4429_s30 }
 0x33d   : > { %v2100_v48 = vadd.f32 %v6509_v3, %v2062_v24 }
 0x33e   : > { %v2133_v15 = vmax.f32 %v2101_v0, 0.0 }
 0x33f   : > { %v2132_v53 = vmax.f32 %v2100_v48, 0.0  ;;  %v6696_v18 = vld [vmem:[#allocation2 + $0xd0] sm:$0x3] }
 0x340   : > { %2165 = vst.msk [vmem:[#allocation2 + $0xe1] sm:$0xff] %vm279_vm0, %v2133_v15  ;;  %v6699_v60 = vld [vmem:[#allocation2 + $0xc8] sm:$0xff]  ;;  %v2332_v9 = vrot.slane %v6696_v18, 1  ;;  %v6702_v45 = vld [vmem:[#allocation2 + $0xc0] sm:$0xff] }
 0x341   : > { %2164 = vst.msk [vmem:[#allocation2 + $0xd9] sm:$0xff] %vm279_vm0, %v2132_v53  ;;  %v4246_v49 = vpop.f32.mrb[18].mxu0  ;;  %v2330_v2 = vrot.slane %v6699_v60, 1  ;;  %v2329_v58 = vrot.slane %v6702_v45, 1 }
 0x342   : > { %v2065_v62 = vmul.f32 %v4246_v49, %v6504_v36  ;;  %v1971_v26 = vpop.f32.mrb[19].mxu0 }
 0x343   : > { %v2064_v7 = vmul.f32 %v6504_v36, %v1971_v26  ;;  %v6710_v31 = vsel %vm495_vm3, %v2330_v2, %v2332_v9  ;;  %v6713_v6 = vsel %vm495_vm3, %v2329_v58, %v2330_v2 }
 0x344   : > { %8891 = vst [vmem:[#allocation146_spill] sm:$0xff] %v6710_v31  ;;  %8892 = vst [vmem:[#allocation111_spill] sm:$0xff] %v6713_v6  ;;  %v2103_v61 = vadd.f32 %v6509_v3, %v2065_v62  ;;  %2403 = vrot.lane.b32.xlu1 %v6710_v31, %s4429_s30  ;;  %2401 = vrot.lane.b32.xlu0 %v6713_v6, %s4429_s30 }
 0x345   : > { %v2102_v39 = vadd.f32 %v6509_v3, %v2064_v7 }
 0x346   : > { %v2135_v52 = vmax.f32 %v2103_v61, 0.0 }
 0x347   : > { %v2134_v34 = vmax.f32 %v2102_v39, 0.0  ;;  %v6721_v44 = vld [vmem:[#allocation2 + $0xe8] sm:$0x3] }
 0x348   : > { %2167 = vst.msk [vmem:[#allocation2 + $0xf9] sm:$0xff] %vm279_vm0, %v2135_v52  ;;  %v6724_v20 = vld [vmem:[#allocation2 + $0xe0] sm:$0xff]  ;;  %v2337_v51 = vrot.slane %v6721_v44, 1  ;;  %v6727_v24 = vld [vmem:[#allocation2 + $0xd8] sm:$0xff] }
 0x349   : > { %2166 = vst.msk [vmem:[#allocation2 + $0xf1] sm:$0xff] %vm279_vm0, %v2134_v34  ;;  %v4249_v0 = vpop.f32.mrb[20].mxu0  ;;  %v2335_v48 = vrot.slane %v6724_v20, 1  ;;  %v2334_v15 = vrot.slane %v6727_v24, 1 }
 0x34a   : > { %v2067_v53 = vmul.f32 %v4249_v0, %v6504_v36  ;;  %v1981_v9 = vpop.f32.mrb[21].mxu0 }
 0x34b   : > { %v2066_v49 = vmul.f32 %v6504_v36, %v1981_v9  ;;  %v6735_v2 = vsel %vm495_vm3, %v2335_v48, %v2337_v51  ;;  %v6738_v58 = vsel %vm495_vm3, %v2334_v15, %v2335_v48 }
 0x34c   : > { %8893 = vst [vmem:[#allocation79_spill] sm:$0xff] %v6735_v2  ;;  %8894 = vst [vmem:[#allocation141_spill] sm:$0xff] %v6738_v58  ;;  %v2105_v62 = vadd.f32 %v6509_v3, %v2067_v53  ;;  %2407 = vrot.lane.b32.xlu1 %v6735_v2, %s4429_s30  ;;  %2405 = vrot.lane.b32.xlu0 %v6738_v58, %s4429_s30 }
 0x34d   : > { %v2104_v26 = vadd.f32 %v6509_v3, %v2066_v49 }
 0x34e   : > { %v2137_v7 = vmax.f32 %v2105_v62, 0.0 }
 0x34f   : > { %v2136_v61 = vmax.f32 %v2104_v26, 0.0  ;;  %v6746_v39 = vld [vmem:[#allocation2 + $0x100] sm:$0x3] }
 0x350   : > { %2169 = vst.msk [vmem:[#allocation2 + $0x111] sm:$0xff] %vm279_vm0, %v2137_v7  ;;  %v6749_v52 = vld [vmem:[#allocation2 + $0xf8] sm:$0xff]  ;;  %v2342_v34 = vrot.slane %v6746_v39, 1  ;;  %v6752_v51 = vld [vmem:[#allocation2 + $0xf0] sm:$0xff] }
 0x351   : > { %2168 = vst.msk [vmem:[#allocation2 + $0x109] sm:$0xff] %vm279_vm0, %v2136_v61  ;;  %v4252_v0 = vpop.f32.mrb[22].mxu0  ;;  %v2340_v48 = vrot.slane %v6749_v52, 1  ;;  %v2339_v15 = vrot.slane %v6752_v51, 1 }
 0x352   : > { %v2069_v53 = vmul.f32 %v4252_v0, %v6504_v36  ;;  %v1991_v9 = vpop.f32.mrb[23].mxu0 }
 0x353   : > { %v2068_v49 = vmul.f32 %v6504_v36, %v1991_v9  ;;  %v6760_v62 = vsel %vm495_vm3, %v2340_v48, %v2342_v34  ;;  %v6763_v26 = vsel %vm495_vm3, %v2339_v15, %v2340_v48 }
 0x354   : > { %8895 = vst [vmem:[#allocation110_spill] sm:$0xff] %v6760_v62  ;;  %8896 = vst [vmem:[#allocation140_spill] sm:$0xff] %v6763_v26  ;;  %v2107_v7 = vadd.f32 %v6509_v3, %v2069_v53  ;;  %2411 = vrot.lane.b32.xlu1 %v6760_v62, %s4429_s30  ;;  %2409 = vrot.lane.b32.xlu0 %v6763_v26, %s4429_s30 }
 0x355   : > { %v2106_v61 = vadd.f32 %v6509_v3, %v2068_v49 }
 0x356   : > { %v2139_v0 = vmax.f32 %v2107_v7, 0.0 }
 0x357   : > { %v2138_v2 = vmax.f32 %v2106_v61, 0.0  ;;  %v6771_v58 = vld [vmem:[#allocation2 + $0x118] sm:$0x3] }
 0x358   : > { %2171 = vst.msk [vmem:[#allocation2 + $0x129] sm:$0xff] %vm279_vm0, %v2139_v0  ;;  %v6774_v34 = vld [vmem:[#allocation2 + $0x110] sm:$0xff]  ;;  %v2347_v48 = vrot.slane %v6771_v58, 1  ;;  %v6777_v15 = vld [vmem:[#allocation2 + $0x108] sm:$0xff] }
 0x359   : > { %2170 = vst.msk [vmem:[#allocation2 + $0x121] sm:$0xff] %vm279_vm0, %v2138_v2  ;;  %v4255_v53 = vpop.f32.mrb[24].mxu0  ;;  %v2345_v9 = vrot.slane %v6774_v34, 1  ;;  %v2344_v62 = vrot.slane %v6777_v15, 1 }
 0x35a   : > { %v2071_v49 = vmul.f32 %v4255_v53, %v6504_v36  ;;  %v2001_v7 = vpop.f32.mrb[25].mxu0 }
 0x35b   : > { %v2070_v61 = vmul.f32 %v6504_v36, %v2001_v7  ;;  %v6785_v0 = vsel %vm495_vm3, %v2345_v9, %v2347_v48  ;;  %v6788_v26 = vsel %vm495_vm3, %v2344_v62, %v2345_v9 }
 0x35c   : > { %8897 = vst [vmem:[#allocation165_spill] sm:$0xff] %v6785_v0  ;;  %8898 = vst [vmem:[#allocation81_spill] sm:$0xff] %v6788_v26  ;;  %v2109_v31 = vadd.f32 %v6509_v3, %v2071_v49  ;;  %2415 = vrot.lane.b32.xlu1 %v6785_v0, %s4429_s30  ;;  %2413 = vrot.lane.b32.xlu0 %v6788_v26, %s4429_s30 }
 0x35d   : > { %v2108_v2 = vadd.f32 %v6509_v3, %v2070_v61 }
 0x35e   : > { %v2141_v53 = vmax.f32 %v2109_v31, 0.0 }
 0x35f   : > { %v2140_v6 = vmax.f32 %v2108_v2, 0.0  ;;  %v6796_v28 = vld [vmem:[#allocation2 + $0x130] sm:$0x3] }
 0x360   : > { %2173 = vst.msk [vmem:[#allocation2 + $0x141] sm:$0xff] %vm279_vm0, %v2141_v53  ;;  %v6799_v48 = vld [vmem:[#allocation2 + $0x128] sm:$0xff]  ;;  %v2352_v62 = vrot.slane %v6796_v28, 1  ;;  %v6802_v9 = vld [vmem:[#allocation2 + $0x120] sm:$0xff] }
 0x361   : > { %2172 = vst.msk [vmem:[#allocation2 + $0x139] sm:$0xff] %vm279_vm0, %v2140_v6  ;;  %v4258_v49 = vpop.f32.mrb[26].mxu0  ;;  %v2350_v7 = vrot.slane %v6799_v48, 1  ;;  %v2349_v0 = vrot.slane %v6802_v9, 1 }
 0x362   : > { %v2073_v31 = vmul.f32 %v4258_v49, %v6504_v36  ;;  %v2011_v61 = vpop.f32.mrb[27].mxu0 }
 0x363   : > { %v2072_v2 = vmul.f32 %v6504_v36, %v2011_v61  ;;  %v6810_v53 = vsel %vm495_vm3, %v2350_v7, %v2352_v62  ;;  %v6813_v26 = vsel %vm495_vm3, %v2349_v0, %v2350_v7 }
 0x364   : > { %8899 = vst [vmem:[#allocation113_spill] sm:$0xff] %v6810_v53  ;;  %8900 = vst [vmem:[#allocation80_spill] sm:$0xff] %v6813_v26  ;;  %v2111_v63 = vadd.f32 %v6509_v3, %v2073_v31  ;;  %2419 = vrot.lane.b32.xlu1 %v6810_v53, %s4429_s30  ;;  %2417 = vrot.lane.b32.xlu0 %v6813_v26, %s4429_s30 }
 0x365   : > { %v2110_v6 = vadd.f32 %v6509_v3, %v2072_v2 }
 0x366   : > { %v2143_v49 = vmax.f32 %v2111_v63, 0.0 }
 0x367   : > { %v2142_v23 = vmax.f32 %v2110_v6, 0.0  ;;  %v6821_v21 = vld [vmem:[#allocation2 + $0x148] sm:$0x3] }
 0x368   : > { %2175 = vst.msk [vmem:[#allocation2 + $0x159] sm:$0xff] %vm279_vm0, %v2143_v49  ;;  %v6824_v62 = vld [vmem:[#allocation2 + $0x140] sm:$0xff]  ;;  %v2357_v0 = vrot.slane %v6821_v21, 1  ;;  %v6827_v7 = vld [vmem:[#allocation2 + $0x138] sm:$0xff] }
 0x369   : > { %2174 = vst.msk [vmem:[#allocation2 + $0x151] sm:$0xff] %vm279_vm0, %v2142_v23  ;;  %v4261_v31 = vpop.f32.mrb[28].mxu0  ;;  %v2355_v61 = vrot.slane %v6824_v62, 1  ;;  %v2354_v53 = vrot.slane %v6827_v7, 1 }
 0x36a   : > { %v2075_v63 = vmul.f32 %v4261_v31, %v6504_v36  ;;  %v2021_v2 = vpop.f32.mrb[29].mxu0 }
 0x36b   : > { %v2074_v6 = vmul.f32 %v6504_v36, %v2021_v2  ;;  %v6835_v49 = vsel %vm495_vm3, %v2355_v61, %v2357_v0  ;;  %v6838_v26 = vsel %vm495_vm3, %v2354_v53, %v2355_v61 }
 0x36c   : > { %8901 = vst [vmem:[#allocation144_spill] sm:$0xff] %v6835_v49  ;;  %8902 = vst [vmem:[#allocation112_spill] sm:$0xff] %v6838_v26  ;;  %v2113_v33 = vadd.f32 %v6509_v3, %v2075_v63  ;;  %2423 = vrot.lane.b32.xlu1 %v6835_v49, %s4429_s30  ;;  %2421 = vrot.lane.b32.xlu0 %v6838_v26, %s4429_s30 }
 0x36d   : > { %v2112_v23 = vadd.f32 %v6509_v3, %v2074_v6 }
 0x36e   : > { %v2145_v31 = vmax.f32 %v2113_v33, 0.0 }
 0x36f   : > { %v2144_v38 = vmax.f32 %v2112_v23, 0.0  ;;  %v6846_v32 = vld [vmem:[#allocation2 + $0x160] sm:$0x3] }
 0x370   : > { %2177 = vst.msk [vmem:[#allocation2 + $0x171] sm:$0xff] %vm279_vm0, %v2145_v31  ;;  %v6849_v0 = vld [vmem:[#allocation2 + $0x158] sm:$0xff]  ;;  %v2362_v53 = vrot.slane %v6846_v32, 1  ;;  %v6852_v61 = vld [vmem:[#allocation2 + $0x150] sm:$0xff] }
 0x371   : > { %2176 = vst.msk [vmem:[#allocation2 + $0x169] sm:$0xff] %vm279_vm0, %v2144_v38  ;;  %v4264_v63 = vpop.f32.mrb[30].mxu0  ;;  %v2360_v2 = vrot.slane %v6849_v0, 1  ;;  %v2359_v49 = vrot.slane %v6852_v61, 1 }
 0x372   : > { %v2077_v33 = vmul.f32 %v4264_v63, %v6504_v36  ;;  %v2031_v6 = vpop.f32.mrb[31].mxu0 }
 0x373   : > { %v2076_v23 = vmul.f32 %v6504_v36, %v2031_v6  ;;  %v6860_v31 = vsel %vm495_vm3, %v2360_v2, %v2362_v53  ;;  %v6863_v26 = vsel %vm495_vm3, %v2359_v49, %v2360_v2  ;;  %v2466_v2 = vrot.slane %v6410_v59, 2 }
 0x374   : > { %8903 = vst [vmem:[#allocation167_spill] sm:$0xff] %v6860_v31  ;;  %8904 = vst [vmem:[#allocation143_spill] sm:$0xff] %v6863_v26  ;;  %v2115_v55 = vadd.f32 %v6509_v3, %v2077_v33  ;;  %2427 = vrot.lane.b32.xlu1 %v6860_v31, %s4429_s30  ;;  %2425 = vrot.lane.b32.xlu0 %v6863_v26, %s4429_s30  ;;  %v2465_v6 = vrot.slane %v6408_v29, 2  ;;  %v2473_v29 = vrot.slane %v6521_v35, 2 }
 0x375   : > { %v2114_v38 = vadd.f32 %v6509_v3, %v2076_v23 }
 0x376   : > { %v2147_v63 = vmax.f32 %v2115_v55, 0.0  ;;  %v2468_v55 = vrot.slane %v6412_v13, 2  ;;  %v2471_v13 = vrot.slane %v6524_v54, 2 }
 0x377   : > { %v2146_v56 = vmax.f32 %v2114_v38, 0.0  ;;  %v6871_v12 = vld [vmem:[#allocation2 + $0x178] sm:$0x3] }
 0x378   : > { %2179 = vst.msk [vmem:[#allocation2 + $0x189] sm:$0xff] %vm279_vm0, %v2147_v63  ;;  %v6874_v36 = vld [vmem:[#allocation2 + $0x170] sm:$0xff]  ;;  %v2367_v49 = vrot.slane %v6871_v12, 1  ;;  %v6877_v53 = vld [vmem:[#allocation2 + $0x168] sm:$0xff]  ;;  %v2469_v59 = vsel %vm672_vm4, %v2466_v2, %v2468_v55  ;;  %v2470_v63 = vrot.slane %v6527_v19, 2 }
 0x379   : > { %2178 = vst.msk [vmem:[#allocation2 + $0x181] sm:$0xff] %vm279_vm0, %v2146_v56  ;;  %v2365_v33 = vrot.slane %v6874_v36, 1  ;;  %v2364_v3 = vrot.slane %v6877_v53, 1  ;;  %v2467_v56 = vsel %vm672_vm4, %v2465_v6, %v2466_v2  ;;  %v2475_v2 = vrot.slane %v6552_v25, 2 }
 0x37a   : > { %v6908_v55 = vsel %vm672_vm4, %v2470_v63, %v2471_v13 }
 0x37b   : > { %v6886_v23 = vsel %vm495_vm3, %v2365_v33, %v2367_v49  ;;  %v6889_v38 = vsel %vm495_vm3, %v2364_v3, %v2365_v33  ;;  %v2476_v49 = vrot.slane %v6549_v11, 2  ;;  %v2478_v33 = vrot.slane %v6546_v50, 2 }
 0x37c   : > { %8905 = vst [vmem:[#allocation166_spill] sm:$0xff] %v6886_v23  ;;  %8906 = vst [vmem:[#allocation83_spill] sm:$0xff] %v6889_v38  ;;  %2431 = vrot.lane.b32.xlu1 %v6886_v23, %s4429_s30  ;;  %2429 = vrot.lane.b32.xlu0 %v6889_v38, %s4429_s30  ;;  %v6905_v3 = vsel %vm672_vm4, %v2471_v13, %v2473_v29  ;;  %v2481_v50 = vrot.slane %v6574_v47, 2  ;;  %v2486_v13 = vrot.slane %v6599_v43, 2  ;;  %v2488_v29 = vrot.slane %v6596_v4, 2 }
 0x37d   : > { %v6916_v35 = vsel %vm672_vm4, %v2476_v49, %v2478_v33  ;;  %v6919_v6 = vsel %vm672_vm4, %v2475_v2, %v2476_v49  ;;  %v2491_v4 = vrot.slane %v6624_v8, 2 }
 0x37e   : > { %v6942_v33 = vsel %vm672_vm4, %v2486_v13, %v2488_v29  ;;  %v2498_v29 = vrot.slane %v6646_v37, 2  ;;  %v2501_v37 = vrot.slane %v6674_v10, 2 }
 0x380   : > { %2547 = vrot.lane.b32.xlu1 %v2469_v59, %s4430_s8  ;;  %2545 = vrot.lane.b32.xlu0 %v2467_v56, %s4430_s8  ;;  %v2483_v59 = vrot.slane %v6571_v40, 2  ;;  %v2480_v56 = vrot.slane %v6577_v1, 2  ;;  %v2485_v40 = vrot.slane %v6602_v16, 2 }
 0x382   : > { %v6931_v63 = vsel %vm672_vm4, %v2481_v50, %v2483_v59  ;;  %v6934_v49 = vsel %vm672_vm4, %v2480_v56, %v2481_v50  ;;  %v6945_v2 = vsel %vm672_vm4, %v2485_v40, %v2486_v13  ;;  %v2493_v59 = vrot.slane %v6621_v17, 2 }
 0x383   : > { %v2490_v50 = vrot.slane %v6627_v22, 2  ;;  %v2496_v56 = vrot.slane %v6649_v5, 2  ;;  %v2495_v17 = vrot.slane %v6652_v30, 2 }
 0x384   : > { %2551 = vrot.lane.b32.xlu1 %v6905_v3, %s4430_s8  ;;  %2549 = vrot.lane.b32.xlu0 %v6908_v55, %s4430_s8  ;;  %v6957_v23 = vsel %vm672_vm4, %v2491_v4, %v2493_v59  ;;  %v2503_v59 = vrot.slane %v6671_v42, 2  ;;  %v2505_v42 = vrot.slane %v6702_v45, 2 }
 0x385   : > { %v6960_v13 = vsel %vm672_vm4, %v2490_v50, %v2491_v4  ;;  %v6968_v40 = vsel %vm672_vm4, %v2496_v56, %v2498_v29  ;;  %v6971_v38 = vsel %vm672_vm4, %v2495_v17, %v2496_v56  ;;  %v2500_v4 = vrot.slane %v6677_v46, 2 }
 0x386   : > { %v2506_v50 = vrot.slane %v6699_v60, 2  ;;  %v2508_v29 = vrot.slane %v6696_v18, 2  ;;  %v6983_v31 = vsel %vm672_vm4, %v2501_v37, %v2503_v59  ;;  %v2511_v18 = vrot.slane %v6724_v20, 2 }
 0x387   : > { %8907 = vst [vmem:[#allocation115_spill] sm:$0xff] %v6983_v31  ;;  %v6986_v56 = vsel %vm672_vm4, %v2500_v4, %v2501_v37  ;;  %v2513_v59 = vrot.slane %v6721_v44, 2  ;;  %v2510_v37 = vrot.slane %v6727_v24, 2  ;;  %v2516_v4 = vrot.slane %v6749_v52, 2 }
 0x388   : > { %2555 = vrot.lane.b32.xlu1 %v6916_v35, %s4430_s8  ;;  %2553 = vrot.lane.b32.xlu0 %v6919_v6, %s4430_s8  ;;  %v6994_v17 = vsel %vm672_vm4, %v2506_v50, %v2508_v29  ;;  %v6997_v26 = vsel %vm672_vm4, %v2505_v42, %v2506_v50  ;;  %v2518_v29 = vrot.slane %v6746_v39, 2  ;;  %v2515_v44 = vrot.slane %v6752_v51, 2 }
 0x389   : > { %8908 = vst [vmem:[#allocation82_spill] sm:$0xff] %v6994_v17  ;;  %v7012_v50 = vsel %vm672_vm4, %v2510_v37, %v2511_v18  ;;  %v2521_v39 = vrot.slane %v6774_v34, 2  ;;  %v2526_v37 = vrot.slane %v6799_v48, 2 }
 0x38a   : > { %v7020_v42 = vsel %vm672_vm4, %v2516_v4, %v2518_v29  ;;  %v2528_v29 = vrot.slane %v6796_v28, 2  ;;  %v2531_v28 = vrot.slane %v6824_v62, 2 }
 0x38c   : > { %2559 = vrot.lane.b32.xlu1 %v6931_v63, %s4430_s8  ;;  %2557 = vrot.lane.b32.xlu0 %v6934_v49, %s4430_s8  ;;  %v7046_v34 = vsel %vm672_vm4, %v2526_v37, %v2528_v29 }
 0x390   : > { %2563 = vrot.lane.b32.xlu1 %v6942_v33, %s4430_s8  ;;  %2561 = vrot.lane.b32.xlu0 %v6945_v2, %s4430_s8 }
 0x394   : > { %2567 = vrot.lane.b32.xlu1 %v6957_v23, %s4430_s8  ;;  %2565 = vrot.lane.b32.xlu0 %v6960_v13, %s4430_s8 }
 0x398   : > { %2571 = vrot.lane.b32.xlu1 %v6968_v40, %s4430_s8  ;;  %2569 = vrot.lane.b32.xlu0 %v6971_v38, %s4430_s8 }
 0x39c   : > { %2575 = vrot.lane.b32.xlu1 %v6983_v31, %s4430_s8  ;;  %2573 = vrot.lane.b32.xlu0 %v6986_v56, %s4430_s8  ;;  %v7009_v31 = vsel %vm672_vm4, %v2511_v18, %v2513_v59  ;;  %v2523_v59 = vrot.slane %v6771_v58, 2  ;;  %v2520_v18 = vrot.slane %v6777_v15, 2  ;;  %v2525_v58 = vrot.slane %v6802_v9, 2  ;;  %v7056_v9 = vpop.permute.xlu1 %2371 }
 0x39d   : > { %8909 = vst [vmem:[#allocation147_spill] sm:$0xff] %v7009_v31 }
 0x39e   : > { %v7049_v48 = vsel %vm672_vm4, %v2525_v58, %v2526_v37  ;;  %v2538_v37 = vrot.slane %v6846_v32, 2 }
 0x3a0   : > { %2579 = vrot.lane.b32.xlu1 %v6994_v17, %s4430_s8  ;;  %2577 = vrot.lane.b32.xlu0 %v6997_v26, %s4430_s8  ;;  %v7023_v17 = vsel %vm672_vm4, %v2515_v44, %v2516_v4  ;;  %v7038_v4 = vsel %vm672_vm4, %v2520_v18, %v2521_v39  ;;  %v2533_v44 = vrot.slane %v6821_v21, 2  ;;  %v2536_v18 = vrot.slane %v6849_v0, 2  ;;  %v7077_v58 = vpop.permute.xlu1 %2375 }
 0x3a2   : > { %v7065_v62 = vsel %vm672_vm4, %v2531_v28, %v2533_v44  ;;  %v7080_v32 = vsel %vm672_vm4, %v2536_v18, %v2538_v37  ;;  %v2540_v44 = vrot.slane %v6877_v53, 2 }
 0x3a3   : > { %8910 = vst [vmem:[#allocation114_spill] sm:$0xff] %v7065_v62  ;;  %8912 = vst [vmem:[#allocation168_spill] sm:$0xff] %v7080_v32 }
 0x3a4   : > { %2583 = vrot.lane.b32.xlu1 %v7009_v31, %s4430_s8  ;;  %2581 = vrot.lane.b32.xlu0 %v7012_v50, %s4430_s8  ;;  %v7035_v31 = vsel %vm672_vm4, %v2521_v39, %v2523_v59  ;;  %v2530_v39 = vrot.slane %v6827_v7, 2  ;;  %v7054_v59 = vpop.permute.xlu0 %2369  ;;  %v2535_v7 = vrot.slane %v6852_v61, 2  ;;  %v2543_v61 = vrot.slane %v6871_v12, 2 }
 0x3a6   : > { %v7068_v21 = vsel %vm672_vm4, %v2530_v39, %v2531_v28  ;;  %v7083_v0 = vsel %vm672_vm4, %v2535_v7, %v2536_v18  ;;  %v2541_v28 = vrot.slane %v6874_v36, 2 }
 0x3a7   : > { %8911 = vst [vmem:[#allocation145_spill] sm:$0xff] %v7068_v21  ;;  %8913 = vst [vmem:[#allocation85_spill] sm:$0xff] %v7083_v0 }
 0x3a8   : > { %2587 = vrot.lane.b32.xlu1 %v7020_v42, %s4430_s8  ;;  %2585 = vrot.lane.b32.xlu0 %v7023_v17, %s4430_s8  ;;  %v7075_v29 = vpop.permute.xlu0 %2373  ;;  %v7097_v37 = vsel %vm672_vm4, %v2541_v28, %v2543_v61  ;;  %v7100_v18 = vsel %vm672_vm4, %v2540_v44, %v2541_v28 }
 0x3a9   : > { %8914 = vst [vmem:[#allocation117_spill] sm:$0xff] %v7097_v37  ;;  %8915 = vst [vmem:[#allocation84_spill] sm:$0xff] %v7100_v18 }
 0x3ac   : > { %2591 = vrot.lane.b32.xlu1 %v7035_v31, %s4430_s8  ;;  %2589 = vrot.lane.b32.xlu0 %v7038_v4, %s4430_s8  ;;  %v7092_v39 = vpop.permute.xlu0 %2377 }
 0x3b0   : > { %2595 = vrot.lane.b32.xlu1 %v7046_v34, %s4430_s8  ;;  %2593 = vrot.lane.b32.xlu0 %v7049_v48, %s4430_s8  ;;  %v7106_v12 = vpop.permute.xlu0 %2381 }
 0x3b4   : > { %2599 = vrot.lane.b32.xlu1 %v7065_v62, %s4430_s8  ;;  %2597 = vrot.lane.b32.xlu0 %v7068_v21, %s4430_s8  ;;  %v7094_v62 = vpop.permute.xlu1 %2379  ;;  %v7114_v53 = vpop.permute.xlu0 %2385 }
 0x3b8   : > { %2603 = vrot.lane.b32.xlu1 %v7080_v32, %s4430_s8  ;;  %2601 = vrot.lane.b32.xlu0 %v7083_v0, %s4430_s8  ;;  %v7108_v36 = vpop.permute.xlu1 %2383  ;;  %v7122_v28 = vpop.permute.xlu0 %2389 }
 0x3bc   : > { %2607 = vrot.lane.b32.xlu1 %v7097_v37, %s4430_s8  ;;  %2605 = vrot.lane.b32.xlu0 %v7100_v18, %s4430_s8  ;;  %v7116_v7 = vpop.permute.xlu1 %2387 }
 0x3c0   : > { %2645 = vrot.lane.b32.xlu1 %v6524_v54, %s4431_s9  ;;  %2643 = vrot.lane.b32.xlu0 %v6527_v19, %s4431_s9  ;;  %v7124_v61 = vpop.permute.xlu1 %2391  ;;  %v7130_v54 = vpop.permute.xlu0 %2393 }
 0x3c1   : > { %8916 = vst [vmem:[#allocation149_spill] sm:$0xff] %v7130_v54 }
 0x3c4   : > { %2649 = vrot.lane.b32.xlu1 %v6549_v11, %s4431_s9  ;;  %2647 = vrot.lane.b32.xlu0 %v6552_v25, %s4431_s9  ;;  %v7132_v19 = vpop.permute.xlu1 %2395  ;;  %v7138_v44 = vpop.permute.xlu0 %2397 }
 0x3c5   : > { %8917 = vst [vmem:[#allocation116_spill] sm:$0xff] %v7132_v19  ;;  %8918 = vst [vmem:[#allocation148_spill] sm:$0xff] %v7138_v44 }
 0x3c8   : > { %2653 = vrot.lane.b32.xlu1 %v6574_v47, %s4431_s9  ;;  %2651 = vrot.lane.b32.xlu0 %v6577_v1, %s4431_s9  ;;  %v7140_v37 = vpop.permute.xlu1 %2399  ;;  %v7146_v18 = vpop.permute.xlu0 %2401 }
 0x3c9   : > { %8919 = vst [vmem:[#allocation87_spill] sm:$0xff] %v7140_v37  ;;  %8920 = vst [vmem:[#allocation24_spill] sm:$0xff] %v7146_v18 }
 0x3cc   : > { %2657 = vrot.lane.b32.xlu1 %v6599_v43, %s4431_s9  ;;  %2655 = vrot.lane.b32.xlu0 %v6602_v16, %s4431_s9  ;;  %v7148_v32 = vpop.permute.xlu1 %2403  ;;  %v7154_v0 = vpop.permute.xlu0 %2405 }
 0x3cd   : > { %8921 = vst [vmem:[#allocation86_spill] sm:$0xff] %v7148_v32  ;;  %8922 = vst [vmem:[#allocation151_spill] sm:$0xff] %v7154_v0 }
 0x3d0   : > { %2661 = vrot.lane.b32.xlu1 %v6624_v8, %s4431_s9  ;;  %2659 = vrot.lane.b32.xlu0 %v6627_v22, %s4431_s9  ;;  %v7156_v44 = vpop.permute.xlu1 %2407  ;;  %v7162_v37 = vpop.permute.xlu0 %2409 }
 0x3d1   : > { %8923 = vst [vmem:[#allocation118_spill] sm:$0xff] %v7156_v44  ;;  %8924 = vst [vmem:[#allocation150_spill] sm:$0xff] %v7162_v37 }
 0x3d4   : > { %2665 = vrot.lane.b32.xlu1 %v6649_v5, %s4431_s9  ;;  %2663 = vrot.lane.b32.xlu0 %v6652_v30, %s4431_s9  ;;  %v7164_v18 = vpop.permute.xlu1 %2411  ;;  %v7170_v32 = vpop.permute.xlu0 %2413 }
 0x3d5   : > { %8925 = vst [vmem:[#allocation89_spill] sm:$0xff] %v7164_v18  ;;  %8926 = vst [vmem:[#allocation25_spill] sm:$0xff] %v7170_v32 }
 0x3d8   : > { %2669 = vrot.lane.b32.xlu1 %v6674_v10, %s4431_s9  ;;  %2667 = vrot.lane.b32.xlu0 %v6677_v46, %s4431_s9  ;;  %v7172_v0 = vpop.permute.xlu1 %2415  ;;  %v7178_v44 = vpop.permute.xlu0 %2417 }
 0x3d9   : > { %8927 = vst [vmem:[#allocation88_spill] sm:$0xff] %v7172_v0  ;;  %8928 = vst [vmem:[#allocation62_spill] sm:$0xff] %v7178_v44  ;;  %v2235_v44 = vld [vmem:[%s8254_s4 + $0x8] sm:$0xff] }
 0x3dc   : > { %2673 = vrot.lane.b32.xlu1 %v6699_v60, %s4431_s9  ;;  %2671 = vrot.lane.b32.xlu0 %v6702_v45, %s4431_s9  ;;  %v7180_v37 = vpop.permute.xlu1 %2419 }
 0x3dd   : > { %8929 = vst [vmem:[#allocation119_spill] sm:$0xff] %v7180_v37  ;;  %v2234_v37 = vld [vmem:[%s8254_s4] sm:$0xff] }
 0x3de   : > { %v7186_v18 = vpop.permute.xlu0 %2421  ;;  %v4331_v0 = vpack.c.bf16 %v2235_v44, %v2234_v37 }
 0x3df   : > { %8930 = vst [vmem:[#allocation152_spill] sm:$0xff] %v7186_v18 }
 0x3e0   : > { %2677 = vrot.lane.b32.xlu1 %v6724_v20, %s4431_s9  ;;  %2675 = vrot.lane.b32.xlu0 %v6727_v24, %s4431_s9  ;;  %v7188_v32 = vpop.permute.xlu1 %2423 }
 0x3e1   : > { %8931 = vst [vmem:[#allocation91_spill] sm:$0xff] %v7188_v32  ;;  %4332 = vmatprep.subr.bf16.mxu1 %v4331_v0  ;;  %v8940_v32 = vld [vmem:[#allocation76_spill] sm:$0xff] }
 0x3e2   : > { %4334 = vmatpush3.bf16.msra.mxu1 %v4331_v0 }
 0x3e4   : > { %2681 = vrot.lane.b32.xlu1 %v6749_v52, %s4431_s9  ;;  %2679 = vrot.lane.b32.xlu0 %v6752_v51, %s4431_s9 }
 0x3e6   : > { %v7200_v19 = vpop.permute.xlu0 %2425  ;;  %v7202_v18 = vpop.permute.xlu1 %2427 }
 0x3e7   : > { %8932 = vst [vmem:[#allocation121_spill] sm:$0xff] %v7200_v19  ;;  %8933 = vst [vmem:[#allocation90_spill] sm:$0xff] %v7202_v18 }
 0x3e8   : > { %2747 = vrot.lane.b32.xlu1 %v6535_v57, %s4432_s10  ;;  %2745 = vrot.lane.b32.xlu0 %v6538_v27, %s4432_s10  ;;  %v2236_v57 = vld [vmem:[%s8254_s4 + $0x10] sm:$0xff]  ;;  %v2237_v27 = vld [vmem:[%s8254_s4 + $0x18] sm:$0xff] }
 0x3e9   : > { %v4335_v37 = vpack.c.bf16 %v2237_v27, %v2236_v57 }
 0x3eb   : > { %4336 = vmatprep.subr.bf16.mxu1 %v4335_v37 }
 0x3ec   : > { %2848 = vrot.lane.b32.xlu1 %v6905_v3, %s4433_s11  ;;  %2846 = vrot.lane.b32.xlu0 %v6908_v55, %s4433_s11  ;;  %v2238_v3 = vld [vmem:[%s8254_s4 + $0x20] sm:$0xf] }
 0x3ed   : > { %4338 = vmatpush3.bf16.msra.mxu1 %v4335_v37 }
 0x3ee   : > { %v7214_v44 = vpop.permute.xlu0 %2429  ;;  %v7216_v18 = vpop.permute.xlu1 %2431  ;;  %4273 = vmatprep.subr.msk.mxu1 %vm1811_vm5, %v2238_v3 }
 0x3ef   : > { %8934 = vst [vmem:[#allocation63_spill] sm:$0xff] %v7214_v44  ;;  %8935 = vst [vmem:[#allocation120_spill] sm:$0xff] %v7216_v18  ;;  %v8937_v44 = vld [vmem:[#allocation60_spill] sm:$0xff] }
 0x3f0   : > { %2946 = vrot.lane.b32.xlu1 %v6549_v11, %s4434_s12  ;;  %2944 = vrot.lane.b32.xlu0 %v6552_v25, %s4434_s12 }
 0x3f1   : > { %4274 = vmatpush3.msk.msra.mxu1 %vm1811_vm5, %v2238_v3 }
 0x3f2   : > { %v7225_v55 = vpop.permute.xlu0 %2545  ;;  %v7227_v0 = vpop.permute.xlu1 %2547 }
 0x3f4   : > { %2749 = vrot.lane.b32.xlu1 %v6563_v41, %s4432_s10  ;;  %3046 = vrot.lane.b32.xlu0 %v6563_v41, %s4435_s23 }
 0x3f6   : > { %v7235_v11 = vpop.permute.xlu0 %2549  ;;  %v7237_v25 = vpop.permute.xlu1 %2551 }
 0x3f8   : > { %3147 = vrot.lane.b32.xlu1 %v6919_v6, %s4436_s27  ;;  %3048 = vrot.lane.b32.xlu0 %v6560_v14, %s4435_s23 }
 0x3fa   : > { %v7243_v57 = vpop.permute.xlu0 %2553  ;;  %v7245_v27 = vpop.permute.xlu1 %2555 }
 0x3fc   : > { %2751 = vrot.lane.b32.xlu0 %v6560_v14, %s4432_s10  ;;  %2850 = vrot.lane.b32.xlu1 %v6919_v6, %s4433_s11 }
 0x3fe   : > { %v7251_v41 = vpop.permute.xlu0 %2557  ;;  %v7253_v37 = vpop.permute.xlu1 %2559 }
 0x400   : > { %3149 = vrot.lane.b32.xlu0 %v6916_v35, %s4436_s27  ;;  %2852 = vrot.lane.b32.xlu1 %v6916_v35, %s4433_s11 }
 0x402   : > { %v7259_v3 = vpop.permute.xlu0 %2561  ;;  %v7261_v18 = vpop.permute.xlu1 %2563 }
 0x404   : > { %2948 = vrot.lane.b32.xlu0 %v6577_v1, %s4434_s12  ;;  %2950 = vrot.lane.b32.xlu1 %v6574_v47, %s4434_s12 }
 0x406   : > { %v7267_v14 = vpop.permute.xlu0 %2565  ;;  %v7269_v6 = vpop.permute.xlu1 %2567 }
 0x407   : > { %8936 = vst [vmem:[#allocation153_spill] sm:$0xff] %v7269_v6 }
 0x408   : > { %3050 = vrot.lane.b32.xlu0 %v8937_v44, %s4435_s23  ;;  %2753 = vrot.lane.b32.xlu1 %v8937_v44, %s4432_s10 }
 0x40a   : > { %v7275_v35 = vpop.permute.xlu0 %2569  ;;  %v7277_v19 = vpop.permute.xlu1 %2571 }
 0x40b   : > { %8938 = vst [vmem:[#allocation93_spill] sm:$0xff] %v7275_v35  ;;  %8939 = vst [vmem:[#allocation123_spill] sm:$0xff] %v7277_v19 }
 0x40c   : > { %3052 = vrot.lane.b32.xlu0 %v8940_v32, %s4435_s23  ;;  %3151 = vrot.lane.b32.xlu1 %v6934_v49, %s4436_s27 }
 0x40e   : > { %v7283_v47 = vpop.permute.xlu0 %2573  ;;  %v7285_v1 = vpop.permute.xlu1 %2575 }
 0x40f   : > { %8941 = vst [vmem:[#allocation92_spill] sm:$0xff] %v7283_v47  ;;  %8942 = vst [vmem:[#allocation64_spill] sm:$0xff] %v7285_v1 }
 0x410   : > { %2755 = vrot.lane.b32.xlu0 %v8940_v32, %s4432_s10  ;;  %2854 = vrot.lane.b32.xlu1 %v6934_v49, %s4433_s11 }
 0x412   : > { %v7291_v44 = vpop.permute.xlu0 %2577  ;;  %v7293_v21 = vpop.permute.xlu1 %2579 }
 0x413   : > { %8943 = vst [vmem:[#allocation122_spill] sm:$0xff] %v7291_v44  ;;  %8944 = vst [vmem:[#allocation154_spill] sm:$0xff] %v7293_v21  ;;  %v8949_v21 = vld [vmem:[#allocation61_spill] sm:$0xff] }
 0x414   : > { %3153 = vrot.lane.b32.xlu0 %v6931_v63, %s4436_s27  ;;  %2856 = vrot.lane.b32.xlu1 %v6931_v63, %s4433_s11 }
 0x416   : > { %v7299_v19 = vpop.permute.xlu0 %2581  ;;  %v7301_v47 = vpop.permute.xlu1 %2583 }
 0x417   : > { %8945 = vst [vmem:[#allocation45_spill] sm:$0xff] %v7299_v19  ;;  %8946 = vst [vmem:[#allocation31_spill] sm:$0xff] %v7301_v47  ;;  %v8952_v47 = vld [vmem:[#allocation58_spill] sm:$0xff] }
 0x418   : > { %2952 = vrot.lane.b32.xlu0 %v6602_v16, %s4434_s12  ;;  %2954 = vrot.lane.b32.xlu1 %v6599_v43, %s4434_s12 }
 0x41a   : > { %v7307_v49 = vpop.permute.xlu0 %2585  ;;  %v7309_v32 = vpop.permute.xlu1 %2587 }
 0x41b   : > { %8947 = vst [vmem:[#allocation46_spill] sm:$0xff] %v7307_v49  ;;  %8948 = vst [vmem:[#allocation95_spill] sm:$0xff] %v7309_v32  ;;  %v8965_v49 = vld [vmem:[#allocation108_spill] sm:$0xff] }
 0x41c   : > { %3054 = vrot.lane.b32.xlu0 %v8949_v21, %s4435_s23  ;;  %2757 = vrot.lane.b32.xlu1 %v8949_v21, %s4432_s10 }
 0x41e   : > { %v7315_v63 = vpop.permute.xlu0 %2589  ;;  %v7317_v19 = vpop.permute.xlu1 %2591 }
 0x41f   : > { %8950 = vst [vmem:[#allocation125_spill] sm:$0xff] %v7315_v63  ;;  %8951 = vst [vmem:[#allocation94_spill] sm:$0xff] %v7317_v19 }
 0x420   : > { %3056 = vrot.lane.b32.xlu0 %v8952_v47, %s4435_s23  ;;  %3155 = vrot.lane.b32.xlu1 %v6945_v2, %s4436_s27 }
 0x422   : > { %v7323_v43 = vpop.permute.xlu0 %2593  ;;  %v7325_v16 = vpop.permute.xlu1 %2595 }
 0x423   : > { %8953 = vst [vmem:[#allocation65_spill] sm:$0xff] %v7323_v43  ;;  %8954 = vst [vmem:[#allocation124_spill] sm:$0xff] %v7325_v16  ;;  %v8963_v16 = vld [vmem:[#allocation138_spill] sm:$0xff] }
 0x424   : > { %2759 = vrot.lane.b32.xlu0 %v8952_v47, %s4432_s10  ;;  %2858 = vrot.lane.b32.xlu1 %v6945_v2, %s4433_s11 }
 0x426   : > { %v7331_v21 = vpop.permute.xlu0 %2597  ;;  %v7333_v63 = vpop.permute.xlu1 %2599 }
 0x427   : > { %8955 = vst [vmem:[#allocation170_spill] sm:$0xff] %v7331_v21  ;;  %8956 = vst [vmem:[#allocation155_spill] sm:$0xff] %v7333_v63  ;;  %v8961_v63 = vld [vmem:[#allocation142_spill] sm:$0xff] }
 0x428   : > { %3157 = vrot.lane.b32.xlu0 %v6942_v33, %s4436_s27  ;;  %2860 = vrot.lane.b32.xlu1 %v6942_v33, %s4433_s11 }
 0x42a   : > { %v7339_v19 = vpop.permute.xlu0 %2601  ;;  %v7341_v43 = vpop.permute.xlu1 %2603 }
 0x42b   : > { %8957 = vst [vmem:[#allocation38_spill] sm:$0xff] %v7339_v19  ;;  %8958 = vst [vmem:[#allocation169_spill] sm:$0xff] %v7341_v43  ;;  %v8962_v43 = vld [vmem:[#allocation75_spill] sm:$0xff] }
 0x42c   : > { %2956 = vrot.lane.b32.xlu0 %v6627_v22, %s4434_s12  ;;  %2958 = vrot.lane.b32.xlu1 %v6624_v8, %s4434_s12 }
 0x42e   : > { %v7347_v2 = vpop.permute.xlu0 %2605  ;;  %v7349_v47 = vpop.permute.xlu1 %2607 }
 0x42f   : > { %8959 = vst [vmem:[#allocation68_spill] sm:$0xff] %v7347_v2  ;;  %8960 = vst [vmem:[#allocation27_spill] sm:$0xff] %v7349_v47 }
 0x430   : > { %3058 = vrot.lane.b32.xlu0 %v8961_v63, %s4435_s23  ;;  %2761 = vrot.lane.b32.xlu1 %v8961_v63, %s4432_s10 }
 0x432   : > { %v2644_v33 = vpop.permute.xlu0 %2643  ;;  %v7355_v19 = vpop.permute.xlu1 %2645 }
 0x434   : > { %3060 = vrot.lane.b32.xlu0 %v8962_v43, %s4435_s23  ;;  %3159 = vrot.lane.b32.xlu1 %v6960_v13, %s4436_s27 }
 0x436   : > { %v7361_v8 = vpop.permute.xlu0 %2647  ;;  %v7363_v22 = vpop.permute.xlu1 %2649 }
 0x438   : > { %2763 = vrot.lane.b32.xlu0 %v8962_v43, %s4432_s10  ;;  %2862 = vrot.lane.b32.xlu1 %v6960_v13, %s4433_s11 }
 0x43a   : > { %v7369_v63 = vpop.permute.xlu0 %2651  ;;  %v7371_v47 = vpop.permute.xlu1 %2653 }
 0x43c   : > { %3161 = vrot.lane.b32.xlu0 %v6957_v23, %s4436_s27  ;;  %2864 = vrot.lane.b32.xlu1 %v6957_v23, %s4433_s11 }
 0x43e   : > { %v7377_v2 = vpop.permute.xlu0 %2655  ;;  %v7379_v21 = vpop.permute.xlu1 %2657 }
 0x440   : > { %2960 = vrot.lane.b32.xlu0 %v6652_v30, %s4434_s12  ;;  %2962 = vrot.lane.b32.xlu1 %v6649_v5, %s4434_s12 }
 0x442   : > { %v7385_v13 = vpop.permute.xlu0 %2659  ;;  %v7387_v43 = vpop.permute.xlu1 %2661 }
 0x444   : > { %3062 = vrot.lane.b32.xlu0 %v8963_v16, %s4435_s23  ;;  %2765 = vrot.lane.b32.xlu1 %v8963_v16, %s4432_s10 }
 0x446   : > { %v7393_v23 = vpop.permute.xlu0 %2663  ;;  %v7395_v32 = vpop.permute.xlu1 %2665 }
 0x447   : > { %8964 = vst [vmem:[#allocation69_spill] sm:$0xff] %v7395_v32 }
 0x448   : > { %3064 = vrot.lane.b32.xlu0 %v8965_v49, %s4435_s23  ;;  %3163 = vrot.lane.b32.xlu1 %v6971_v38, %s4436_s27 }
 0x44a   : > { %v7401_v5 = vpop.permute.xlu0 %2667  ;;  %v7403_v30 = vpop.permute.xlu1 %2669 }
 0x44b   : > { %8966 = vst [vmem:[#allocation97_spill] sm:$0xff] %v7401_v5  ;;  %8967 = vst [vmem:[#allocation127_spill] sm:$0xff] %v7403_v30  ;;  %v8976_v30 = vld [vmem:[#allocation115_spill] sm:$0xff] }
 0x44c   : > { %2767 = vrot.lane.b32.xlu0 %v8965_v49, %s4432_s10  ;;  %2866 = vrot.lane.b32.xlu1 %v6971_v38, %s4433_s11 }
 0x44e   : > { %v7409_v16 = vpop.permute.xlu0 %2671  ;;  %v7411_v44 = vpop.permute.xlu1 %2673 }
 0x44f   : > { %8968 = vst [vmem:[#allocation96_spill] sm:$0xff] %v7409_v16  ;;  %8969 = vst [vmem:[#allocation66_spill] sm:$0xff] %v7411_v44  ;;  %v8974_v44 = vld [vmem:[#allocation77_spill] sm:$0xff] }
 0x450   : > { %3165 = vrot.lane.b32.xlu0 %v6968_v40, %s4436_s27  ;;  %2868 = vrot.lane.b32.xlu1 %v6968_v40, %s4433_s11  ;;  %v4388_v16 = vld [vmem:[#allocation2] sm:$0xff] }
 0x452   : > { %v7417_v1 = vpop.permute.xlu0 %2675  ;;  %v7419_v5 = vpop.permute.xlu1 %2677 }
 0x453   : > { %8970 = vst [vmem:[#allocation126_spill] sm:$0xff] %v7417_v1  ;;  %8971 = vst [vmem:[#allocation172_spill] sm:$0xff] %v7419_v5  ;;  %v8975_v5 = vld [vmem:[#allocation163_spill] sm:$0xff] }
 0x454   : > { %2964 = vrot.lane.b32.xlu0 %v6677_v46, %s4434_s12  ;;  %2966 = vrot.lane.b32.xlu1 %v6674_v10, %s4434_s12 }
 0x456   : > { %v7425_v38 = vpop.permute.xlu0 %2679  ;;  %v7427_v49 = vpop.permute.xlu1 %2681 }
 0x457   : > { %8972 = vst [vmem:[#allocation156_spill] sm:$0xff] %v7425_v38  ;;  %8973 = vst [vmem:[#allocation184_spill] sm:$0xff] %v7427_v49 }
 0x458   : > { %3066 = vrot.lane.b32.xlu0 %v8974_v44, %s4435_s23  ;;  %2769 = vrot.lane.b32.xlu1 %v8974_v44, %s4432_s10  ;;  %v3243_v44 = vsel %vm279_vm0, %v4388_v16, %v7054_v59 }
 0x459   : > { %v3275_v35 = vsel %vm1483_vm6, %v3243_v44, %v7225_v55  ;;  %v8978_v44 = vld [vmem:[#allocation146_spill] sm:$0xff] }
 0x45a   : > { %v2746_v40 = vpop.permute.xlu0 %2745  ;;  %v2748_v1 = vpop.permute.xlu1 %2747 }
 0x45c   : > { %3068 = vrot.lane.b32.xlu0 %v8975_v5, %s4435_s23  ;;  %3167 = vrot.lane.b32.xlu1 %v6986_v56, %s4436_s27 }
 0x45e   : > { %v2847_v46 = vpop.permute.xlu0 %2846  ;;  %v2849_v10 = vpop.permute.xlu1 %2848 }
 0x460   : > { %2771 = vrot.lane.b32.xlu0 %v8975_v5, %s4432_s10  ;;  %2870 = vrot.lane.b32.xlu1 %v6986_v56, %s4433_s11  ;;  %v3307_v5 = vsel %vm1516_vm7, %v3275_v35, %v2644_v33  ;;  %v4389_v33 = vld [vmem:[#allocation2 + $0x8] sm:$0xff] }
 0x461   : > { %v3339_v56 = vsel %vm1549_vm8, %v3307_v5, %v2746_v40  ;;  %v3244_v40 = vsel %vm279_vm0, %v4389_v33, %v7056_v9 }
 0x462   : > { %v2945_v49 = vpop.permute.xlu0 %2944  ;;  %v2947_v38 = vpop.permute.xlu1 %2946  ;;  %v3371_v6 = vsel %vm1582_vm9, %v3339_v56, %v2847_v46  ;;  %v8977_v46 = vld [vmem:[#allocation111_spill] sm:$0xff] }
 0x463   : > { %v3403_v59 = vsel %vm1615_vm10, %v3371_v6, %v2945_v49 }
 0x464   : > { %3169 = vrot.lane.b32.xlu0 %v8976_v30, %s4436_s27  ;;  %2872 = vrot.lane.b32.xlu1 %v8976_v30, %s4433_s11 }
 0x466   : > { %v3047_v54 = vpop.permute.xlu0 %3046  ;;  %v2750_v32 = vpop.permute.xlu1 %2749 }
 0x467   : > { %v3435_v30 = vsel %vm1648_vm11, %v3403_v59, %v3047_v54 }
 0x468   : > { %2968 = vrot.lane.b32.xlu0 %v6702_v45, %s4434_s12  ;;  %2970 = vrot.lane.b32.xlu1 %v6699_v60, %s4434_s12  ;;  %v3276_v60 = vsel %vm1483_vm6, %v3244_v40, %v7227_v0 }
 0x469   : > { %v3308_v45 = vsel %vm1516_vm7, %v3276_v60, %v7355_v19 }
 0x46a   : > { %v3049_v16 = vpop.permute.xlu0 %3048  ;;  %v3148_v55 = vpop.permute.xlu1 %3147  ;;  %v3340_v49 = vsel %vm1549_vm8, %v3308_v45, %v2748_v1 }
 0x46b   : > { %v3467_v35 = vsel %vm1681_vm12, %v3435_v30, %v3148_v55  ;;  %v3372_v9 = vsel %vm1582_vm9, %v3340_v49, %v2849_v10  ;;  %v4390_v30 = vld [vmem:[#allocation2 + $0x18] sm:$0xff]  ;;  %v4391_v49 = vld [vmem:[#allocation2 + $0x20] sm:$0xff] }
 0x46c   : > { %3070 = vrot.lane.b32.xlu0 %v8977_v46, %s4435_s23  ;;  %2773 = vrot.lane.b32.xlu1 %v8977_v46, %s4432_s10  ;;  %v3404_v5 = vsel %vm1615_vm10, %v3372_v9, %v2947_v38  ;;  %v3245_v38 = vsel %vm279_vm0, %v4390_v30, %v7075_v29  ;;  %v4392_v30 = vld [vmem:[#allocation2 + $0x30] sm:$0xff] }
 0x46d   : > { %4275 = vmatprep.mubr.msk.f32.mxu1 %vm1714_vm13, %v3467_v35  ;;  %v3436_v0 = vsel %vm1648_vm11, %v3404_v5, %v3049_v16  ;;  %v8979_v16 = vld [vmem:[#allocation82_spill] sm:$0xff]  ;;  %v3277_v55 = vsel %vm1483_vm6, %v3245_v38, %v7235_v11  ;;  %v8982_v38 = vld [vmem:[#allocation147_spill] sm:$0xff] }
 0x46e   : > { %v2752_v54 = vpop.permute.xlu0 %2751  ;;  %v2851_v6 = vpop.permute.xlu1 %2850 }
 0x470   : > { %3072 = vrot.lane.b32.xlu0 %v8978_v44, %s4435_s23  ;;  %3171 = vrot.lane.b32.xlu1 %v6997_v26, %s4436_s27 }
 0x472   : > { %v3150_v56 = vpop.permute.xlu0 %3149  ;;  %v2853_v59 = vpop.permute.xlu1 %2852 }
 0x473   : > { %v3468_v19 = vsel %vm1681_vm12, %v3436_v0, %v3150_v56  ;;  %v8981_v0 = vld [vmem:[#allocation79_spill] sm:$0xff] }
 0x474   : > { %2775 = vrot.lane.b32.xlu0 %v8978_v44, %s4432_s10  ;;  %2874 = vrot.lane.b32.xlu1 %v6997_v26, %s4433_s11  ;;  %v3309_v26 = vsel %vm1516_vm7, %v3277_v55, %v7361_v8 }
 0x475   : > { %4276 = vmatmul.mubr.msk.f32.vlgmr.msra.gmra.mrb[0].mxu1 %vm1714_vm13, %v3468_v19  ;;  %v3341_v40 = vsel %vm1549_vm8, %v3309_v26, %v2750_v32  ;;  %v3246_v32 = vsel %vm279_vm0, %v4391_v49, %v7077_v58 }
 0x476   : > { %v2949_v1 = vpop.permute.xlu0 %2948  ;;  %v2951_v10 = vpop.permute.xlu1 %2950  ;;  %v3373_v46 = vsel %vm1582_vm9, %v3341_v40, %v2851_v6  ;;  %v8980_v6 = vld [vmem:[#allocation141_spill] sm:$0xff] }
 0x477   : > { %v3405_v29 = vsel %vm1615_vm10, %v3373_v46, %v2949_v1 }
 0x478   : > { %3173 = vrot.lane.b32.xlu0 %v8979_v16, %s4436_s27  ;;  %2876 = vrot.lane.b32.xlu1 %v8979_v16, %s4433_s11 }
 0x47a   : > { %v3051_v35 = vpop.permute.xlu0 %3050  ;;  %v2754_v33 = vpop.permute.xlu1 %2753 }
 0x47b   : > { %v3437_v60 = vsel %vm1648_vm11, %v3405_v29, %v3051_v35 }
 0x47c   : > { %2972 = vrot.lane.b32.xlu0 %v6727_v24, %s4434_s12  ;;  %2974 = vrot.lane.b32.xlu1 %v6724_v20, %s4434_s12  ;;  %v3278_v20 = vsel %vm1483_vm6, %v3246_v32, %v7237_v25  ;;  %v8984_v32 = vld [vmem:[#allocation110_spill] sm:$0xff] }
 0x47d   : > { %v3310_v24 = vsel %vm1516_vm7, %v3278_v20, %v7363_v22 }
 0x47e   : > { %v3053_v11 = vpop.permute.xlu0 %3052  ;;  %v3152_v45 = vpop.permute.xlu1 %3151  ;;  %v3342_v5 = vsel %vm1549_vm8, %v3310_v24, %v2752_v54 }
 0x47f   : > { %v3469_v8 = vsel %vm1681_vm12, %v3437_v60, %v3152_v45  ;;  %v3374_v58 = vsel %vm1582_vm9, %v3342_v5, %v2853_v59  ;;  %v4393_v60 = vld [vmem:[#allocation2 + $0x38] sm:$0xff]  ;;  %v4394_v5 = vld [vmem:[#allocation2 + $0x48] sm:$0xff] }
 0x480   : > { %3074 = vrot.lane.b32.xlu0 %v8980_v6, %s4435_s23  ;;  %2777 = vrot.lane.b32.xlu1 %v8980_v6, %s4432_s10  ;;  %v3406_v56 = vsel %vm1615_vm10, %v3374_v58, %v2951_v10  ;;  %v3247_v10 = vsel %vm279_vm0, %v4392_v30, %v7092_v39  ;;  %v3249_v58 = vsel %vm279_vm0, %v4394_v5, %v7106_v12  ;;  %v7593_v30 = vld [vmem:[#allocation2 + $0x110] sm:$0xff] }
 0x481   : > { %4278 = vmatprep.mubr.msk.f32.mxu1 %vm1714_vm13, %v3469_v8  ;;  %v3438_v25 = vsel %vm1648_vm11, %v3406_v56, %v3053_v11  ;;  %v3279_v16 = vsel %vm1483_vm6, %v3247_v10, %v7243_v57  ;;  %v8983_v11 = vld [vmem:[#allocation140_spill] sm:$0xff]  ;;  %v8985_v10 = vld [vmem:[#allocation81_spill] sm:$0xff] }
 0x482   : > { %v2756_v9 = vpop.permute.xlu0 %2755  ;;  %v2855_v44 = vpop.permute.xlu1 %2854 }
 0x484   : > { %3076 = vrot.lane.b32.xlu0 %v8981_v0, %s4435_s23  ;;  %3175 = vrot.lane.b32.xlu1 %v7012_v50, %s4436_s27 }
 0x486   : > { %v3154_v19 = vpop.permute.xlu0 %3153  ;;  %v2857_v1 = vpop.permute.xlu1 %2856 }
 0x487   : > { %v3470_v22 = vsel %vm1681_vm12, %v3438_v25, %v3154_v19 }
 0x488   : > { %2779 = vrot.lane.b32.xlu0 %v8981_v0, %s4432_s10  ;;  %2878 = vrot.lane.b32.xlu1 %v7012_v50, %s4433_s11  ;;  %v3311_v50 = vsel %vm1516_vm7, %v3279_v16, %v7369_v63  ;;  %v3281_v0 = vsel %vm1483_vm6, %v3249_v58, %v7251_v41 }
 0x489   : > { %4279 = vmatmul.mubr.msk.f32.gmra.mrb[2].mxu1 %vm1714_vm13, %v3470_v22  ;;  %v3343_v35 = vsel %vm1549_vm8, %v3311_v50, %v2754_v33  ;;  %v3248_v33 = vsel %vm279_vm0, %v4393_v60, %v7094_v62 }
 0x48a   : > { %v2953_v54 = vpop.permute.xlu0 %2952  ;;  %v2955_v59 = vpop.permute.xlu1 %2954  ;;  %v3375_v40 = vsel %vm1582_vm9, %v3343_v35, %v2855_v44 }
 0x48b   : > { %v3407_v39 = vsel %vm1615_vm10, %v3375_v40, %v2953_v54  ;;  %v4395_v54 = vld [vmem:[#allocation2 + $0x50] sm:$0xff] }
 0x48c   : > { %3177 = vrot.lane.b32.xlu0 %v8982_v38, %s4436_s27  ;;  %2880 = vrot.lane.b32.xlu1 %v8982_v38, %s4433_s11 }
 0x48e   : > { %v3055_v55 = vpop.permute.xlu0 %3054  ;;  %v2758_v26 = vpop.permute.xlu1 %2757 }
 0x48f   : > { %v3439_v46 = vsel %vm1648_vm11, %v3407_v39, %v3055_v55  ;;  %v8986_v39 = vld [vmem:[#allocation165_spill] sm:$0xff] }
 0x490   : > { %2976 = vrot.lane.b32.xlu0 %v6752_v51, %s4434_s12  ;;  %2978 = vrot.lane.b32.xlu1 %v6749_v52, %s4434_s12  ;;  %v3280_v52 = vsel %vm1483_vm6, %v3248_v33, %v7245_v27 }
 0x491   : > { %v3312_v51 = vsel %vm1516_vm7, %v3280_v52, %v7371_v47 }
 0x492   : > { %v3057_v57 = vpop.permute.xlu0 %3056  ;;  %v3156_v29 = vpop.permute.xlu1 %3155  ;;  %v3344_v49 = vsel %vm1549_vm8, %v3312_v51, %v2756_v9 }
 0x493   : > { %v3471_v63 = vsel %vm1681_vm12, %v3439_v46, %v3156_v29  ;;  %v3376_v62 = vsel %vm1582_vm9, %v3344_v49, %v2857_v1  ;;  %v4397_v29 = vld [vmem:[#allocation2 + $0x60] sm:$0xff]  ;;  %v4398_v49 = vld [vmem:[#allocation2 + $0x68] sm:$0xff] }
 0x494   : > { %3078 = vrot.lane.b32.xlu0 %v8983_v11, %s4435_s23  ;;  %2781 = vrot.lane.b32.xlu1 %v8983_v11, %s4432_s10  ;;  %v3408_v6 = vsel %vm1615_vm10, %v3376_v62, %v2955_v59  ;;  %v3250_v59 = vsel %vm279_vm0, %v4395_v54, %v7108_v36  ;;  %v3252_v62 = vsel %vm279_vm0, %v4398_v49, %v7116_v7  ;;  %v8995_v49 = vld [vmem:[#allocation144_spill] sm:$0xff] }
 0x495   : > { %4281 = vmatprep.mubr.msk.f32.mxu1 %vm1714_vm13, %v3471_v63  ;;  %v3440_v27 = vsel %vm1648_vm11, %v3408_v6, %v3057_v57  ;;  %v3251_v63 = vsel %vm279_vm0, %v4397_v29, %v7114_v53 }
 0x496   : > { %v2760_v45 = vpop.permute.xlu0 %2759  ;;  %v2859_v8 = vpop.permute.xlu1 %2858  ;;  %v3283_v60 = vsel %vm1483_vm6, %v3251_v63, %v7259_v3 }
 0x497   : > { %v3315_v33 = vsel %vm1516_vm7, %v3283_v60, %v7385_v13  ;;  %v4405_v60 = vld [vmem:[#allocation2 + $0x90] sm:$0xff] }
 0x498   : > { %3080 = vrot.lane.b32.xlu0 %v8984_v32, %s4435_s23  ;;  %3179 = vrot.lane.b32.xlu1 %v7023_v17, %s4436_s27 }
 0x49a   : > { %v3158_v20 = vpop.permute.xlu0 %3157  ;;  %v2861_v24 = vpop.permute.xlu1 %2860 }
 0x49b   : > { %v3472_v47 = vsel %vm1681_vm12, %v3440_v27, %v3158_v20 }
 0x49c   : > { %2783 = vrot.lane.b32.xlu0 %v8984_v32, %s4432_s10  ;;  %2882 = vrot.lane.b32.xlu1 %v7023_v17, %s4433_s11  ;;  %v3313_v17 = vsel %vm1516_vm7, %v3281_v0, %v7377_v2  ;;  %v7639_v32 = vld [vmem:[#allocation2 + $0x120] sm:$0xff] }
 0x49d   : > { %4282 = vmatmul.mubr.msk.f32.gmra.mrb[4].mxu1 %vm1714_vm13, %v3472_v47  ;;  %v3345_v19 = vsel %vm1549_vm8, %v3313_v17, %v2758_v26  ;;  %v7652_v47 = vld [vmem:[#allocation2 + $0x128] sm:$0xff] }
 0x49e   : > { %v2957_v9 = vpop.permute.xlu0 %2956  ;;  %v2959_v44 = vpop.permute.xlu1 %2958  ;;  %v3377_v1 = vsel %vm1582_vm9, %v3345_v19, %v2859_v8  ;;  %v8988_v19 = vld [vmem:[#allocation113_spill] sm:$0xff] }
 0x4a0   : > { %3181 = vrot.lane.b32.xlu0 %v7020_v42, %s4436_s27  ;;  %2884 = vrot.lane.b32.xlu1 %v7020_v42, %s4433_s11  ;;  %v3409_v42 = vsel %vm1615_vm10, %v3377_v1, %v2957_v9  ;;  %v8987_v9 = vld [vmem:[#allocation80_spill] sm:$0xff] }
 0x4a2   : > { %v3059_v56 = vpop.permute.xlu0 %3058  ;;  %v2762_v25 = vpop.permute.xlu1 %2761 }
 0x4a3   : > { %v3441_v12 = vsel %vm1648_vm11, %v3409_v42, %v3059_v56  ;;  %v3347_v51 = vsel %vm1549_vm8, %v3315_v33, %v2762_v25  ;;  %v4401_v56 = vld [vmem:[#allocation2 + $0x78] sm:$0xff]  ;;  %v8992_v33 = vld [vmem:[#allocation149_spill] sm:$0xff] }
 0x4a4   : > { %2980 = vrot.lane.b32.xlu0 %v6777_v15, %s4434_s12  ;;  %2683 = vrot.lane.b32.xlu1 %v6777_v15, %s4431_s9  ;;  %v3282_v15 = vsel %vm1483_vm6, %v3250_v59, %v7253_v37  ;;  %v3253_v25 = vsel %vm279_vm0, %v4401_v56, %v7122_v28 }
 0x4a5   : > { %v3314_v38 = vsel %vm1516_vm7, %v3282_v15, %v7379_v21  ;;  %v3285_v1 = vsel %vm1483_vm6, %v3253_v25, %v7267_v14 }
 0x4a6   : > { %v3061_v41 = vpop.permute.xlu0 %3060  ;;  %v3160_v22 = vpop.permute.xlu1 %3159  ;;  %v3346_v36 = vsel %vm1549_vm8, %v3314_v38, %v2760_v45  ;;  %v3317_v42 = vsel %vm1516_vm7, %v3285_v1, %v7393_v23  ;;  %v8989_v38 = vld [vmem:[#allocation153_spill] sm:$0xff] }
 0x4a7   : > { %v3473_v2 = vsel %vm1681_vm12, %v3441_v12, %v3160_v22  ;;  %v3378_v55 = vsel %vm1582_vm9, %v3346_v36, %v2861_v24 }
 0x4a8   : > { %2982 = vrot.lane.b32.xlu0 %v7593_v30, %s4434_s12  ;;  %3082 = vrot.lane.b32.xlu1 %v8985_v10, %s4435_s23  ;;  %v3410_v26 = vsel %vm1615_vm10, %v3378_v55, %v2959_v44 }
 0x4a9   : > { %4284 = vmatprep.mubr.msk.f32.mxu1 %vm1714_vm13, %v3473_v2  ;;  %v3442_v37 = vsel %vm1648_vm11, %v3410_v26, %v3061_v41 }
 0x4aa   : > { %v2764_v16 = vpop.permute.xlu0 %2763  ;;  %v2863_v50 = vpop.permute.xlu1 %2862 }
 0x4ab   : > { %v3379_v45 = vsel %vm1582_vm9, %v3347_v51, %v2863_v50 }
 0x4ac   : > { %2685 = vrot.lane.b32.xlu0 %v7593_v30, %s4431_s9  ;;  %2785 = vrot.lane.b32.xlu1 %v8985_v10, %s4432_s10  ;;  %v4402_v10 = vld [vmem:[#allocation2 + $0x80] sm:$0xff] }
 0x4ad   : > { %v3254_v15 = vsel %vm279_vm0, %v4402_v10, %v7124_v61  ;;  %v7762_v10 = vld [vmem:[#allocation2 + $0x158] sm:$0xff] }
 0x4ae   : > { %v3162_v35 = vpop.permute.xlu0 %3161  ;;  %v2865_v40 = vpop.permute.xlu1 %2864 }
 0x4af   : > { %v3474_v21 = vsel %vm1681_vm12, %v3442_v37, %v3162_v35  ;;  %v7698_v37 = vld [vmem:[#allocation2 + $0x138] sm:$0xff] }
 0x4b0   : > { %3084 = vrot.lane.b32.xlu0 %v8986_v39, %s4435_s23  ;;  %3183 = vrot.lane.b32.xlu1 %v7038_v4, %s4436_s27 }
 0x4b1   : > { %4285 = vmatmul.mubr.msk.f32.gmra.mrb[6].mxu1 %vm1714_vm13, %v3474_v21 }
 0x4b2   : > { %v2961_v46 = vpop.permute.xlu0 %2960  ;;  %v2963_v57 = vpop.permute.xlu1 %2962 }
 0x4b4   : > { %2787 = vrot.lane.b32.xlu0 %v8986_v39, %s4432_s10  ;;  %2886 = vrot.lane.b32.xlu1 %v7038_v4, %s4433_s11  ;;  %v3411_v4 = vsel %vm1615_vm10, %v3379_v45, %v2961_v46  ;;  %v7707_v46 = vld [vmem:[#allocation2 + $0x140] sm:$0xff] }
 0x4b5   : > { %v8994_v45 = vld [vmem:[#allocation97_spill] sm:$0xff] }
 0x4b6   : > { %v3063_v11 = vpop.permute.xlu0 %3062  ;;  %v2766_v52 = vpop.permute.xlu1 %2765 }
 0x4b7   : > { %v3443_v53 = vsel %vm1648_vm11, %v3411_v4, %v3063_v11  ;;  %v3349_v22 = vsel %vm1549_vm8, %v3317_v42, %v2766_v52  ;;  %v3255_v11 = vsel %vm279_vm0, %v4405_v60, %v8992_v33  ;;  %v8993_v52 = vld [vmem:[#allocation93_spill] sm:$0xff]  ;;  %v9006_v60 = vld [vmem:[#allocation167_spill] sm:$0xff] }
 0x4b8   : > { %3185 = vrot.lane.b32.xlu0 %v7035_v31, %s4436_s27  ;;  %2888 = vrot.lane.b32.xlu1 %v7035_v31, %s4433_s11  ;;  %v3284_v31 = vsel %vm1483_vm6, %v3252_v62, %v7261_v18  ;;  %v3287_v51 = vsel %vm1483_vm6, %v3255_v11, %v8993_v52  ;;  %v8996_v62 = vld [vmem:[#allocation145_spill] sm:$0xff]  ;;  %v9008_v11 = vld [vmem:[#allocation64_spill] sm:$0xff] }
 0x4b9   : > { %v3316_v6 = vsel %vm1516_vm7, %v3284_v31, %v7387_v43  ;;  %v3319_v4 = vsel %vm1516_vm7, %v3287_v51, %v8994_v45  ;;  %v9007_v33 = vld [vmem:[#allocation85_spill] sm:$0xff]  ;;  %v9009_v51 = vld [vmem:[#allocation66_spill] sm:$0xff] }
 0x4ba   : > { %v3065_v3 = vpop.permute.xlu0 %3064  ;;  %v3164_v8 = vpop.permute.xlu1 %3163  ;;  %v3348_v7 = vsel %vm1549_vm8, %v3316_v6, %v2764_v16  ;;  %v8990_v16 = vld [vmem:[#allocation69_spill] sm:$0xff] }
 0x4bb   : > { %v3475_v13 = vsel %vm1681_vm12, %v3443_v53, %v3164_v8  ;;  %v3380_v24 = vsel %vm1582_vm9, %v3348_v7, %v2865_v40 }
 0x4bc   : > { %2984 = vrot.lane.b32.xlu0 %v7639_v32, %s4434_s12  ;;  %2687 = vrot.lane.b32.xlu1 %v7639_v32, %s4431_s9  ;;  %v3412_v18 = vsel %vm1615_vm10, %v3380_v24, %v2963_v57  ;;  %v8991_v57 = vld [vmem:[#allocation112_spill] sm:$0xff] }
 0x4bd   : > { %4287 = vmatprep.mubr.msk.f32.mxu1 %vm1714_vm13, %v3475_v13  ;;  %v3444_v44 = vsel %vm1648_vm11, %v3412_v18, %v3065_v3  ;;  %v4406_v24 = vld [vmem:[#allocation2 + $0x98] sm:$0xff] }
 0x4be   : > { %v2768_v27 = vpop.permute.xlu0 %2767  ;;  %v2867_v20 = vpop.permute.xlu1 %2866 }
 0x4bf   : > { %v3381_v2 = vsel %vm1582_vm9, %v3349_v22, %v2867_v20 }
 0x4c0   : > { %2986 = vrot.lane.b32.xlu0 %v7652_v47, %s4434_s12  ;;  %3086 = vrot.lane.b32.xlu1 %v8987_v9, %s4435_s23 }
 0x4c2   : > { %v3166_v5 = vpop.permute.xlu0 %3165  ;;  %v2869_v43 = vpop.permute.xlu1 %2868 }
 0x4c3   : > { %v3476_v58 = vsel %vm1681_vm12, %v3444_v44, %v3166_v5  ;;  %v8998_v44 = vld [vmem:[#allocation123_spill] sm:$0xff] }
 0x4c4   : > { %2689 = vrot.lane.b32.xlu0 %v7652_v47, %s4431_s9  ;;  %2789 = vrot.lane.b32.xlu1 %v8987_v9, %s4432_s10  ;;  %v8997_v9 = vld [vmem:[#allocation116_spill] sm:$0xff] }
 0x4c5   : > { %4288 = vmatmul.mubr.msk.f32.gmra.mrb[8].mxu1 %vm1714_vm13, %v3476_v58  ;;  %v3256_v18 = vsel %vm279_vm0, %v4406_v24, %v8997_v9  ;;  %v4411_v24 = vld [vmem:[#allocation2 + $0xc0] sm:$0xff]  ;;  %v9011_v9 = vld [vmem:[#allocation24_spill] sm:$0xff] }
 0x4c6   : > { %v2965_v0 = vpop.permute.xlu0 %2964  ;;  %v2967_v17 = vpop.permute.xlu1 %2966  ;;  %v3288_v5 = vsel %vm1483_vm6, %v3256_v18, %v8998_v44  ;;  %v3259_v18 = vsel %vm279_vm0, %v4411_v24, %v9011_v9  ;;  %v7808_v44 = vld [vmem:[#allocation2 + $0x168] sm:$0xff]  ;;  %v2230_v9 = vld [vmem:[#allocation2 + $0x190] sm:$0x3] }
 0x4c7   : > { %v3413_v28 = vsel %vm1615_vm10, %v3381_v2, %v2965_v0  ;;  %v7753_v2 = vld [vmem:[#allocation2 + $0x150] sm:$0xff] }
 0x4c8   : > { %3088 = vrot.lane.b32.xlu0 %v8988_v19, %s4435_s23  ;;  %3187 = vrot.lane.b32.xlu1 %v7049_v48, %s4436_s27 }
 0x4ca   : > { %v3067_v12 = vpop.permute.xlu0 %3066  ;;  %v2770_v41 = vpop.permute.xlu1 %2769 }
 0x4cb   : > { %v3445_v54 = vsel %vm1648_vm11, %v3413_v28, %v3067_v12  ;;  %v3351_v8 = vsel %vm1549_vm8, %v3319_v4, %v2770_v41 }
 0x4cc   : > { %2791 = vrot.lane.b32.xlu0 %v8988_v19, %s4432_s10  ;;  %2890 = vrot.lane.b32.xlu1 %v7049_v48, %s4433_s11  ;;  %v3286_v48 = vsel %vm1483_vm6, %v3254_v15, %v8989_v38  ;;  %v9000_v19 = vld [vmem:[#allocation114_spill] sm:$0xff]  ;;  %v9002_v15 = vld [vmem:[#allocation143_spill] sm:$0xff]  ;;  %v9003_v38 = vld [vmem:[#allocation92_spill] sm:$0xff] }
 0x4cd   : > { %v3318_v50 = vsel %vm1516_vm7, %v3286_v48, %v8990_v16  ;;  %v9004_v16 = vld [vmem:[#allocation96_spill] sm:$0xff] }
 0x4ce   : > { %v3069_v14 = vpop.permute.xlu0 %3068  ;;  %v3168_v59 = vpop.permute.xlu1 %3167  ;;  %v3350_v26 = vsel %vm1549_vm8, %v3318_v50, %v2768_v27 }
 0x4cf   : > { %v3477_v23 = vsel %vm1681_vm12, %v3445_v54, %v3168_v59  ;;  %v3382_v61 = vsel %vm1582_vm9, %v3350_v26, %v2869_v43  ;;  %v8999_v43 = vld [vmem:[#allocation127_spill] sm:$0xff]  ;;  %v9001_v59 = vld [vmem:[#allocation148_spill] sm:$0xff] }
 0x4d0   : > { %3189 = vrot.lane.b32.xlu0 %v7046_v34, %s4436_s27  ;;  %2892 = vrot.lane.b32.xlu1 %v7046_v34, %s4433_s11  ;;  %v3414_v34 = vsel %vm1615_vm10, %v3382_v61, %v2967_v17  ;;  %v3320_v58 = vsel %vm1516_vm7, %v3288_v5, %v8999_v43  ;;  %v9012_v5 = vld [vmem:[#allocation122_spill] sm:$0xff] }
 0x4d1   : > { %4290 = vmatprep.mubr.msk.f32.mxu1 %vm1714_vm13, %v3477_v23  ;;  %v3446_v35 = vsel %vm1648_vm11, %v3414_v34, %v3069_v14  ;;  %v4408_v14 = vld [vmem:[#allocation2 + $0xa8] sm:$0xff]  ;;  %v3291_v43 = vsel %vm1483_vm6, %v3259_v18, %v9012_v5 }
 0x4d2   : > { %v2772_v36 = vpop.permute.xlu0 %2771  ;;  %v2871_v55 = vpop.permute.xlu1 %2870  ;;  %v3257_v23 = vsel %vm279_vm0, %v4408_v14, %v9001_v59  ;;  %v4414_v14 = vld [vmem:[#allocation2 + $0xc8] sm:$0xff] }
 0x4d3   : > { %v3383_v13 = vsel %vm1582_vm9, %v3351_v8, %v2871_v55  ;;  %v3352_v56 = vsel %vm1549_vm8, %v3320_v58, %v2772_v36  ;;  %v3289_v48 = vsel %vm1483_vm6, %v3257_v23, %v9003_v38  ;;  %v9013_v58 = vld [vmem:[#allocation126_spill] sm:$0xff] }
 0x4d4   : > { %2988 = vrot.lane.b32.xlu0 %v7698_v37, %s4434_s12  ;;  %2691 = vrot.lane.b32.xlu1 %v7698_v37, %s4431_s9  ;;  %v3321_v50 = vsel %vm1516_vm7, %v3289_v48, %v9004_v16  ;;  %v9015_v59 = vld [vmem:[#allocation86_spill] sm:$0xff]  ;;  %v9017_v48 = vld [vmem:[#allocation172_spill] sm:$0xff] }
 0x4d5   : > { %v3260_v23 = vsel %vm279_vm0, %v4414_v14, %v9015_v59 }
 0x4d6   : > { %v3170_v40 = vpop.permute.xlu0 %3169  ;;  %v2873_v21 = vpop.permute.xlu1 %2872 }
 0x4d7   : > { %v3478_v39 = vsel %vm1681_vm12, %v3446_v35, %v3170_v40  ;;  %v3384_v25 = vsel %vm1582_vm9, %v3352_v56, %v2873_v21 }
 0x4d8   : > { %2990 = vrot.lane.b32.xlu0 %v7707_v46, %s4434_s12  ;;  %3090 = vrot.lane.b32.xlu1 %v8991_v57, %s4435_s23 }
 0x4d9   : > { %4291 = vmatmul.mubr.msk.f32.gmra.mrb[10].mxu1 %vm1714_vm13, %v3478_v39 }
 0x4da   : > { %v2969_v29 = vpop.permute.xlu0 %2968  ;;  %v2971_v63 = vpop.permute.xlu1 %2970 }
 0x4db   : > { %v3415_v31 = vsel %vm1615_vm10, %v3383_v13, %v2969_v29  ;;  %v3416_v1 = vsel %vm1615_vm10, %v3384_v25, %v2971_v63  ;;  %v9005_v29 = vld [vmem:[#allocation87_spill] sm:$0xff] }
 0x4dc   : > { %2693 = vrot.lane.b32.xlu0 %v7707_v46, %s4431_s9  ;;  %2793 = vrot.lane.b32.xlu1 %v8991_v57, %s4432_s10  ;;  %v4410_v57 = vld [vmem:[#allocation2 + $0xb0] sm:$0xff] }
 0x4dd   : > { %v3258_v63 = vsel %vm279_vm0, %v4410_v57, %v9005_v29 }
 0x4de   : > { %v3071_v53 = vpop.permute.xlu0 %3070  ;;  %v2774_v3 = vpop.permute.xlu1 %2773  ;;  %v3290_v52 = vsel %vm1483_vm6, %v3258_v63, %v9008_v11  ;;  %v2229_v11 = vld [vmem:[#allocation2 + $0x188] sm:$0xff] }
 0x4df   : > { %v3447_v6 = vsel %vm1648_vm11, %v3415_v31, %v3071_v53  ;;  %v3353_v26 = vsel %vm1549_vm8, %v3321_v50, %v2774_v3  ;;  %v3322_v45 = vsel %vm1516_vm7, %v3290_v52, %v9009_v51 }
 0x4e0   : > { %3092 = vrot.lane.b32.xlu0 %v8995_v49, %s4435_s23  ;;  %3191 = vrot.lane.b32.xlu1 %v8996_v62, %s4436_s27 }
 0x4e2   : > { %v3073_v27 = vpop.permute.xlu0 %3072  ;;  %v3172_v20 = vpop.permute.xlu1 %3171 }
 0x4e3   : > { %v3479_v7 = vsel %vm1681_vm12, %v3447_v6, %v3172_v20  ;;  %v3448_v42 = vsel %vm1648_vm11, %v3416_v1, %v3073_v27  ;;  %v9010_v27 = vld [vmem:[#allocation168_spill] sm:$0xff]  ;;  %v7820_v1 = vld [vmem:[#allocation2 + $0x170] sm:$0xff] }
 0x4e4   : > { %2795 = vrot.lane.b32.xlu0 %v8995_v49, %s4432_s10  ;;  %2894 = vrot.lane.b32.xlu1 %v8996_v62, %s4433_s11 }
 0x4e5   : > { %4293 = vmatprep.mubr.msk.f32.mxu1 %vm1714_vm13, %v3479_v7 }
 0x4e6   : > { %v2776_v0 = vpop.permute.xlu0 %2775  ;;  %v2875_v17 = vpop.permute.xlu1 %2874 }
 0x4e7   : > { %v3385_v61 = vsel %vm1582_vm9, %v3353_v26, %v2875_v17  ;;  %v3354_v3 = vsel %vm1549_vm8, %v3322_v45, %v2776_v0  ;;  %v3323_v0 = vsel %vm1516_vm7, %v3291_v43, %v9013_v58 }
 0x4e8   : > { %3193 = vrot.lane.b32.xlu0 %v9000_v19, %s4436_s27  ;;  %2896 = vrot.lane.b32.xlu1 %v9000_v19, %s4433_s11 }
 0x4ea   : > { %v3174_v12 = vpop.permute.xlu0 %3173  ;;  %v2877_v41 = vpop.permute.xlu1 %2876 }
 0x4eb   : > { %v3480_v22 = vsel %vm1681_vm12, %v3448_v42, %v3174_v12  ;;  %v3386_v8 = vsel %vm1582_vm9, %v3354_v3, %v2877_v41  ;;  %v9014_v42 = vld [vmem:[#allocation83_spill] sm:$0xff] }
 0x4ec   : > { %2992 = vrot.lane.b32.xlu0 %v7753_v2, %s4434_s12  ;;  %2695 = vrot.lane.b32.xlu1 %v7753_v2, %s4431_s9  ;;  %v9021_v3 = vld [vmem:[#allocation151_spill] sm:$0xff] }
 0x4ed   : > { %4294 = vmatmul.mubr.msk.f32.gmra.mrb[12].mxu1 %vm1714_vm13, %v3480_v22 }
 0x4ee   : > { %v2973_v28 = vpop.permute.xlu0 %2972  ;;  %v2975_v54 = vpop.permute.xlu1 %2974 }
 0x4ef   : > { %v3417_v34 = vsel %vm1615_vm10, %v3385_v61, %v2973_v28  ;;  %v3418_v13 = vsel %vm1615_vm10, %v3386_v8, %v2975_v54  ;;  %v9018_v61 = vld [vmem:[#allocation166_spill] sm:$0xff] }
 0x4f0   : > { %2994 = vrot.lane.b32.xlu0 %v7762_v10, %s4434_s12  ;;  %3094 = vrot.lane.b32.xlu1 %v9002_v15, %s4435_s23 }
 0x4f2   : > { %v3075_v36 = vpop.permute.xlu0 %3074  ;;  %v2778_v55 = vpop.permute.xlu1 %2777 }
 0x4f3   : > { %v3449_v35 = vsel %vm1648_vm11, %v3417_v34, %v3075_v36  ;;  %v3355_v25 = vsel %vm1549_vm8, %v3323_v0, %v2778_v55  ;;  %v9019_v34 = vld [vmem:[#allocation84_spill] sm:$0xff] }
 0x4f4   : > { %2697 = vrot.lane.b32.xlu0 %v7762_v10, %s4431_s9  ;;  %2797 = vrot.lane.b32.xlu1 %v9002_v15, %s4432_s10  ;;  %v9016_v15 = vld [vmem:[#allocation154_spill] sm:$0xff] }
 0x4f5   : > { %v3292_v38 = vsel %vm1483_vm6, %v3260_v23, %v9016_v15 }
 0x4f6   : > { %v3077_v40 = vpop.permute.xlu0 %3076  ;;  %v3176_v21 = vpop.permute.xlu1 %3175  ;;  %v3324_v16 = vsel %vm1516_vm7, %v3292_v38, %v9017_v48 }
 0x4f7   : > { %v3481_v39 = vsel %vm1681_vm12, %v3449_v35, %v3176_v21  ;;  %v3450_v49 = vsel %vm1648_vm11, %v3418_v13, %v3077_v40  ;;  %v9022_v13 = vld [vmem:[#allocation45_spill] sm:$0xff] }
 0x4f8   : > { %3096 = vrot.lane.b32.xlu0 %v9006_v60, %s4435_s23  ;;  %3195 = vrot.lane.b32.xlu1 %v9007_v33, %s4436_s27 }
 0x4f9   : > { %4296 = vmatprep.mubr.msk.f32.mxu1 %vm1714_vm13, %v3481_v39 }
 0x4fa   : > { %v2780_v4 = vpop.permute.xlu0 %2779  ;;  %v2879_v53 = vpop.permute.xlu1 %2878 }
 0x4fb   : > { %v3387_v19 = vsel %vm1582_vm9, %v3355_v25, %v2879_v53  ;;  %v3356_v55 = vsel %vm1549_vm8, %v3324_v16, %v2780_v4  ;;  %v2741_v4 = vrot.slane %v2229_v11, 1  ;;  %v4415_v53 = vld [vmem:[#allocation2 + $0xd8] sm:$0xff] }
 0x4fc   : > { %2799 = vrot.lane.b32.xlu0 %v9006_v60, %s4432_s10  ;;  %2898 = vrot.lane.b32.xlu1 %v9007_v33, %s4433_s11  ;;  %v9020_v60 = vld [vmem:[#allocation117_spill] sm:$0xff]  ;;  %v3261_v8 = vsel %vm279_vm0, %v4415_v53, %v9021_v3  ;;  %v9028_v53 = vld [vmem:[#allocation46_spill] sm:$0xff] }
 0x4fd   : > { %v2228_v33 = vld [vmem:[#allocation2 + $0x180] sm:$0xff] }
 0x4fe   : > { %v3178_v62 = vpop.permute.xlu0 %3177  ;;  %v2881_v31 = vpop.permute.xlu1 %2880  ;;  %v2740_v45 = vrot.slane %v2228_v33, 1  ;;  %v2841_v0 = vrot.slane %v2228_v33, 2 }
 0x4ff   : > { %v3482_v6 = vsel %vm1681_vm12, %v3450_v49, %v3178_v62  ;;  %v3388_v26 = vsel %vm1582_vm9, %v3356_v55, %v2881_v31  ;;  %v3293_v49 = vsel %vm1483_vm6, %v3261_v8, %v9022_v13  ;;  %v9023_v62 = vld [vmem:[#allocation156_spill] sm:$0xff] }
 0x500   : > { %3197 = vrot.lane.b32.xlu0 %v9010_v27, %s4436_s27  ;;  %2900 = vrot.lane.b32.xlu1 %v9010_v27, %s4433_s11  ;;  %v3325_v31 = vsel %vm1516_vm7, %v3293_v49, %v9023_v62 }
 0x501   : > { %4297 = vmatmul.mubr.msk.f32.gmra.mrb[14].mxu1 %vm1714_vm13, %v3482_v6 }
 0x502   : > { %v2977_v20 = vpop.permute.xlu0 %2976  ;;  %v2979_v7 = vpop.permute.xlu1 %2978 }
 0x503   : > { %v3419_v12 = vsel %vm1615_vm10, %v3387_v19, %v2977_v20  ;;  %v3420_v35 = vsel %vm1615_vm10, %v3388_v26, %v2979_v7  ;;  %v2742_v7 = vsel %vm495_vm3, %v2740_v45, %v2741_v4  ;;  %v4416_v19 = vld [vmem:[#allocation2 + $0xe0] sm:$0xff]  ;;  %v9027_v45 = vld [vmem:[#allocation150_spill] sm:$0xff] }
 0x504   : > { %2996 = vrot.lane.b32.xlu0 %v7808_v44, %s4434_s12  ;;  %2699 = vrot.lane.b32.xlu1 %v7808_v44, %s4431_s9 }
 0x506   : > { %v3079_v17 = vpop.permute.xlu0 %3078  ;;  %v2782_v56 = vpop.permute.xlu1 %2781 }
 0x507   : > { %v3451_v41 = vsel %vm1648_vm11, %v3419_v12, %v3079_v17  ;;  %v3357_v20 = vsel %vm1549_vm8, %v3325_v31, %v2782_v56  ;;  %v2842_v17 = vrot.slane %v2229_v11, 2  ;;  %v2743_v56 = vrot.slane %v2230_v9, 1 }
 0x508   : > { %2998 = vrot.lane.b32.xlu0 %v7820_v1, %s4434_s12  ;;  %3098 = vrot.lane.b32.xlu1 %v9014_v42, %s4435_s23 }
 0x509   : > { %v2744_v15 = vsel %vm495_vm3, %v2741_v4, %v2743_v56  ;;  %v2843_v38 = vsel %vm672_vm4, %v2841_v0, %v2842_v17  ;;  %v4418_v56 = vld [vmem:[#allocation2 + $0xf8] sm:$0xff] }
 0x50a   : > { %v3081_v22 = vpop.permute.xlu0 %3080  ;;  %v3180_v28 = vpop.permute.xlu1 %3179 }
 0x50b   : > { %v3483_v54 = vsel %vm1681_vm12, %v3451_v41, %v3180_v28  ;;  %v3452_v40 = vsel %vm1648_vm11, %v3420_v35, %v3081_v22  ;;  %v9025_v41 = vld [vmem:[#allocation31_spill] sm:$0xff]  ;;  %v9026_v28 = vld [vmem:[#allocation184_spill] sm:$0xff] }
 0x50c   : > { %2701 = vrot.lane.b32.xlu0 %v7820_v1, %s4431_s9  ;;  %2801 = vrot.lane.b32.xlu1 %v9014_v42, %s4432_s10  ;;  %v9024_v42 = vld [vmem:[#allocation118_spill] sm:$0xff] }
 0x50d   : > { %4299 = vmatprep.mubr.msk.f32.mxu1 %vm1714_vm13, %v3483_v54  ;;  %v3262_v12 = vsel %vm279_vm0, %v4416_v19, %v9024_v42  ;;  %v9030_v42 = vld [vmem:[#allocation95_spill] sm:$0xff] }
 0x50e   : > { %v2784_v50 = vpop.permute.xlu0 %2783  ;;  %v2883_v36 = vpop.permute.xlu1 %2882  ;;  %v3294_v22 = vsel %vm1483_vm6, %v3262_v12, %v9025_v41 }
 0x50f   : > { %v3389_v24 = vsel %vm1582_vm9, %v3357_v20, %v2883_v36  ;;  %v3326_v54 = vsel %vm1516_vm7, %v3294_v22, %v9026_v28 }
 0x510   : > { %3100 = vrot.lane.b32.xlu0 %v9018_v61, %s4435_s23  ;;  %3199 = vrot.lane.b32.xlu1 %v9019_v34, %s4436_s27  ;;  %v3358_v23 = vsel %vm1549_vm8, %v3326_v54, %v2784_v50 }
 0x512   : > { %v3182_v21 = vpop.permute.xlu0 %3181  ;;  %v2885_v39 = vpop.permute.xlu1 %2884 }
 0x513   : > { %v3484_v57 = vsel %vm1681_vm12, %v3452_v40, %v3182_v21  ;;  %v3390_v48 = vsel %vm1582_vm9, %v3358_v23, %v2885_v39  ;;  %v2231_v40 = vld [vmem:[#allocation2 + $0x198] sm:$0xff]  ;;  %v2232_v21 = vld [vmem:[#allocation2 + $0x1a0] sm:$0xff]  ;;  %v2233_v39 = vld [vmem:[#allocation2 + $0x1a8] sm:$0x3] }
 0x514   : > { %2803 = vrot.lane.b32.xlu0 %v9018_v61, %s4432_s10  ;;  %2902 = vrot.lane.b32.xlu1 %v9019_v34, %s4433_s11  ;;  %v2844_v34 = vrot.slane %v2230_v9, 2  ;;  %v3142_v8 = vrot.slane %v2231_v40, 2  ;;  %v3143_v13 = vrot.slane %v2232_v21, 2  ;;  %v3145_v31 = vrot.slane %v2233_v39, 2 }
 0x515   : > { %4300 = vmatmul.mubr.msk.f32.gmra.mrb[16].mxu1 %vm1714_vm13, %v3484_v57 }
 0x516   : > { %v2981_v29 = vpop.permute.xlu0 %2980  ;;  %v7854_v63 = vpop.permute.xlu1 %2683  ;;  %v2845_v57 = vsel %vm672_vm4, %v2842_v17, %v2844_v34 }
 0x517   : > { %v3421_v18 = vsel %vm1615_vm10, %v3389_v24, %v2981_v29  ;;  %v3041_v29 = vrot.slane %v2231_v40, 1 }
 0x518   : > { %3201 = vrot.lane.b32.xlu0 %v9020_v60, %s4436_s27  ;;  %2904 = vrot.lane.b32.xlu1 %v9020_v60, %s4433_s11  ;;  %v3042_v60 = vrot.slane %v2232_v21, 1 }
 0x51a   : > { %v2983_v52 = vpop.permute.xlu0 %2982  ;;  %v3083_v51 = vpop.permute.xlu1 %3082  ;;  %v3043_v49 = vsel %vm495_vm3, %v3041_v29, %v3042_v60  ;;  %v9031_v29 = vld [vmem:[#allocation25_spill] sm:$0xff] }
 0x51b   : > { %v3453_v5 = vsel %vm1648_vm11, %v3421_v18, %v3083_v51  ;;  %v3422_v16 = vsel %vm1615_vm10, %v3390_v48, %v2983_v52  ;;  %v4417_v51 = vld [vmem:[#allocation2 + $0xf0] sm:$0xff] }
 0x51c   : > { %3000 = vrot.lane.b32.xlu0 %v2228_v33, %s4434_s12  ;;  %2703 = vrot.lane.b32.xlu1 %v2228_v33, %s4431_s9  ;;  %v3044_v33 = vrot.slane %v2233_v39, 1  ;;  %v3263_v4 = vsel %vm279_vm0, %v4417_v51, %v9027_v45 }
 0x51d   : > { %v3295_v3 = vsel %vm1483_vm6, %v3263_v4, %v9028_v53 }
 0x51e   : > { %v7868_v6 = vpop.permute.xlu0 %2685  ;;  %v7870_v27 = vpop.permute.xlu1 %2785  ;;  %v3045_v62 = vsel %vm495_vm3, %v3042_v60, %v3044_v33  ;;  %v3327_v20 = vsel %vm1516_vm7, %v3295_v3, %v7854_v63 }
 0x51f   : > { %v3359_v9 = vsel %vm1549_vm8, %v3327_v20, %v7870_v27  ;;  %v9029_v27 = vld [vmem:[#allocation89_spill] sm:$0xff] }
 0x520   : > { %3002 = vrot.lane.b32.xlu0 %v2229_v11, %s4434_s12  ;;  %3102 = vrot.lane.b32.xlu1 %v2742_v7, %s4435_s23  ;;  %v3264_v19 = vsel %vm279_vm0, %v4418_v56, %v9029_v27 }
 0x521   : > { %v3296_v12 = vsel %vm1483_vm6, %v3264_v19, %v9030_v42 }
 0x522   : > { %v3085_v43 = vpop.permute.xlu0 %3084  ;;  %v3184_v58 = vpop.permute.xlu1 %3183  ;;  %v3328_v41 = vsel %vm1516_vm7, %v3296_v12, %v7868_v6  ;;  %v7951_v6 = vld [vmem:[%s8255_s5] ss:$0 sm:$0xff] }
 0x523   : > { %v3485_v25 = vsel %vm1681_vm12, %v3453_v5, %v3184_v58  ;;  %v3454_v36 = vsel %vm1648_vm11, %v3422_v16, %v3085_v43  ;;  %v3144_v43 = vsel %vm672_vm4, %v3142_v8, %v3143_v13  ;;  %v3146_v58 = vsel %vm672_vm4, %v3143_v13, %v3145_v31  ;;  %v9033_v13 = vld [vmem:[#allocation4_spill] sm:$0xff]  ;;  %v9034_v31 = vld [vmem:[#allocation3_spill] sm:$0xff] }
 0x524   : > { %2705 = vrot.lane.b32.xlu0 %v2229_v11, %s4431_s9  ;;  %2805 = vrot.lane.b32.xlu1 %v2742_v7, %s4432_s10 }
 0x525   : > { %4302 = vmatprep.mubr.msk.f32.mxu1 %vm1714_vm13, %v3485_v25 }
 0x526   : > { %v7889_v14 = vpop.permute.xlu0 %2787  ;;  %v2887_v59 = vpop.permute.xlu1 %2886 }
 0x527   : > { %v3391_v18 = vsel %vm1582_vm9, %v3359_v9, %v2887_v59  ;;  %v3360_v54 = vsel %vm1549_vm8, %v3328_v41, %v7889_v14  ;;  %v7956_v14 = vld [vmem:[%s8256_s6] ss:$0 sm:$0xff] }
 0x528   : > { %3104 = vrot.lane.b32.xlu0 %v2744_v15, %s4435_s23  ;;  %3203 = vrot.lane.b32.xlu1 %v2843_v38, %s4436_s27 }
 0x52a   : > { %v3186_v55 = vpop.permute.xlu0 %3185  ;;  %v2889_v26 = vpop.permute.xlu1 %2888 }
 0x52b   : > { %v3486_v61 = vsel %vm1681_vm12, %v3454_v36, %v3186_v55  ;;  %v3392_v59 = vsel %vm1582_vm9, %v3360_v54, %v2889_v26 }
 0x52c   : > { %2807 = vrot.lane.b32.xlu0 %v2744_v15, %s4432_s10  ;;  %2906 = vrot.lane.b32.xlu1 %v2843_v38, %s4433_s11 }
 0x52d   : > { %4303 = vmatmul.mubr.msk.f32.gmra.mrb[18].mxu1 %vm1714_vm13, %v3486_v61 }
 0x52e   : > { %v2985_v50 = vpop.permute.xlu0 %2984  ;;  %v7903_v35 = vpop.permute.xlu1 %2687 }
 0x52f   : > { %v3423_v5 = vsel %vm1615_vm10, %v3391_v18, %v2985_v50 }
 0x530   : > { %3205 = vrot.lane.b32.xlu0 %v2845_v57, %s4436_s27  ;;  %2908 = vrot.lane.b32.xlu1 %v2845_v57, %s4433_s11  ;;  %v4419_v57 = vld [vmem:[#allocation2 + $0x108] sm:$0xff] }
 0x531   : > { %v3265_v60 = vsel %vm279_vm0, %v4419_v57, %v9031_v29  ;;  %v9040_v29 = vld [vmem:[#allocation65_spill] sm:$0xff] }
 0x532   : > { %v2987_v11 = vpop.permute.xlu0 %2986  ;;  %v3087_v52 = vpop.permute.xlu1 %3086 }
 0x533   : > { %v3455_v63 = vsel %vm1648_vm11, %v3423_v5, %v3087_v52  ;;  %v3424_v23 = vsel %vm1615_vm10, %v3392_v59, %v2987_v11  ;;  %v9032_v11 = vld [vmem:[#allocation125_spill] sm:$0xff] }
 0x534   : > { %3004 = vrot.lane.b32.xlu0 %v2231_v40, %s4434_s12  ;;  %3006 = vrot.lane.b32.xlu1 %v2232_v21, %s4434_s12  ;;  %v3297_v52 = vsel %vm1483_vm6, %v3265_v60, %v9032_v11 }
 0x535   : > { %v3329_v45 = vsel %vm1516_vm7, %v3297_v52, %v7903_v35 }
 0x536   : > { %v7918_v7 = vpop.permute.xlu0 %2689  ;;  %v2790_v24 = vpop.permute.xlu1 %2789 }
 0x537   : > { %v3361_v8 = vsel %vm1549_vm8, %v3329_v45, %v2790_v24 }
 0x538   : > { %3106 = vrot.lane.b32.xlu0 %v3043_v49, %s4435_s23  ;;  %3108 = vrot.lane.b32.xlu1 %v3045_v62, %s4435_s23 }
 0x53a   : > { %v3089_v0 = vpop.permute.xlu0 %3088  ;;  %v3188_v17 = vpop.permute.xlu1 %3187 }
 0x53b   : > { %v3487_v25 = vsel %vm1681_vm12, %v3455_v63, %v3188_v17  ;;  %v3456_v15 = vsel %vm1648_vm11, %v3424_v23, %v3089_v0  ;;  %v9036_v63 = vld [vmem:[#allocation94_spill] sm:$0xff] }
 0x53c   : > { %3207 = vrot.lane.b32.xlu0 %v3144_v43, %s4436_s27  ;;  %3209 = vrot.lane.b32.xlu1 %v3146_v58, %s4436_s27  ;;  %v9035_v58 = vld [vmem:[#allocation88_spill] sm:$0xff] }
 0x53d   : > { %4305 = vmatprep.mubr.msk.f32.mxu1 %vm1714_vm13, %v3487_v25  ;;  %v3266_v24 = vsel %vm279_vm0, %v7593_v30, %v9035_v58 }
 0x53e   : > { %v2792_v22 = vpop.permute.xlu0 %2791  ;;  %v2891_v28 = vpop.permute.xlu1 %2890  ;;  %v3298_v0 = vsel %vm1483_vm6, %v3266_v24, %v9036_v63 }
 0x53f   : > { %v3393_v62 = vsel %vm1582_vm9, %v3361_v8, %v2891_v28  ;;  %v3330_v17 = vsel %vm1516_vm7, %v3298_v0, %v7918_v7 }
 0x540   : > { %v3362_v27 = vsel %vm1549_vm8, %v3330_v17, %v2792_v22 }
 0x542   : > { %v3190_v38 = vpop.permute.xlu0 %3189  ;;  %v2893_v48 = vpop.permute.xlu1 %2892 }
 0x543   : > { %v3488_v16 = vsel %vm1681_vm12, %v3456_v15, %v3190_v38  ;;  %v3394_v19 = vsel %vm1582_vm9, %v3362_v27, %v2893_v48 }
 0x544   : > { %4306 = vmatmul.mubr.msk.f32.gmra.mrb[20].mxu1 %vm1714_vm13, %v3488_v16 }
 0x546   : > { %v2989_v36 = vpop.permute.xlu0 %2988  ;;  %v7946_v55 = vpop.permute.xlu1 %2691 }
 0x547   : > { %v3425_v35 = vsel %vm1615_vm10, %v3393_v62, %v2989_v36  ;;  %v9041_v62 = vld [vmem:[#allocation119_spill] sm:$0xff] }
 0x548   : > { %v4277_v26 = vpop.f32.mrb[0].mxu1 }
 0x549   : > { %v3830_v61 = vmul.f32 %v4277_v26, %v7951_v6  ;;  %v3664_v34 = vpop.f32.mrb[1].mxu1 }
 0x54a   : > { %v3829_v50 = vmul.f32 %v7951_v6, %v3664_v34  ;;  %v2991_v40 = vpop.permute.xlu0 %2990  ;;  %v3091_v21 = vpop.permute.xlu1 %3090  ;;  %v9037_v34 = vld [vmem:[#allocation6_spill] sm:$0xff] }
 0x54b   : > { %v3868_v39 = vadd.f32 %v7956_v14, %v3830_v61  ;;  %v3457_v9 = vsel %vm1648_vm11, %v3425_v35, %v3091_v21  ;;  %v3426_v42 = vsel %vm1615_vm10, %v3394_v19, %v2991_v40  ;;  %v9038_v40 = vld [vmem:[#allocation62_spill] sm:$0xff] }
 0x54c   : > { %v3867_v33 = vadd.f32 %v7956_v14, %v3829_v50  ;;  %v3267_v21 = vsel %vm279_vm0, %v7639_v32, %v9038_v40 }
 0x54d   : > { %v3900_v51 = vmax.f32 %v3868_v39, 0.0  ;;  %v9039_v39 = vld [vmem:[#allocation5_spill] sm:$0xff]  ;;  %v3299_v60 = vsel %vm1483_vm6, %v3267_v21, %v9040_v29 }
 0x54e   : > { %v3899_v4 = vmax.f32 %v3867_v33, 0.0  ;;  %v2694_v53 = vpop.permute.xlu0 %2693  ;;  %v2794_v3 = vpop.permute.xlu1 %2793  ;;  %v3331_v33 = vsel %vm1516_vm7, %v3299_v60, %v7946_v55  ;;  %v3268_v55 = vsel %vm279_vm0, %v7652_v47, %v9041_v62 }
 0x54f   : > { %v3932_v49 = vadd.f32 %v3900_v51, %v9033_v13  ;;  %v3363_v51 = vsel %vm1549_vm8, %v3331_v33, %v2794_v3 }
 0x550   : > { %v3931_v20 = vadd.f32 %v3899_v4, %v9034_v31  ;;  %v9042_v31 = vld [vmem:[#allocation124_spill] sm:$0xff] }
 0x551   : > { %3964 = vst.msk [vmem:[%s7973_s28 + $0x8] sm:$0xff] %vm279_vm0, %v3932_v49 }
 0x552   : > { %3963 = vst.msk [vmem:[%s7973_s28] sm:$0xff] %vm279_vm0, %v3931_v20  ;;  %v3093_v18 = vpop.permute.xlu0 %3092  ;;  %v3192_v5 = vpop.permute.xlu1 %3191  ;;  %v3300_v20 = vsel %vm1483_vm6, %v3268_v55, %v9042_v31 }
 0x553   : > { %v3489_v43 = vsel %vm1681_vm12, %v3457_v9, %v3192_v5  ;;  %v3458_v12 = vsel %vm1648_vm11, %v3426_v42, %v3093_v18  ;;  %v3332_v3 = vsel %vm1516_vm7, %v3300_v20, %v2694_v53 }
 0x554   : > { %4308 = vmatprep.mubr.msk.f32.mxu1 %vm1714_vm13, %v3489_v43 }
 0x556   : > { %v2796_v25 = vpop.permute.xlu0 %2795  ;;  %v2895_v56 = vpop.permute.xlu1 %2894 }
 0x557   : > { %v3395_v45 = vsel %vm1582_vm9, %v3363_v51, %v2895_v56  ;;  %v3364_v18 = vsel %vm1549_vm8, %v3332_v3, %v2796_v25 }
 0x55a   : > { %v3194_v41 = vpop.permute.xlu0 %3193  ;;  %v2897_v30 = vpop.permute.xlu1 %2896 }
 0x55b   : > { %v3490_v28 = vsel %vm1681_vm12, %v3458_v12, %v3194_v41  ;;  %v3396_v5 = vsel %vm1582_vm9, %v3364_v18, %v2897_v30  ;;  %v9043_v30 = vld [vmem:[#allocation8_spill] sm:$0xff] }
 0x55c   : > { %v4280_v54 = vpop.f32.mrb[2].mxu1  ;;  %4309 = vmatmul.mubr.msk.f32.gmra.mrb[22].mxu1 %vm1714_vm13, %v3490_v28 }
 0x55d   : > { %v3832_v7 = vmul.f32 %v4280_v54, %v7951_v6  ;;  %v3674_v59 = vpop.f32.mrb[3].mxu1  ;;  %v9044_v54 = vld [vmem:[#allocation7_spill] sm:$0xff] }
 0x55e   : > { %v3831_v22 = vmul.f32 %v7951_v6, %v3674_v59  ;;  %v2993_v23 = vpop.permute.xlu0 %2992  ;;  %v2696_v15 = vpop.permute.xlu1 %2695 }
 0x55f   : > { %v3870_v38 = vadd.f32 %v7956_v14, %v3832_v7  ;;  %v3427_v32 = vsel %vm1615_vm10, %v3395_v45, %v2993_v23  ;;  %v9045_v23 = vld [vmem:[#allocation152_spill] sm:$0xff] }
 0x560   : > { %v3869_v48 = vadd.f32 %v7956_v14, %v3831_v22 }
 0x561   : > { %v3902_v16 = vmax.f32 %v3870_v38, 0.0  ;;  %v3269_v38 = vsel %vm279_vm0, %v7698_v37, %v9045_v23  ;;  %v9047_v37 = vld [vmem:[#allocation91_spill] sm:$0xff] }
 0x562   : > { %v3901_v36 = vmax.f32 %v3869_v48, 0.0  ;;  %v2995_v26 = vpop.permute.xlu0 %2994  ;;  %v3095_v61 = vpop.permute.xlu1 %3094  ;;  %v9046_v48 = vld [vmem:[#allocation170_spill] sm:$0xff]  ;;  %v3270_v60 = vsel %vm279_vm0, %v7707_v46, %v9047_v37 }
 0x563   : > { %v3934_v50 = vadd.f32 %v3902_v16, %v9037_v34  ;;  %v3459_v4 = vsel %vm1648_vm11, %v3427_v32, %v3095_v61  ;;  %v3428_v58 = vsel %vm1615_vm10, %v3396_v5, %v2995_v26  ;;  %v3301_v16 = vsel %vm1483_vm6, %v3269_v38, %v9046_v48  ;;  %v9049_v5 = vld [vmem:[#allocation10_spill] sm:$0xff] }
 0x564   : > { %v3933_v57 = vadd.f32 %v3901_v36, %v9039_v39  ;;  %v3333_v36 = vsel %vm1516_vm7, %v3301_v16, %v2696_v15  ;;  %v9048_v15 = vld [vmem:[#allocation155_spill] sm:$0xff] }
 0x565   : > { %3966 = vst.msk [vmem:[%s7973_s28 + $0x18] sm:$0xff] %vm279_vm0, %v3934_v50 }
 0x566   : > { %3965 = vst.msk [vmem:[%s7973_s28 + $0x10] sm:$0xff] %vm279_vm0, %v3933_v57  ;;  %v2698_v11 = vpop.permute.xlu0 %2697  ;;  %v2798_v52 = vpop.permute.xlu1 %2797 }
 0x567   : > { %v3365_v34 = vsel %vm1549_vm8, %v3333_v36, %v2798_v52  ;;  %v3302_v52 = vsel %vm1483_vm6, %v3270_v60, %v9048_v15  ;;  %v9053_v36 = vld [vmem:[#allocation90_spill] sm:$0xff] }
 0x568   : > { %v3334_v32 = vsel %vm1516_vm7, %v3302_v52, %v2698_v11 }
 0x56a   : > { %v3097_v8 = vpop.permute.xlu0 %3096  ;;  %v3196_v13 = vpop.permute.xlu1 %3195 }
 0x56b   : > { %v3491_v49 = vsel %vm1681_vm12, %v3459_v4, %v3196_v13  ;;  %v3460_v63 = vsel %vm1648_vm11, %v3428_v58, %v3097_v8 }
 0x56c   : > { %4311 = vmatprep.mubr.msk.f32.mxu1 %vm1714_vm13, %v3491_v49 }
 0x56e   : > { %v2800_v35 = vpop.permute.xlu0 %2799  ;;  %v2899_v9 = vpop.permute.xlu1 %2898 }
 0x56f   : > { %v3397_v50 = vsel %vm1582_vm9, %v3365_v34, %v2899_v9  ;;  %v3366_v49 = vsel %vm1549_vm8, %v3334_v32, %v2800_v35 }
 0x570   : > { %v4283_v43 = vpop.f32.mrb[4].mxu1 }
 0x571   : > { %v3834_v24 = vmul.f32 %v4283_v43, %v7951_v6  ;;  %v3684_v47 = vpop.f32.mrb[5].mxu1 }
 0x572   : > { %v3833_v0 = vmul.f32 %v7951_v6, %v3684_v47  ;;  %v3198_v17 = vpop.permute.xlu0 %3197  ;;  %v2901_v53 = vpop.permute.xlu1 %2900 }
 0x573   : > { %v3872_v56 = vadd.f32 %v7956_v14, %v3834_v24  ;;  %v3492_v25 = vsel %vm1681_vm12, %v3460_v63, %v3198_v17  ;;  %v3398_v62 = vsel %vm1582_vm9, %v3366_v49, %v2901_v53  ;;  %v9050_v24 = vld [vmem:[#allocation9_spill] sm:$0xff] }
 0x574   : > { %v3871_v27 = vadd.f32 %v7956_v14, %v3833_v0  ;;  %4312 = vmatmul.mubr.msk.f32.gmra.mrb[24].mxu1 %vm1714_vm13, %v3492_v25  ;;  %v9051_v53 = vld [vmem:[#allocation121_spill] sm:$0xff]  ;;  %v9052_v25 = vld [vmem:[#allocation38_spill] sm:$0xff] }
 0x575   : > { %v3904_v19 = vmax.f32 %v3872_v56, 0.0  ;;  %v3271_v56 = vsel %vm279_vm0, %v7753_v2, %v9051_v53 }
 0x576   : > { %v3903_v42 = vmax.f32 %v3871_v27, 0.0  ;;  %v2997_v12 = vpop.permute.xlu0 %2996  ;;  %v2700_v41 = vpop.permute.xlu1 %2699  ;;  %v3303_v27 = vsel %vm1483_vm6, %v3271_v56, %v9052_v25 }
 0x577   : > { %v3936_v28 = vadd.f32 %v3904_v19, %v9043_v30  ;;  %v3429_v40 = vsel %vm1615_vm10, %v3397_v50, %v2997_v12  ;;  %v3335_v19 = vsel %vm1516_vm7, %v3303_v27, %v2700_v41  ;;  %v9054_v50 = vld [vmem:[#allocation169_spill] sm:$0xff] }
 0x578   : > { %v3935_v7 = vadd.f32 %v3903_v42, %v9044_v54 }
 0x579   : > { %3968 = vst.msk [vmem:[%s7973_s28 + $0x28] sm:$0xff] %vm279_vm0, %v3936_v28 }
 0x57a   : > { %3967 = vst.msk [vmem:[%s7973_s28 + $0x20] sm:$0xff] %vm279_vm0, %v3935_v7  ;;  %v2999_v59 = vpop.permute.xlu0 %2998  ;;  %v3099_v22 = vpop.permute.xlu1 %3098 }
 0x57b   : > { %v3461_v21 = vsel %vm1648_vm11, %v3429_v40, %v3099_v22  ;;  %v3430_v31 = vsel %vm1615_vm10, %v3398_v62, %v2999_v59 }
 0x57e   : > { %v2702_v26 = vpop.permute.xlu0 %2701  ;;  %v2802_v61 = vpop.permute.xlu1 %2801 }
 0x57f   : > { %v3367_v30 = vsel %vm1549_vm8, %v3335_v19, %v2802_v61  ;;  %v3272_v61 = vsel %vm279_vm0, %v7762_v10, %v9053_v36  ;;  %v9056_v10 = vld [vmem:[#allocation11_spill] sm:$0xff] }
 0x580   : > { %v3304_v40 = vsel %vm1483_vm6, %v3272_v61, %v9054_v50 }
 0x582   : > { %v3101_v39 = vpop.permute.xlu0 %3100  ;;  %v3200_v57 = vpop.permute.xlu1 %3199 }
 0x583   : > { %v3493_v29 = vsel %vm1681_vm12, %v3461_v21, %v3200_v57  ;;  %v3462_v3 = vsel %vm1648_vm11, %v3430_v31, %v3101_v39  ;;  %v3336_v39 = vsel %vm1516_vm7, %v3304_v40, %v2702_v26 }
 0x584   : > { %v4286_v33 = vpop.f32.mrb[6].mxu1  ;;  %4314 = vmatprep.mubr.msk.f32.mxu1 %vm1714_vm13, %v3493_v29 }
 0x585   : > { %v3836_v51 = vmul.f32 %v4286_v33, %v7951_v6  ;;  %v3694_v45 = vpop.f32.mrb[7].mxu1  ;;  %v9055_v33 = vld [vmem:[#allocation12_spill] sm:$0xff] }
 0x586   : > { %v3835_v4 = vmul.f32 %v7951_v6, %v3694_v45  ;;  %v2804_v8 = vpop.permute.xlu0 %2803  ;;  %v2903_v13 = vpop.permute.xlu1 %2902 }
 0x587   : > { %v3874_v46 = vadd.f32 %v7956_v14, %v3836_v51  ;;  %v3399_v28 = vsel %vm1582_vm9, %v3367_v30, %v2903_v13  ;;  %v3368_v60 = vsel %vm1549_vm8, %v3336_v39, %v2804_v8 }
 0x588   : > { %v3873_v55 = vadd.f32 %v7956_v14, %v3835_v4 }
 0x589   : > { %v3906_v20 = vmax.f32 %v3874_v46, 0.0  ;;  %v9057_v46 = vld [vmem:[#allocation63_spill] sm:$0xff] }
 0x58a   : > { %v3905_v11 = vmax.f32 %v3873_v55, 0.0  ;;  %v3202_v9 = vpop.permute.xlu0 %3201  ;;  %v2905_v18 = vpop.permute.xlu1 %2904  ;;  %v3273_v62 = vsel %vm279_vm0, %v7808_v44, %v9057_v46  ;;  %v9058_v55 = vld [vmem:[#allocation120_spill] sm:$0xff] }
 0x58b   : > { %v3938_v43 = vadd.f32 %v3906_v20, %v9049_v5  ;;  %v3494_v58 = vsel %vm1681_vm12, %v3462_v3, %v3202_v9  ;;  %v3400_v52 = vsel %vm1582_vm9, %v3368_v60, %v2905_v18  ;;  %v3274_v31 = vsel %vm279_vm0, %v7820_v1, %v9058_v55  ;;  %v9059_v20 = vld [vmem:[#allocation68_spill] sm:$0xff] }
 0x58c   : > { %v3937_v35 = vadd.f32 %v3905_v11, %v9050_v24  ;;  %4315 = vmatmul.mubr.msk.f32.gmra.mrb[26].mxu1 %vm1714_vm13, %v3494_v58  ;;  %v3305_v3 = vsel %vm1483_vm6, %v3273_v62, %v9059_v20  ;;  %v9060_v11 = vld [vmem:[#allocation27_spill] sm:$0xff] }
 0x58d   : > { %3970 = vst.msk [vmem:[%s7973_s28 + $0x38] sm:$0xff] %vm279_vm0, %v3938_v43  ;;  %v3306_v9 = vsel %vm1483_vm6, %v3274_v31, %v9060_v11  ;;  %v9067_v11 = vld [vmem:[#allocation20_spill] sm:$0xff] }
 0x58e   : > { %3969 = vst.msk [vmem:[%s7973_s28 + $0x30] sm:$0xff] %vm279_vm0, %v3937_v35  ;;  %v3001_v47 = vpop.permute.xlu0 %3000  ;;  %v2704_v63 = vpop.permute.xlu1 %2703 }
 0x58f   : > { %v3431_v7 = vsel %vm1615_vm10, %v3399_v28, %v3001_v47  ;;  %v3337_v18 = vsel %vm1516_vm7, %v3305_v3, %v2704_v63 }
 0x592   : > { %v3003_v0 = vpop.permute.xlu0 %3002  ;;  %v3103_v17 = vpop.permute.xlu1 %3102 }
 0x593   : > { %v3463_v23 = vsel %vm1648_vm11, %v3431_v7, %v3103_v17  ;;  %v3432_v45 = vsel %vm1615_vm10, %v3400_v52, %v3003_v0 }
 0x596   : > { %v2706_v42 = vpop.permute.xlu0 %2705  ;;  %v2806_v12 = vpop.permute.xlu1 %2805 }
 0x597   : > { %v3338_v5 = vsel %vm1516_vm7, %v3306_v9, %v2706_v42  ;;  %v3369_v24 = vsel %vm1549_vm8, %v3337_v18, %v2806_v12  ;;  %v9068_v18 = vld [vmem:[#allocation19_spill] sm:$0xff] }
 0x598   : > { %v4289_v54 = vpop.f32.mrb[8].mxu1 }
 0x599   : > { %v3838_v59 = vmul.f32 %v4289_v54, %v7951_v6  ;;  %v3704_v22 = vpop.f32.mrb[9].mxu1 }
 0x59a   : > { %v3837_v2 = vmul.f32 %v7951_v6, %v3704_v22  ;;  %v3105_v38 = vpop.permute.xlu0 %3104  ;;  %v3204_v48 = vpop.permute.xlu1 %3203  ;;  %v9061_v22 = vld [vmem:[#allocation14_spill] sm:$0xff] }
 0x59b   : > { %v3876_v41 = vadd.f32 %v7956_v14, %v3838_v59  ;;  %v3495_v16 = vsel %vm1681_vm12, %v3463_v23, %v3204_v48  ;;  %v3464_v32 = vsel %vm1648_vm11, %v3432_v45, %v3105_v38 }
 0x59c   : > { %v3875_v34 = vadd.f32 %v7956_v14, %v3837_v2  ;;  %4317 = vmatprep.mubr.msk.f32.mxu1 %vm1714_vm13, %v3495_v16  ;;  %v9062_v2 = vld [vmem:[#allocation13_spill] sm:$0xff] }
 0x59d   : > { %v3908_v21 = vmax.f32 %v3876_v41, 0.0 }
 0x59e   : > { %v3907_v57 = vmax.f32 %v3875_v34, 0.0  ;;  %v2808_v29 = vpop.permute.xlu0 %2807  ;;  %v2907_v37 = vpop.permute.xlu1 %2906 }
 0x59f   : > { %v3940_v15 = vadd.f32 %v3908_v21, %v9055_v33  ;;  %v3370_v44 = vsel %vm1549_vm8, %v3338_v5, %v2808_v29  ;;  %v3401_v35 = vsel %vm1582_vm9, %v3369_v24, %v2907_v37  ;;  %v9063_v21 = vld [vmem:[#allocation16_spill] sm:$0xff] }
 0x5a0   : > { %v3939_v51 = vadd.f32 %v3907_v57, %v9056_v10  ;;  %v9064_v57 = vld [vmem:[#allocation15_spill] sm:$0xff] }
 0x5a1   : > { %3972 = vst.msk [vmem:[%s7973_s28 + $0x48] sm:$0xff] %vm279_vm0, %v3940_v15 }
 0x5a2   : > { %3971 = vst.msk [vmem:[%s7973_s28 + $0x40] sm:$0xff] %vm279_vm0, %v3939_v51  ;;  %v3206_v26 = vpop.permute.xlu0 %3205  ;;  %v2909_v4 = vpop.permute.xlu1 %2908 }
 0x5a3   : > { %v3496_v13 = vsel %vm1681_vm12, %v3464_v32, %v3206_v26  ;;  %v3402_v1 = vsel %vm1582_vm9, %v3370_v44, %v2909_v4  ;;  %v9065_v32 = vld [vmem:[#allocation18_spill] sm:$0xff]  ;;  %v9066_v4 = vld [vmem:[#allocation17_spill] sm:$0xff] }
 0x5a4   : > { %4318 = vmatmul.mubr.msk.f32.gmra.mrb[28].mxu1 %vm1714_vm13, %v3496_v13 }
 0x5a6   : > { %v3005_v8 = vpop.permute.xlu0 %3004  ;;  %v3007_v49 = vpop.permute.xlu1 %3006 }
 0x5a7   : > { %v3433_v0 = vsel %vm1615_vm10, %v3401_v35, %v3005_v8  ;;  %v3434_v17 = vsel %vm1615_vm10, %v3402_v1, %v3007_v49 }
 0x5aa   : > { %v3107_v43 = vpop.permute.xlu0 %3106  ;;  %v3109_v58 = vpop.permute.xlu1 %3108 }
 0x5ab   : > { %v3465_v56 = vsel %vm1648_vm11, %v3433_v0, %v3107_v43  ;;  %v3466_v25 = vsel %vm1648_vm11, %v3434_v17, %v3109_v58  ;;  %v9069_v17 = vld [vmem:[#allocation22_spill] sm:$0xff] }
 0x5ac   : > { %v4292_v47 = vpop.f32.mrb[10].mxu1 }
 0x5ad   : > { %v3840_v53 = vmul.f32 %v4292_v47, %v7951_v6  ;;  %v3714_v63 = vpop.f32.mrb[11].mxu1 }
 0x5ae   : > { %v3839_v27 = vmul.f32 %v7951_v6, %v3714_v63  ;;  %v3208_v19 = vpop.permute.xlu0 %3207  ;;  %v3210_v42 = vpop.permute.xlu1 %3209  ;;  %v9070_v63 = vld [vmem:[#allocation21_spill] sm:$0xff] }
 0x5af   : > { %v3878_v12 = vadd.f32 %v7956_v14, %v3840_v53  ;;  %v3497_v30 = vsel %vm1681_vm12, %v3465_v56, %v3208_v19  ;;  %v3498_v28 = vsel %vm1681_vm12, %v3466_v25, %v3210_v42 }
 0x5b0   : > { %v3877_v54 = vadd.f32 %v7956_v14, %v3839_v27  ;;  %4320 = vmatprep.mubr.msk.f32.mxu1 %vm1714_vm13, %v3497_v30 }
 0x5b1   : > { %v3910_v7 = vmax.f32 %v3878_v12, 0.0  ;;  %4321 = vmatmul.mubr.msk.f32.gmra.mrb[30].mxu1 %vm1714_vm13, %v3498_v28 }
 0x5b2   : > { %v3909_v59 = vmax.f32 %v3877_v54, 0.0 }
 0x5b3   : > { %v3942_v23 = vadd.f32 %v3910_v7, %v9061_v22  ;;  %v9071_v7 = vld [vmem:[#allocation26_spill] sm:$0xff]  ;;  %v9072_v22 = vld [vmem:[#allocation23_spill] sm:$0xff] }
 0x5b4   : > { %v3941_v38 = vadd.f32 %v3909_v59, %v9062_v2 }
 0x5b5   : > { %3974 = vst.msk [vmem:[%s7973_s28 + $0x58] sm:$0xff] %vm279_vm0, %v3942_v23 }
 0x5b6   : > { %3973 = vst.msk [vmem:[%s7973_s28 + $0x50] sm:$0xff] %vm279_vm0, %v3941_v38 }
 0x5c0   : > { %v4295_v48 = vpop.f32.mrb[12].mxu1 }
 0x5c1   : > { %v3842_v41 = vmul.f32 %v4295_v48, %v7951_v6  ;;  %v3724_v16 = vpop.f32.mrb[13].mxu1 }
 0x5c2   : > { %v3841_v36 = vmul.f32 %v7951_v6, %v3724_v16 }
 0x5c3   : > { %v3880_v61 = vadd.f32 %v7956_v14, %v3842_v41 }
 0x5c4   : > { %v3879_v34 = vadd.f32 %v7956_v14, %v3841_v36 }
 0x5c5   : > { %v3912_v50 = vmax.f32 %v3880_v61, 0.0 }
 0x5c6   : > { %v3911_v40 = vmax.f32 %v3879_v34, 0.0 }
 0x5c7   : > { %v3944_v39 = vadd.f32 %v3912_v50, %v9063_v21  ;;  %v9073_v50 = vld [vmem:[#allocation29_spill] sm:$0xff]  ;;  %v9074_v21 = vld [vmem:[#allocation28_spill] sm:$0xff] }
 0x5c8   : > { %v3943_v29 = vadd.f32 %v3911_v40, %v9064_v57 }
 0x5c9   : > { %3976 = vst.msk [vmem:[%s7973_s28 + $0x68] sm:$0xff] %vm279_vm0, %v3944_v39 }
 0x5ca   : > { %3975 = vst.msk [vmem:[%s7973_s28 + $0x60] sm:$0xff] %vm279_vm0, %v3943_v29 }
 0x5d4   : > { %v4298_v37 = vpop.f32.mrb[14].mxu1 }
 0x5d5   : > { %v3844_v60 = vmul.f32 %v4298_v37, %v7951_v6  ;;  %v3734_v33 = vpop.f32.mrb[15].mxu1 }
 0x5d6   : > { %v3843_v15 = vmul.f32 %v7951_v6, %v3734_v33 }
 0x5d7   : > { %v3882_v52 = vadd.f32 %v7956_v14, %v3844_v60 }
 0x5d8   : > { %v3881_v10 = vadd.f32 %v7956_v14, %v3843_v15 }
 0x5d9   : > { %v3914_v51 = vmax.f32 %v3882_v52, 0.0 }
 0x5da   : > { %v3913_v45 = vmax.f32 %v3881_v10, 0.0 }
 0x5db   : > { %v3946_v26 = vadd.f32 %v3914_v51, %v9065_v32  ;;  %v9075_v51 = vld [vmem:[#allocation32_spill] sm:$0xff]  ;;  %v9076_v32 = vld [vmem:[#allocation30_spill] sm:$0xff] }
 0x5dc   : > { %v3945_v13 = vadd.f32 %v3913_v45, %v9066_v4 }
 0x5dd   : > { %3978 = vst.msk [vmem:[%s7973_s28 + $0x78] sm:$0xff] %vm279_vm0, %v3946_v26 }
 0x5de   : > { %3977 = vst.msk [vmem:[%s7973_s28 + $0x70] sm:$0xff] %vm279_vm0, %v3945_v13 }
 0x5e8   : > { %v4301_v8 = vpop.f32.mrb[16].mxu1 }
 0x5e9   : > { %v3846_v49 = vmul.f32 %v4301_v8, %v7951_v6  ;;  %v3744_v46 = vpop.f32.mrb[17].mxu1 }
 0x5ea   : > { %v3845_v62 = vmul.f32 %v7951_v6, %v3744_v46 }
 0x5eb   : > { %v3884_v55 = vadd.f32 %v7956_v14, %v3846_v49 }
 0x5ec   : > { %v3883_v31 = vadd.f32 %v7956_v14, %v3845_v62 }
 0x5ed   : > { %v3916_v20 = vmax.f32 %v3884_v55, 0.0 }
 0x5ee   : > { %v3915_v3 = vmax.f32 %v3883_v31, 0.0 }
 0x5ef   : > { %v3948_v9 = vadd.f32 %v3916_v20, %v9067_v11  ;;  %v9077_v20 = vld [vmem:[#allocation34_spill] sm:$0xff]  ;;  %v9078_v11 = vld [vmem:[#allocation33_spill] sm:$0xff] }
 0x5f0   : > { %v3947_v5 = vadd.f32 %v3915_v3, %v9068_v18 }
 0x5f1   : > { %3980 = vst.msk [vmem:[%s7973_s28 + $0x88] sm:$0xff] %vm279_vm0, %v3948_v9 }
 0x5f2   : > { %3979 = vst.msk [vmem:[%s7973_s28 + $0x80] sm:$0xff] %vm279_vm0, %v3947_v5 }
 0x600   : > { %v4304_v43 = vpop.f32.mrb[18].mxu1 }
 0x601   : > { %v3848_v58 = vmul.f32 %v4304_v43, %v7951_v6  ;;  %v3754_v24 = vpop.f32.mrb[19].mxu1 }
 0x602   : > { %v3847_v44 = vmul.f32 %v7951_v6, %v3754_v24 }
 0x603   : > { %v3886_v35 = vadd.f32 %v7956_v14, %v3848_v58 }
 0x604   : > { %v3885_v1 = vadd.f32 %v7956_v14, %v3847_v44 }
 0x605   : > { %v3918_v47 = vmax.f32 %v3886_v35, 0.0 }
 0x606   : > { %v3917_v0 = vmax.f32 %v3885_v1, 0.0 }
 0x607   : > { %v3950_v53 = vadd.f32 %v3918_v47, %v9069_v17  ;;  %v9079_v47 = vld [vmem:[#allocation36_spill] sm:$0xff]  ;;  %v9080_v17 = vld [vmem:[#allocation35_spill] sm:$0xff] }
 0x608   : > { %v3949_v56 = vadd.f32 %v3917_v0, %v9070_v63 }
 0x609   : > { %3982 = vst.msk [vmem:[%s7973_s28 + $0x98] sm:$0xff] %vm279_vm0, %v3950_v53 }
 0x60a   : > { %3981 = vst.msk [vmem:[%s7973_s28 + $0x90] sm:$0xff] %vm279_vm0, %v3949_v56 }
 0x617   : > { %v4307_v25 = vpop.f32.mrb[20].mxu1 }
 0x618   : > { %v3850_v27 = vmul.f32 %v4307_v25, %v7951_v6  ;;  %v3764_v19 = vpop.f32.mrb[21].mxu1 }
 0x619   : > { %v3849_v42 = vmul.f32 %v7951_v6, %v3764_v19 }
 0x61a   : > { %v3888_v12 = vadd.f32 %v7956_v14, %v3850_v27 }
 0x61b   : > { %v3887_v30 = vadd.f32 %v7956_v14, %v3849_v42 }
 0x61c   : > { %v3920_v28 = vmax.f32 %v3888_v12, 0.0 }
 0x61d   : > { %v3919_v54 = vmax.f32 %v3887_v30, 0.0 }
 0x61e   : > { %v3952_v59 = vadd.f32 %v3920_v28, %v9071_v7  ;;  %v9081_v28 = vld [vmem:[#allocation59_spill] sm:$0xff] }
 0x61f   : > { %v3951_v23 = vadd.f32 %v3919_v54, %v9072_v22  ;;  %v9082_v7 = vld [vmem:[#allocation55_spill] sm:$0xff] }
 0x620   : > { %3984 = vst.msk [vmem:[%s7973_s28 + $0xa8] sm:$0xff] %vm279_vm0, %v3952_v59 }
 0x621   : > { %3983 = vst.msk [vmem:[%s7973_s28 + $0xa0] sm:$0xff] %vm279_vm0, %v3951_v23 }
 0x62f   : > { %v4310_v2 = vpop.f32.mrb[22].mxu1 }
 0x630   : > { %v3852_v38 = vmul.f32 %v4310_v2, %v7951_v6  ;;  %v3774_v48 = vpop.f32.mrb[23].mxu1 }
 0x631   : > { %v3851_v41 = vmul.f32 %v7951_v6, %v3774_v48 }
 0x632   : > { %v3890_v16 = vadd.f32 %v7956_v14, %v3852_v38 }
 0x633   : > { %v3889_v36 = vadd.f32 %v7956_v14, %v3851_v41 }
 0x634   : > { %v3922_v61 = vmax.f32 %v3890_v16, 0.0 }
 0x635   : > { %v3921_v34 = vmax.f32 %v3889_v36, 0.0 }
 0x636   : > { %v3954_v40 = vadd.f32 %v3922_v61, %v9073_v50 }
 0x637   : > { %v3953_v39 = vadd.f32 %v3921_v34, %v9074_v21 }
 0x638   : > { %3986 = vst.msk [vmem:[%s7973_s28 + $0xb8] sm:$0xff] %vm279_vm0, %v3954_v40 }
 0x639   : > { %3985 = vst.msk [vmem:[%s7973_s28 + $0xb0] sm:$0xff] %vm279_vm0, %v3953_v39 }
 0x647   : > { %v4313_v57 = vpop.f32.mrb[24].mxu1 }
 0x648   : > { %v3854_v29 = vmul.f32 %v4313_v57, %v7951_v6  ;;  %v3784_v37 = vpop.f32.mrb[25].mxu1 }
 0x649   : > { %v3853_v60 = vmul.f32 %v7951_v6, %v3784_v37 }
 0x64a   : > { %v3892_v33 = vadd.f32 %v7956_v14, %v3854_v29 }
 0x64b   : > { %v3891_v15 = vadd.f32 %v7956_v14, %v3853_v60 }
 0x64c   : > { %v3924_v52 = vmax.f32 %v3892_v33, 0.0 }
 0x64d   : > { %v3923_v10 = vmax.f32 %v3891_v15, 0.0 }
 0x64e   : > { %v3956_v45 = vadd.f32 %v3924_v52, %v9075_v51 }
 0x64f   : > { %v3955_v26 = vadd.f32 %v3923_v10, %v9076_v32 }
 0x650   : > { %3988 = vst.msk [vmem:[%s7973_s28 + $0xc8] sm:$0xff] %vm279_vm0, %v3956_v45 }
 0x651   : > { %3987 = vst.msk [vmem:[%s7973_s28 + $0xc0] sm:$0xff] %vm279_vm0, %v3955_v26 }
 0x65f   : > { %v4316_v4 = vpop.f32.mrb[26].mxu1 }
 0x660   : > { %v3856_v13 = vmul.f32 %v4316_v4, %v7951_v6  ;;  %v3794_v8 = vpop.f32.mrb[27].mxu1 }
 0x661   : > { %v3855_v49 = vmul.f32 %v7951_v6, %v3794_v8 }
 0x662   : > { %v3894_v46 = vadd.f32 %v7956_v14, %v3856_v13 }
 0x663   : > { %v3893_v62 = vadd.f32 %v7956_v14, %v3855_v49 }
 0x664   : > { %v3926_v55 = vmax.f32 %v3894_v46, 0.0 }
 0x665   : > { %v3925_v31 = vmax.f32 %v3893_v62, 0.0 }
 0x666   : > { %v3958_v3 = vadd.f32 %v3926_v55, %v9077_v20 }
 0x667   : > { %v3957_v9 = vadd.f32 %v3925_v31, %v9078_v11 }
 0x668   : > { %3990 = vst.msk [vmem:[%s7973_s28 + $0xd8] sm:$0xff] %vm279_vm0, %v3958_v3 }
 0x669   : > { %3989 = vst.msk [vmem:[%s7973_s28 + $0xd0] sm:$0xff] %vm279_vm0, %v3957_v9 }
 0x677   : > { %v4319_v18 = vpop.f32.mrb[28].mxu1 }
 0x678   : > { %v3858_v5 = vmul.f32 %v4319_v18, %v7951_v6  ;;  %v3804_v43 = vpop.f32.mrb[29].mxu1 }
 0x679   : > { %v3857_v58 = vmul.f32 %v7951_v6, %v3804_v43 }
 0x67a   : > { %v3896_v24 = vadd.f32 %v7956_v14, %v3858_v5 }
 0x67b   : > { %v3895_v44 = vadd.f32 %v7956_v14, %v3857_v58 }
 0x67c   : > { %v3928_v35 = vmax.f32 %v3896_v24, 0.0 }
 0x67d   : > { %v3927_v1 = vmax.f32 %v3895_v44, 0.0 }
 0x67e   : > { %v3960_v0 = vadd.f32 %v3928_v35, %v9079_v47 }
 0x67f   : > { %v3959_v53 = vadd.f32 %v3927_v1, %v9080_v17 }
 0x680   : > { %3992 = vst.msk [vmem:[%s7973_s28 + $0xe8] sm:$0xff] %vm279_vm0, %v3960_v0 }
 0x681   : > { %3991 = vst.msk [vmem:[%s7973_s28 + $0xe0] sm:$0xff] %vm279_vm0, %v3959_v53 }
 0x684   : > { %v4322_v63 = vpop.f32.mrb[30].mxu1 }
 0x685   : > { %v3860_v56 = vmul.f32 %v4322_v63, %v7951_v6  ;;  %v3814_v25 = vpop.f32.mrb[31].mxu1 }
 0x686   : > { %v3859_v27 = vmul.f32 %v7951_v6, %v3814_v25 }
 0x687   : > { %v3898_v19 = vadd.f32 %v7956_v14, %v3860_v56 }
 0x688   : > { %v3897_v42 = vadd.f32 %v7956_v14, %v3859_v27 }
 0x689   : > { %v3930_v12 = vmax.f32 %v3898_v19, 0.0 }
 0x68a   : > { %v3929_v30 = vmax.f32 %v3897_v42, 0.0 }
 0x68b   : > { %v3962_v54 = vadd.f32 %v3930_v12, %v9081_v28 }
 0x68c   : > { %v3961_v59 = vadd.f32 %v3929_v30, %v9082_v7 }
 0x68d   : > { %3994 = vst.msk [vmem:[%s7973_s28 + $0xf8] sm:$0xff] %vm279_vm0, %v3962_v54 }
 0x68e   : > { %3993 = vst.msk [vmem:[%s7973_s28 + $0xf0] sm:$0xff] %vm279_vm0, %v3961_v59 }
 0x68f PF: > { %s17_s24 = sadd.s32 1, %s4426_s24  }
 0x690   : > { %p14_p4 = scmp.ge.s32.totalorder %s17_s24, 4  }
 0x692   :  { %16 = sbr.rel (!%p14_p4) target bundleno = 1 (0x1), region = 80 }

</bundles_post_ra>
